<compile_context>
chip_gen: v7x
topology: tpu7x:2x2x1
jax: 0.10.0
libtpu: 0.0.40
codegen_flags: <defaults>
</compile_context>

<pallas_src>
import math

import jax
import jax.numpy as jnp
from jax.experimental import pallas as pl
from jax.experimental.pallas import tpu as pltpu


_COMPUTE_DTYPE = jnp.bfloat16
_HAS_BUFFERED = hasattr(pl, "Buffered")


def _vmem_limit_bytes():
    """Per-generation scoped-VMEM limit with headroom under physical capacity."""
    cap = None
    try:
        cap = getattr(pltpu.get_tpu_info(), "vmem_capacity_bytes", None)
    except Exception:
        cap = None
    if cap is None:
        cap = 64 * 1024 * 1024            # conservative default (v7x-sized)
    if cap >= 96 * 1024 * 1024:           # v5e / v6e: 128 MiB physical
        return 100 * 1024 * 1024
    return 48 * 1024 * 1024               # v7x: 64 MiB physical, leave spill headroom


def _layernorm(x, eps=1e-6):
    # nn.LayerNorm(elementwise_affine=False, eps=1e-6): biased variance.
    mu = jnp.mean(x, axis=-1, keepdims=True)
    var = jnp.mean((x - mu) ** 2, axis=-1, keepdims=True)
    return (x - mu) * jax.lax.rsqrt(var + eps)


def _gelu_tanh(x):
    # nn.GELU(approximate='tanh')
    c = math.sqrt(2.0 / math.pi)
    return 0.5 * x * (1.0 + jnp.tanh(c * (x + 0.044715 * x * x * x)))


# --------------------------- kernel A: norm1 + QKV ---------------------------
def qkv_kernel(x_ref, wqkv_ref, bqkv_ref, q_ref, k_ref, v_ref):
    x = x_ref[0]                                   # (tn, C) f32
    C = q_ref.shape[-1]
    xn = _layernorm(x).astype(wqkv_ref.dtype)      # bf16 MXU operand
    qkv = jnp.dot(xn, wqkv_ref[...], preferred_element_type=jnp.float32)
    qkv = qkv + bqkv_ref[0]                        # attn scale already folded into Q part
    q_ref[0] = qkv[:, 0 * C:1 * C].astype(q_ref.dtype)   # static lane-aligned slices
    k_ref[0] = qkv[:, 1 * C:2 * C].astype(k_ref.dtype)
    v_ref[0] = qkv[:, 2 * C:3 * C].astype(v_ref.dtype)


# ------------------ kernel B: flash attention (one head/step) ----------------
def flash_attn_kernel(q_ref, k_ref, v_ref, o_ref, m_sc, l_sc, acc_sc):
    ki = pl.program_id(3)

    @pl.when(ki == 0)
    def _():
        m_sc[...] = jnp.full_like(m_sc, -jnp.inf)
        l_sc[...] = jnp.zeros_like(l_sc)
        acc_sc[...] = jnp.zeros_like(acc_sc)

    q = q_ref[0]     # (tq, hd)  bf16, Q pre-scaled via weight folding
    k = k_ref[0]     # (tkv, hd) bf16
    v = v_ref[0]     # (tkv, hd) bf16

    s = jnp.einsum('qd,kd->qk', q, k, preferred_element_type=jnp.float32)
    m_prev = m_sc[...]
    m_new = jnp.maximum(m_prev, jnp.max(s, axis=-1, keepdims=True))
    alpha = jnp.exp(m_prev - m_new)
    p = jnp.exp(s - m_new)
    l_sc[...] = alpha * l_sc[...] + jnp.sum(p, axis=-1, keepdims=True)
    acc_sc[...] = alpha * acc_sc[...] + jnp.dot(
        p.astype(v.dtype), v, preferred_element_type=jnp.float32)
    m_sc[...] = m_new

    # NOTE: this init/finalize gating is tied to the kv axis being the LAST,
    # "arbitrary" grid dimension — keep them in sync if the grid ever changes.
    @pl.when(ki == pl.num_programs(3) - 1)
    def _():
        inv_l = pl.reciprocal(l_sc[...], approx=False)   # once per (b,h,q-tile): exact
        o_ref[0] = (acc_sc[...] * inv_l).astype(o_ref.dtype)


# ---------- kernel C: out-proj + residual + norm2 + MLP + residual -----------
def proj_mlp_kernel(x_ref, a_ref, wproj_ref, bproj_ref,
                    w1_ref, b1_ref, w2_ref, b2_ref, o_ref):
    x = x_ref[0]            # (tn, C) f32 residual path stays f32
    a = a_ref[0]            # (tn, C) bf16 attention output (already head-merged by layout)
    proj = jnp.dot(a, wproj_ref[...], preferred_element_type=jnp.float32) + bproj_ref[0]
    x1 = x + proj
    xn2 = _layernorm(x1).astype(w1_ref.dtype)
    h = jnp.dot(xn2, w1_ref[...], preferred_element_type=jnp.float32) + b1_ref[0]
    h = _gelu_tanh(h).astype(w2_ref.dtype)
    h2 = jnp.dot(h, w2_ref[...], preferred_element_type=jnp.float32) + b2_ref[0]
    o_ref[0] = (x1 + h2).astype(o_ref.dtype)


# --------------------------------- wrappers ----------------------------------
def prepare_params(params, num_heads, compute_dtype=_COMPUTE_DTYPE):
    """One-time weight transform: fold attention scale into Q cols, cast to bf16."""
    C = params["wproj"].shape[0]
    hd = C // num_heads
    scale = hd ** -0.5
    col_scale = jnp.concatenate([
        jnp.full((C,), scale, dtype=params["wqkv"].dtype),
        jnp.ones((2 * C,), dtype=params["wqkv"].dtype),
    ])
    wqkv = params["wqkv"] * col_scale[None, :]
    bqkv = params["bqkv"] * col_scale[None, :]
    return {
        "wqkv":  wqkv.astype(compute_dtype),
        "bqkv":  bqkv.astype(jnp.float32),
        "wproj": params["wproj"].astype(compute_dtype),
        "bproj": params["bproj"].astype(jnp.float32),
        "w1":    params["w1"].astype(compute_dtype),
        "b1":    params["b1"].astype(jnp.float32),
        "w2":    params["w2"].astype(compute_dtype),
        "b2":    params["b2"].astype(jnp.float32),
    }


def dit_block(x, p, num_heads, *, token_tile=256, q_tile=256, kv_tile=256,
              single_buffer_weights=_HAS_BUFFERED):
    B, N, C = x.shape
    assert C % num_heads == 0
    hd = C // num_heads
    assert hd % 128 == 0, "head_dim must be lane-aligned for head-column BlockSpecs"
    H = p["w1"].shape[1]
    cdt = p["wqkv"].dtype

    tn = min(token_tile, N)
    tq = min(q_tile, N)
    tkv = min(kv_tile, N)
    assert N % tn == 0 and N % tq == 0 and N % tkv == 0

    vmem_limit = _vmem_limit_bytes()
    cp2 = pltpu.CompilerParams(dimension_semantics=("parallel", "parallel"),
                               vmem_limit_bytes=vmem_limit)
    cp4 = pltpu.CompilerParams(
        dimension_semantics=("parallel", "parallel", "parallel", "arbitrary"),
        vmem_limit_bytes=vmem_limit)

    def tok_spec():
        return pl.BlockSpec((1, tn, C), lambda b, t: (b, t, 0))

    def weight_spec(shape):
        # constant index_map -> one DMA ever; single-buffer to halve resident VMEM
        idx = lambda b, t, _n=len(shape): (0,) * _n
        if single_buffer_weights:
            return pl.BlockSpec(shape, idx, pipeline_mode=pl.Buffered(1))
        return pl.BlockSpec(shape, idx)

    # ---- A: norm1 + QKV projection (tiled over tokens) ----
    q, k, v = pl.pallas_call(
        qkv_kernel,
        out_shape=tuple(jax.ShapeDtypeStruct((B, N, C), cdt) for _ in range(3)),
        grid_spec=pltpu.PrefetchScalarGridSpec(
            num_scalar_prefetch=0,
            grid=(B, N // tn),
            in_specs=[
                tok_spec(),
                weight_spec((C, 3 * C)),
                weight_spec((1, 3 * C)),
            ],
            out_specs=(tok_spec(), tok_spec(), tok_spec()),
        ),
        compiler_params=cp2,
    )(x, p["wqkv"], p["bqkv"])

    # ---- B: flash attention, grid (B, heads, q-tiles, kv-tiles) ----
    # Head split/merge is done purely by lane-aligned BlockSpec column slicing of the
    # (B, N, C) tensors: no XLA reshape/transpose round trips through HBM.
    attn = pl.pallas_call(
        flash_attn_kernel,
        out_shape=jax.ShapeDtypeStruct((B, N, C), cdt),
        grid_spec=pltpu.PrefetchScalarGridSpec(
            num_scalar_prefetch=0,
            grid=(B, num_heads, N // tq, N // tkv),
            in_specs=[
                pl.BlockSpec((1, tq, hd),  lambda b, h, qi, ki: (b, qi, h)),
                pl.BlockSpec((1, tkv, hd), lambda b, h, qi, ki: (b, ki, h)),
                pl.BlockSpec((1, tkv, hd), lambda b, h, qi, ki: (b, ki, h)),
            ],
            out_specs=pl.BlockSpec((1, tq, hd), lambda b, h, qi, ki: (b, qi, h)),
            scratch_shapes=[
                pltpu.VMEM((tq, 1), jnp.float32),    # running max
                pltpu.VMEM((tq, 1), jnp.float32),    # running denom
                pltpu.VMEM((tq, hd), jnp.float32),   # output accumulator
            ],
        ),
        compiler_params=cp4,
    )(q, k, v)

    # ---- C: out-proj + residual + norm2 + MLP + residual (tiled over tokens) ----
    out = pl.pallas_call(
        proj_mlp_kernel,
        out_shape=jax.ShapeDtypeStruct((B, N, C), x.dtype),
        grid_spec=pltpu.PrefetchScalarGridSpec(
            num_scalar_prefetch=0,
            grid=(B, N // tn),
            in_specs=[
                tok_spec(),                                      # x (residual)
                tok_spec(),                                      # attention output
                weight_spec((C, C)),
                weight_spec((1, C)),
                weight_spec((C, H)),
                weight_spec((1, H)),
                weight_spec((H, C)),
                weight_spec((1, C)),
            ],
            out_specs=tok_spec(),
        ),
        compiler_params=cp2,
    )(x, attn, p["wproj"], p["bproj"], p["w1"], p["b1"], p["w2"], p["b2"])
    return out


def dit_block_ref(x, params, num_heads):
    """Pure-JAX f32 reference mirroring the PyTorch forward, for verification."""
    B, N, C = x.shape
    hd = C // num_heads
    scale = hd ** -0.5

    xn = _layernorm(x)
    qkv = xn @ params["wqkv"] + params["bqkv"][0]                # (B, N, 3C)
    qkv = qkv.reshape(B, N, 3, num_heads, hd).transpose(2, 0, 3, 1, 4)
    q, k, v = qkv[0], qkv[1], qkv[2]                             # (B, H, N, hd)
    s = (q * scale) @ jnp.swapaxes(k, -1, -2)                    # (B, H, N, N)
    p = jax.nn.softmax(s, axis=-1)
    o = (p @ v).transpose(0, 2, 1, 3).reshape(B, N, C)
    o = o @ params["wproj"] + params["bproj"][0]
    x1 = x + o

    xn2 = _layernorm(x1)
    h = _gelu_tanh(xn2 @ params["w1"] + params["b1"][0])
    return x1 + (h @ params["w2"] + params["b2"][0])


if __name__ == "__main__":
    # Small but lane-dense config: C and head_dim are multiples of 128.
    B, N, C = 2, 256, 256
    num_heads = 2            # head_dim = 128
    mlp_ratio = 4.0
    H = int(C * mlp_ratio)

    key = jax.random.PRNGKey(0)
    ks = jax.random.split(key, 10)
    f32 = jnp.float32

    x = jax.random.normal(ks[0], (B, N, C), dtype=f32)
    params = {
        "wqkv":  0.02 * jax.random.normal(ks[1], (C, 3 * C), dtype=f32),
        "bqkv":  0.02 * jax.random.normal(ks[2], (1, 3 * C), dtype=f32),
        "wproj": 0.02 * jax.random.normal(ks[3], (C, C), dtype=f32),
        "bproj": 0.02 * jax.random.normal(ks[4], (1, C), dtype=f32),
        "w1":    0.02 * jax.random.normal(ks[5], (C, H), dtype=f32),
        "b1":    0.02 * jax.random.normal(ks[6], (1, H), dtype=f32),
        "w2":    0.02 * jax.random.normal(ks[7], (H, C), dtype=f32),
        "b2":    0.02 * jax.random.normal(ks[8], (1, C), dtype=f32),
    }

    prep = prepare_params(params, num_heads)
    try:
        out = jax.block_until_ready(dit_block(x, prep, num_heads))
    except Exception:
        # pipeline_mode=pl.Buffered(1) unsupported on this jax build -> default buffering
        out = jax.block_until_ready(
            dit_block(x, prep, num_heads, single_buffer_weights=False))

    ref = jax.block_until_ready(dit_block_ref(x, params, num_heads))
    assert out.shape == (B, N, C)
    max_err = float(jnp.max(jnp.abs(out - ref)))
    # bf16 matmul operands -> looser tolerance than pure f32
    assert jnp.allclose(out, ref, atol=2e-2, rtol=2e-2), max_err

    print("KERNEL_OK")
</pallas_src>

<mosaic_0001>
module attributes {stable_mosaic.version = 11 : i64} {
  func.func @qkv_kernel(%arg0: i32, %arg1: i32, %arg2: memref<1x256x256xf32, #tpu.memory_space<vmem>>, %arg3: memref<256x768xbf16, #tpu.memory_space<vmem>>, %arg4: memref<1x768xf32, #tpu.memory_space<vmem>>, %arg5: memref<1x256x256xbf16, #tpu.memory_space<vmem>>, %arg6: memref<1x256x256xbf16, #tpu.memory_space<vmem>>, %arg7: memref<1x256x256xbf16, #tpu.memory_space<vmem>>) attributes {dimension_semantics = [#tpu.dimension_semantics<parallel>, #tpu.dimension_semantics<parallel>], iteration_bounds = array<i64: 2, 1>, scalar_prefetch = 0 : i64, scratch_operands = 0 : i64, tpu.core_type = #tpu.core_type<tc>, window_params = [{transform_indices = @transform_0, window_bounds = array<i64: 1, 256, 256>}, {pipeline_mode = #tpu.pipeline_mode<synchronous>, transform_indices = @transform_1, window_bounds = array<i64: 256, 768>}, {pipeline_mode = #tpu.pipeline_mode<synchronous>, transform_indices = @transform_2, window_bounds = array<i64: 1, 768>}, {transform_indices = @transform_3, window_bounds = array<i64: 1, 256, 256>}, {transform_indices = @transform_4, window_bounds = array<i64: 1, 256, 256>}, {transform_indices = @transform_5, window_bounds = array<i64: 1, 256, 256>}]} {
    %c0 = arith.constant 0 : index
    %c0_0 = arith.constant 0 : index
    %c0_1 = arith.constant 0 : index
    %0 = vector.load %arg2[%c0, %c0_0, %c0_1] : memref<1x256x256xf32, #tpu.memory_space<vmem>>, vector<1x256x256xf32>
    %1 = vector.shape_cast %0 : vector<1x256x256xf32> to vector<256x256xf32>
    %cst = arith.constant dense<0.000000e+00> : vector<256xf32>
    %2 = vector.multi_reduction <add>, %1, %cst [1] : vector<256x256xf32> to vector<256xf32>
    %3 = vector.shape_cast %2 : vector<256xf32> to vector<256x1xf32>
    %cst_2 = arith.constant 2.560000e+02 : f32
    %4 = vector.broadcast %cst_2 : f32 to vector<256x1xf32>
    %5 = arith.divf %3, %4 : vector<256x1xf32>
    %6 = vector.broadcast %5 : vector<256x1xf32> to vector<256x256xf32>
    %7 = arith.subf %1, %6 : vector<256x256xf32>
    %8 = arith.mulf %7, %7 : vector<256x256xf32>
    %cst_3 = arith.constant dense<0.000000e+00> : vector<256xf32>
    %9 = vector.multi_reduction <add>, %8, %cst_3 [1] : vector<256x256xf32> to vector<256xf32>
    %10 = vector.shape_cast %9 : vector<256xf32> to vector<256x1xf32>
    %cst_4 = arith.constant 2.560000e+02 : f32
    %11 = vector.broadcast %cst_4 : f32 to vector<256x1xf32>
    %12 = arith.divf %10, %11 : vector<256x1xf32>
    %13 = vector.broadcast %5 : vector<256x1xf32> to vector<256x256xf32>
    %14 = arith.subf %1, %13 : vector<256x256xf32>
    %cst_5 = arith.constant 9.99999997E-7 : f32
    %15 = vector.broadcast %cst_5 : f32 to vector<256x1xf32>
    %16 = arith.addf %12, %15 : vector<256x1xf32>
    %17 = math.rsqrt %16 : vector<256x1xf32>
    %18 = vector.broadcast %17 : vector<256x1xf32> to vector<256x256xf32>
    %19 = arith.mulf %14, %18 : vector<256x256xf32>
    %20 = arith.truncf %19 : vector<256x256xf32> to vector<256x256xbf16>
    %c0_6 = arith.constant 0 : index
    %c0_7 = arith.constant 0 : index
    %21 = vector.load %arg3[%c0_6, %c0_7] : memref<256x768xbf16, #tpu.memory_space<vmem>>, vector<256x768xbf16>
    %cst_8 = arith.constant dense<0.000000e+00> : vector<256x768xf32>
    %22 = tpu.matmul %20, %21, %cst_8 {dimension_numbers = #tpu.dot_dimension_numbers<[1], [0], [0], [1], [0, 0, 1, 1], [], []>} : vector<256x256xbf16>, vector<256x768xbf16>, vector<256x768xf32> -> vector<256x768xf32>
    %c0_9 = arith.constant 0 : index
    %c0_10 = arith.constant 0 : index
    %23 = vector.load %arg4[%c0_9, %c0_10] : memref<1x768xf32, #tpu.memory_space<vmem>>, vector<1x768xf32>
    %24 = vector.shape_cast %23 : vector<1x768xf32> to vector<768xf32>
    %25 = vector.shape_cast %24 : vector<768xf32> to vector<1x768xf32>
    %26 = vector.broadcast %25 : vector<1x768xf32> to vector<256x768xf32>
    %27 = arith.addf %22, %26 : vector<256x768xf32>
    %28 = vector.extract_strided_slice %27 {offsets = [0, 0], sizes = [256, 256], strides = [1, 1]} : vector<256x768xf32> to vector<256x256xf32>
    %29 = arith.truncf %28 : vector<256x256xf32> to vector<256x256xbf16>
    %c0_11 = arith.constant 0 : index
    %c0_12 = arith.constant 0 : index
    %c0_13 = arith.constant 0 : index
    %30 = vector.load %arg5[%c0_11, %c0_12, %c0_13] : memref<1x256x256xbf16, #tpu.memory_space<vmem>>, vector<1x256x256xbf16>
    %31 = vector.shape_cast %30 : vector<1x256x256xbf16> to vector<256x256xbf16>
    %32 = vector.shape_cast %29 : vector<256x256xbf16> to vector<1x256x256xbf16>
    tpu.vector_store %arg5[%c0_11, %c0_12, %c0_13], %32 {strides = array<i32>} : memref<1x256x256xbf16, #tpu.memory_space<vmem>>, vector<1x256x256xbf16>,
    %33 = vector.extract_strided_slice %27 {offsets = [0, 256], sizes = [256, 256], strides = [1, 1]} : vector<256x768xf32> to vector<256x256xf32>
    %34 = arith.truncf %33 : vector<256x256xf32> to vector<256x256xbf16>
    %c0_14 = arith.constant 0 : index
    %c0_15 = arith.constant 0 : index
    %c0_16 = arith.constant 0 : index
    %35 = vector.load %arg6[%c0_14, %c0_15, %c0_16] : memref<1x256x256xbf16, #tpu.memory_space<vmem>>, vector<1x256x256xbf16>
    %36 = vector.shape_cast %35 : vector<1x256x256xbf16> to vector<256x256xbf16>
    %37 = vector.shape_cast %34 : vector<256x256xbf16> to vector<1x256x256xbf16>
    tpu.vector_store %arg6[%c0_14, %c0_15, %c0_16], %37 {strides = array<i32>} : memref<1x256x256xbf16, #tpu.memory_space<vmem>>, vector<1x256x256xbf16>,
    %38 = vector.extract_strided_slice %27 {offsets = [0, 512], sizes = [256, 256], strides = [1, 1]} : vector<256x768xf32> to vector<256x256xf32>
    %39 = arith.truncf %38 : vector<256x256xf32> to vector<256x256xbf16>
    %c0_17 = arith.constant 0 : index
    %c0_18 = arith.constant 0 : index
    %c0_19 = arith.constant 0 : index
    %40 = vector.load %arg7[%c0_17, %c0_18, %c0_19] : memref<1x256x256xbf16, #tpu.memory_space<vmem>>, vector<1x256x256xbf16>
    %41 = vector.shape_cast %40 : vector<1x256x256xbf16> to vector<256x256xbf16>
    %42 = vector.shape_cast %39 : vector<256x256xbf16> to vector<1x256x256xbf16>
    tpu.vector_store %arg7[%c0_17, %c0_18, %c0_19], %42 {strides = array<i32>} : memref<1x256x256xbf16, #tpu.memory_space<vmem>>, vector<1x256x256xbf16>,
    return
  }
  func.func @transform_0(%arg0: i32, %arg1: i32) -> (i32, i32, i32) {
    %c0_i32 = arith.constant 0 : i32
    %c0_i32_0 = arith.constant 0 : i32
    return %arg0, %arg1, %c0_i32 : i32, i32, i32
  }
  func.func @transform_1(%arg0: i32, %arg1: i32) -> (i32, i32) {
    %c0_i32 = arith.constant 0 : i32
    %c0_i32_0 = arith.constant 0 : i32
    %c0_i32_1 = arith.constant 0 : i32
    return %c0_i32, %c0_i32_0 : i32, i32
  }
  func.func @transform_2(%arg0: i32, %arg1: i32) -> (i32, i32) {
    %c0_i32 = arith.constant 0 : i32
    %c0_i32_0 = arith.constant 0 : i32
    %c0_i32_1 = arith.constant 0 : i32
    return %c0_i32, %c0_i32_0 : i32, i32
  }
  func.func @transform_3(%arg0: i32, %arg1: i32) -> (i32, i32, i32) {
    %c0_i32 = arith.constant 0 : i32
    %c0_i32_0 = arith.constant 0 : i32
    return %arg0, %arg1, %c0_i32 : i32, i32, i32
  }
  func.func @transform_4(%arg0: i32, %arg1: i32) -> (i32, i32, i32) {
    %c0_i32 = arith.constant 0 : i32
    %c0_i32_0 = arith.constant 0 : i32
    return %arg0, %arg1, %c0_i32 : i32, i32, i32
  }
  func.func @transform_5(%arg0: i32, %arg1: i32) -> (i32, i32, i32) {
    %c0_i32 = arith.constant 0 : i32
    %c0_i32_0 = arith.constant 0 : i32
    return %arg0, %arg1, %c0_i32 : i32, i32, i32
  }
}

module attributes {stable_mosaic.version = 11 : i64} {
  func.func @qkv_kernel(%arg0: i32, %arg1: i32, %arg2: memref<1x256x256xf32, #tpu.memory_space<vmem>>, %arg3: memref<256x768xbf16, #tpu.memory_space<vmem>>, %arg4: memref<1x768xf32, #tpu.memory_space<vmem>>, %arg5: memref<1x256x256xbf16, #tpu.memory_space<vmem>>, %arg6: memref<1x256x256xbf16, #tpu.memory_space<vmem>>, %arg7: memref<1x256x256xbf16, #tpu.memory_space<vmem>>) attributes {dimension_semantics = [#tpu.dimension_semantics<parallel>, #tpu.dimension_semantics<parallel>], iteration_bounds = array<i64: 2, 1>, scalar_prefetch = 0 : i64, scratch_operands = 0 : i64, tpu.core_type = #tpu.core_type<tc>, window_params = [{transform_indices = @transform_0, window_bounds = array<i64: 1, 256, 256>}, {pipeline_mode = #tpu.pipeline_mode<synchronous>, transform_indices = @transform_1, window_bounds = array<i64: 256, 768>}, {pipeline_mode = #tpu.pipeline_mode<synchronous>, transform_indices = @transform_2, window_bounds = array<i64: 1, 768>}, {transform_indices = @transform_3, window_bounds = array<i64: 1, 256, 256>}, {transform_indices = @transform_4, window_bounds = array<i64: 1, 256, 256>}, {transform_indices = @transform_5, window_bounds = array<i64: 1, 256, 256>}]} {
    %c0 = arith.constant 0 : index
    %c0_0 = arith.constant 0 : index
    %c0_1 = arith.constant 0 : index
    %0 = vector.load %arg2[%c0, %c0_0, %c0_1] : memref<1x256x256xf32, #tpu.memory_space<vmem>>, vector<1x256x256xf32>
    %1 = vector.shape_cast %0 : vector<1x256x256xf32> to vector<256x256xf32>
    %cst = arith.constant dense<0.000000e+00> : vector<256xf32>
    %2 = vector.multi_reduction <add>, %1, %cst [1] : vector<256x256xf32> to vector<256xf32>
    %3 = vector.shape_cast %2 : vector<256xf32> to vector<256x1xf32>
    %cst_2 = arith.constant 2.560000e+02 : f32
    %4 = vector.broadcast %cst_2 : f32 to vector<256x1xf32>
    %5 = arith.divf %3, %4 : vector<256x1xf32>
    %6 = vector.broadcast %5 : vector<256x1xf32> to vector<256x256xf32>
    %7 = arith.subf %1, %6 : vector<256x256xf32>
    %8 = arith.mulf %7, %7 : vector<256x256xf32>
    %cst_3 = arith.constant dense<0.000000e+00> : vector<256xf32>
    %9 = vector.multi_reduction <add>, %8, %cst_3 [1] : vector<256x256xf32> to vector<256xf32>
    %10 = vector.shape_cast %9 : vector<256xf32> to vector<256x1xf32>
    %cst_4 = arith.constant 2.560000e+02 : f32
    %11 = vector.broadcast %cst_4 : f32 to vector<256x1xf32>
    %12 = arith.divf %10, %11 : vector<256x1xf32>
    %13 = vector.broadcast %5 : vector<256x1xf32> to vector<256x256xf32>
    %14 = arith.subf %1, %13 : vector<256x256xf32>
    %cst_5 = arith.constant 9.99999997E-7 : f32
    %15 = vector.broadcast %cst_5 : f32 to vector<256x1xf32>
    %16 = arith.addf %12, %15 : vector<256x1xf32>
    %17 = math.rsqrt %16 : vector<256x1xf32>
    %18 = vector.broadcast %17 : vector<256x1xf32> to vector<256x256xf32>
    %19 = arith.mulf %14, %18 : vector<256x256xf32>
    %20 = arith.truncf %19 : vector<256x256xf32> to vector<256x256xbf16>
    %c0_6 = arith.constant 0 : index
    %c0_7 = arith.constant 0 : index
    %21 = vector.load %arg3[%c0_6, %c0_7] : memref<256x768xbf16, #tpu.memory_space<vmem>>, vector<256x768xbf16>
    %cst_8 = arith.constant dense<0.000000e+00> : vector<256x768xf32>
    %22 = tpu.matmul %20, %21, %cst_8 {dimension_numbers = #tpu.dot_dimension_numbers<[1], [0], [0], [1], [0, 0, 1, 1], [], []>} : vector<256x256xbf16>, vector<256x768xbf16>, vector<256x768xf32> -> vector<256x768xf32>
    %c0_9 = arith.constant 0 : index
    %c0_10 = arith.constant 0 : index
    %23 = vector.load %arg4[%c0_9, %c0_10] : memref<1x768xf32, #tpu.memory_space<vmem>>, vector<1x768xf32>
    %24 = vector.shape_cast %23 : vector<1x768xf32> to vector<768xf32>
    %25 = vector.shape_cast %24 : vector<768xf32> to vector<1x768xf32>
    %26 = vector.broadcast %25 : vector<1x768xf32> to vector<256x768xf32>
    %27 = arith.addf %22, %26 : vector<256x768xf32>
    %28 = vector.extract_strided_slice %27 {offsets = [0, 0], sizes = [256, 256], strides = [1, 1]} : vector<256x768xf32> to vector<256x256xf32>
    %29 = arith.truncf %28 : vector<256x256xf32> to vector<256x256xbf16>
    %c0_11 = arith.constant 0 : index
    %c0_12 = arith.constant 0 : index
    %c0_13 = arith.constant 0 : index
    %30 = vector.load %arg5[%c0_11, %c0_12, %c0_13] : memref<1x256x256xbf16, #tpu.memory_space<vmem>>, vector<1x256x256xbf16>
    %31 = vector.shape_cast %30 : vector<1x256x256xbf16> to vector<256x256xbf16>
    %32 = vector.shape_cast %29 : vector<256x256xbf16> to vector<1x256x256xbf16>
    tpu.vector_store %arg5[%c0_11, %c0_12, %c0_13], %32 {strides = array<i32>} : memref<1x256x256xbf16, #tpu.memory_space<vmem>>, vector<1x256x256xbf16>,
    %33 = vector.extract_strided_slice %27 {offsets = [0, 256], sizes = [256, 256], strides = [1, 1]} : vector<256x768xf32> to vector<256x256xf32>
    %34 = arith.truncf %33 : vector<256x256xf32> to vector<256x256xbf16>
    %c0_14 = arith.constant 0 : index
    %c0_15 = arith.constant 0 : index
    %c0_16 = arith.constant 0 : index
    %35 = vector.load %arg6[%c0_14, %c0_15, %c0_16] : memref<1x256x256xbf16, #tpu.memory_space<vmem>>, vector<1x256x256xbf16>
    %36 = vector.shape_cast %35 : vector<1x256x256xbf16> to vector<256x256xbf16>
    %37 = vector.shape_cast %34 : vector<256x256xbf16> to vector<1x256x256xbf16>
    tpu.vector_store %arg6[%c0_14, %c0_15, %c0_16], %37 {strides = array<i32>} : memref<1x256x256xbf16, #tpu.memory_space<vmem>>, vector<1x256x256xbf16>,
    %38 = vector.extract_strided_slice %27 {offsets = [0, 512], sizes = [256, 256], strides = [1, 1]} : vector<256x768xf32> to vector<256x256xf32>
    %39 = arith.truncf %38 : vector<256x256xf32> to vector<256x256xbf16>
    %c0_17 = arith.constant 0 : index
    %c0_18 = arith.constant 0 : index
    %c0_19 = arith.constant 0 : index
    %40 = vector.load %arg7[%c0_17, %c0_18, %c0_19] : memref<1x256x256xbf16, #tpu.memory_space<vmem>>, vector<1x256x256xbf16>
    %41 = vector.shape_cast %40 : vector<1x256x256xbf16> to vector<256x256xbf16>
    %42 = vector.shape_cast %39 : vector<256x256xbf16> to vector<1x256x256xbf16>
    tpu.vector_store %arg7[%c0_17, %c0_18, %c0_19], %42 {strides = array<i32>} : memref<1x256x256xbf16, #tpu.memory_space<vmem>>, vector<1x256x256xbf16>,
    return
  }
  func.func @transform_0(%arg0: i32, %arg1: i32) -> (i32, i32, i32) {
    %c0_i32 = arith.constant 0 : i32
    %c0_i32_0 = arith.constant 0 : i32
    return %arg0, %arg1, %c0_i32 : i32, i32, i32
  }
  func.func @transform_1(%arg0: i32, %arg1: i32) -> (i32, i32) {
    %c0_i32 = arith.constant 0 : i32
    %c0_i32_0 = arith.constant 0 : i32
    %c0_i32_1 = arith.constant 0 : i32
    return %c0_i32, %c0_i32_0 : i32, i32
  }
  func.func @transform_2(%arg0: i32, %arg1: i32) -> (i32, i32) {
    %c0_i32 = arith.constant 0 : i32
    %c0_i32_0 = arith.constant 0 : i32
    %c0_i32_1 = arith.constant 0 : i32
    return %c0_i32, %c0_i32_0 : i32, i32
  }
  func.func @transform_3(%arg0: i32, %arg1: i32) -> (i32, i32, i32) {
    %c0_i32 = arith.constant 0 : i32
    %c0_i32_0 = arith.constant 0 : i32
    return %arg0, %arg1, %c0_i32 : i32, i32, i32
  }
  func.func @transform_4(%arg0: i32, %arg1: i32) -> (i32, i32, i32) {
    %c0_i32 = arith.constant 0 : i32
    %c0_i32_0 = arith.constant 0 : i32
    return %arg0, %arg1, %c0_i32 : i32, i32, i32
  }
  func.func @transform_5(%arg0: i32, %arg1: i32) -> (i32, i32, i32) {
    %c0_i32 = arith.constant 0 : i32
    %c0_i32_0 = arith.constant 0 : i32
    return %arg0, %arg1, %c0_i32 : i32, i32, i32
  }
}

</mosaic_0001>

<bundles_post_ra>
// kernel: tpu_custom_call.1
= control target key start
LH: loop header
LB: loop body
LE: loop exit
PB: predicated region body
PF: predicated region fallthrough
CT: control target
= control target key end

     0   :  { %11 = vsyncpa [#allocation3], 0  ;;  %s5315_s0 = inlined_call_operand.hbm [shape: f32[2,256,256], index: 0, kind: input, shape index: {}]   ;;  %s5316_s1 = inlined_call_operand.hbm [shape: bf16[256,768], index: 1, kind: input, shape index: {}]   ;;  %s5317_s2 = inlined_call_operand.vmem [shape: f32[1,768], index: 2, kind: input, shape index: {}]   ;;  %s5318_s3 = inlined_call_operand.hbm [shape: bf16[2,256,256], index: 3, kind: output, shape index: {0}]   ;;  %s5319_s4 = inlined_call_operand.hbm [shape: bf16[2,256,256], index: 4, kind: output, shape index: {1}]   ;;  %s5320_s5 = inlined_call_operand.hbm [shape: bf16[2,256,256], index: 5, kind: output, shape index: {2}]  }
   0x1   :  { %13 = vsyncpa [#allocation3 + $0x1], 0 }
   0x2   :  { %14 = vsyncpa [#allocation6], 0 }
   0x3   :  { %15 = vsyncpa [#allocation4], 0 }
   0x4   :  { %17 = vsyncpa [#allocation4 + $0x1], 0 }
   0x5   :  { %18 = vsyncpa [#allocation9], 0 }
   0x6   :  { %20 = vsyncpa [#allocation9 + $0x1], 0  ;;  %s3893_s18 = smov 0   ;;  %s3895_s19 = smov 0  }
   0x7   :  { %s3897_s20 = smov 0   ;;  %s3899_s21 = smov 0  }
   0x8   :  { %s3901_s22 = smov 0   ;;  %s3903_s23 = smov 0  }
   0x9 LB: > { %s3924_s24 = sadd.s32 4294967295, %s3850_s23   ;;  %s5362_s25 = sadd.s32 4294967294, %s3850_s23   ;;  %s3850_s23 = sphi %s3903_s23, %s26_s23   ;;  %s3846_s22 = sphi %s3901_s22, %s5454_s22   ;;  %s3842_s21 = sphi %s3899_s21, %s5453_s21   ;;  %s3838_s20 = sphi %s3897_s20, %s5452_s20   ;;  %s3834_s19 = sphi %s3895_s19, %s5451_s19   ;;  %s3830_s18 = sphi %s3893_s18, %s5450_s18  }
   0xa   : > { %p60_p0 = scmp.ne.s32.totalorder %s3834_s19, %s3830_s18  ;;  %p5321_p1 = scmp.eq.s32.totalorder %s3924_s24, 0 }
   0xb   : > { %p134_p3 = scmp.eq.s32.totalorder %s5362_s25, 1  ;;  %p3002_p5 = scmp.ge.s32.totalorder %s3850_s23, 1 }
   0xc   : > { %p3935_p4 = por %p5321_p1, %p60_p0  ;;  %p197_p7 = scmp.lt.s32.totalorder %s3850_s23, 3 }
   0xd   : > { %p3940_p6 = por %p134_p3, %p60_p0  ;;  %s3852_s29 = smov [#allocation5]  }
   0xe   : > { %s5363_s26 = scalar_select %p3935_p4, 1, 0 }
   0xf   : > { %s5364_s27 = scalar_select %p3940_p6, 1, 0 }
  0x10   : > { %p3945_p8 = pnand %p3002_p5, %p197_p7  ;;  %s209_s30 = sshll.u32 %s3852_s29, 4  ;;  %s210_s30 = int_to_ptr.vmem [resolvable:$true] %s209_s30 }
  0x11   : > { %s38_s7 = sadd.s32 1, %s3846_s22  ;;  %s3646_s10 = scalar_lea.hbm %s5316_s1, 12288 }
  0x12   : > { %s5365_s28 = scalar_select %p3945_p8, 1, 0 }
  0x13   : > { %p3361_p9 = pneg %p3945_p8  ;;  %p3647_p12 = scmp.ne.s32.totalorder %s5316_s1, %s3646_s10 }
  0x14   : > { %p3653_p5 = scmp.lt.u32.totalorder %s3646_s10, %s5316_s1 }
  0x15   : > { %p3954_p11 = pnand %p3361_p9, %p5321_p1 }
  0x17   : > { %p3648_p13 = pneg %p3954_p11 }
  0x19   : > { %p3649_p0 = pnand %p3648_p13, %p3647_p12 }
  0x1b   : > { %p3650_p3 = pneg %p3649_p0 }
  0x1d   : > { %p3655_p7 = pnand %p3653_p5, %p3650_p3 }
  0x1f   : > { %3658 = shalt.err (!%p3655_p7)
}
  0x20   : > { %s3659_s15 = scalar_lea.vmem %s210_s30, 12288  ;;  %p3667_p2 = scmp.lt.s32.totalorder %s210_s30, %s210_s30 }
  0x21   : > { %p3660_p9 = scmp.ne.s32.totalorder %s210_s30, %s3659_s15  ;;  %p3668_p6 = scmp.lt.s32.totalorder %s3659_s15, %s3659_s15 }
  0x23   : > { %p3662_p10 = pnand %p3660_p9, %p3648_p13  ;;  %p3669_p4 = por %p3668_p6, %p3667_p2 }
  0x25   : > { %p3663_p1 = pneg %p3662_p10 }
  0x27   : > { %p3670_p8 = pnand %p3669_p4, %p3663_p1 }
  0x29   : > { %3673 = shalt.err (!%p3670_p8)
}
  0x2a   : > { %s3853_s16 = smov 384   ;;  %s3854_s17 = smov 24  }
  0x2b   : > { %3364 = dma.hbm_to_vmem [thread:$0]  (!%p3954_p11), %s5316_s1, 12288, %s210_s30, [#allocation6], %s3853_s16, %s3853_s16, %s3854_s17  }
  0x2c   : > { %p40_p1 = scmp.ge.s32.totalorder %s38_s7, 2  ;;  %s47_s9 = sadd.s32 1, %s3838_s20 }
  0x2d   : > { %p54_p2 = scmp.ne.s32.totalorder %s3838_s20, %s3834_s19  ;;  %p55_p4 = scmp.eq.s32.totalorder %s3850_s23, 0 }
  0x2e   : > { %s5456_s7 = smov (%p40_p1, %s38_s7), 0  ;;  %p5368_p8 = scmp.eq.s32.totalorder %s3924_s24, 1 }
  0x2f   : > { %p3981_p6 = por %p55_p4, %p54_p2  ;;  %s42_s6 = ssub.s32 %s3846_s22, %s5456_s7 }
  0x30   : > { %p3987_p10 = por %p5368_p8, %p54_p2  ;;  %p3380_p12 = scmp.lt.s32.totalorder %s3850_s23, 2 }
  0x31   : > { %p45_p11 = scmp.eq.s32.totalorder %s42_s6, 0  ;;  %s226_s30 = sand.u32 1, %s3838_s20  }
  0x32   : > { %s3005_s12 = sshll.u32 %s226_s30, 9  ;;  %s3217_s14 = sshll.u32 %s3846_s22, 13 }
  0x33   : > { %s3996_s13 = scalar_select %p45_p11, %s3838_s20, %s47_s9  }
  0x34   : > { %s4002_s17 = scalar_lea.hbm %s5315_s0, %s3217_s14  ;;  %s230_s29 = scalar_lea.vmem [#allocation2], %s3005_s12 }
  0x35   : > { %s240_s8 = sshll.u32 %s230_s29, 4  ;;  %p4008_p13 = pnand %p3380_p12, %p3981_p6  ;;  %s4004_s8 = int_to_ptr.vmem [resolvable:$true] %s240_s8 }
  0x36   : > { %s4012_s9 = scalar_lea.sflag [#allocation3], %s226_s30  ;;  %s3674_s15 = scalar_lea.hbm %s4002_s17, 8192 }
  0x37   : > { %p3675_p0 = scmp.ne.s32.totalorder %s4002_s17, %s3674_s15  ;;  %p3676_p3 = pneg %p4008_p13 }
  0x38   : > { %s3679_s10 = scalar_lea.hbm %s5315_s0, 16384  ;;  %p3680_p9 = scmp.lt.u32.totalorder %s4002_s17, %s5315_s0 }
  0x39   : > { %p3677_p5 = pnand %p3676_p3, %p3675_p0  ;;  %p3681_p1 = scmp.lt.u32.totalorder %s3679_s10, %s3674_s15 }
  0x3a   : > { %p3683_p4 = scmp.lt.u32.totalorder %s3674_s15, %s4002_s17 }
  0x3b   : > { %p3678_p7 = pneg %p3677_p5  ;;  %p3682_p2 = por %p3681_p1, %p3680_p9 }
  0x3d   : > { %p3684_p6 = por %p3683_p4, %p3682_p2 }
  0x3f   : > { %p3685_p8 = pnand %p3684_p6, %p3678_p7 }
  0x41   : > { %3688 = shalt.err (!%p3685_p8)
}
  0x42   : > { %s3689_s30 = scalar_lea.vmem %s4004_s8, 8192  ;;  %s3855_s12 = smov [#allocation2]  }
  0x43   : > { %p3690_p12 = scmp.ne.s32.totalorder %s4004_s8, %s3689_s30  ;;  %s3694_s14 = sshll.u32 %s3855_s12, 4  ;;  %s3695_s14 = int_to_ptr.vmem [resolvable:$false] %s3694_s14 }
  0x44   : > { %s3696_s16 = scalar_lea.vmem %s3695_s14, 16384  ;;  %p3697_p5 = scmp.lt.s32.totalorder %s4004_s8, %s3695_s14 }
  0x45   : > { %p3692_p11 = pnand %p3690_p12, %p3676_p3  ;;  %p3698_p9 = scmp.lt.s32.totalorder %s3696_s16, %s3689_s30 }
  0x47   : > { %p3693_p0 = pneg %p3692_p11  ;;  %p3699_p1 = por %p3698_p9, %p3697_p5 }
  0x49   : > { %p3700_p2 = pnand %p3699_p1, %p3693_p0 }
  0x4b   : > { %3703 = shalt.err (!%p3700_p2)
}
  0x4c   : > { %s3856_s15 = smov 256   ;;  %s3857_s10 = smov 16  }
  0x4d   : > { %3368 = dma.hbm_to_vmem [thread:$0]  (!%p4008_p13), %s4002_s17, 8192, %s4004_s8, %s4012_s9, %s3856_s15, %s3856_s15, %s3857_s10  }
  0x4e   : > { %p5371_p3 = scmp.ne.s32.totalorder %s5365_s28, 0 }
  0x50   : > { %252 = sbr.rel (%p5371_p3) target bundleno = 855 (0x357), region = 32 }
  0x57   : > { %s4043_s29 = sand.u32 1, %s3834_s19   ;;  %p5372_p7 = scmp.ne.s32.totalorder %s5363_s26, 0 }
  0x58   : > { %s3009_s30 = sshll.u32 %s4043_s29, 9  ;;  %s255_s12 = scalar_lea.sflag [#allocation3], %s4043_s29 }
  0x59   : > { %s4047_s14 = scalar_lea.vmem [#allocation2], %s3009_s30 }
  0x5a   : > { %3813 = dma.done.wait (%p5372_p7), %s255_s12, 8192  }
  0x5b   : > { %3815 = vsyncadd (%p5372_p7), %s255_s12, 4294959104  ;;  %p5373_p13 = scmp.eq.s32.totalorder %s3924_s24, 0 }
  0x5d   : > { %3817 = dma.done.wait (%p5373_p13), [#allocation6], 12288   ;;  %p5374_p4 = pmov %p5373_p13 }
  0x5e   : > { %v4058_v0 = vld [vmem:[%s4047_s14 + $0x100] sm:$0xff]  ;;  %v4061_v1 = vld [vmem:[%s4047_s14 + $0x108] sm:$0xff]  ;;  %v4064_v2 = vld [vmem:[%s4047_s14 + $0x110] sm:$0xff]  ;;  %s4863_s17 = sshll.u32 %s4043_s29, 8  ;;  %s4986_s6 = sshll.u32 %s3842_s21, 12 }
  0x5f   : > { %3819 = vsyncadd (%p5374_p4), [#allocation6], 4294955008  ;;  %v415_v3 = vadd.f32 %v4061_v1, %v4058_v0  ;;  %v4069_v4 = vld [vmem:[%s4047_s14 + $0x118] sm:$0xff]  ;;  %v4072_v5 = vld [vmem:[%s4047_s14] sm:$0xff]  ;;  %s4871_s8 = scalar_lea.vmem [#allocation7], %s4863_s17  ;;  %s4989_s9 = scalar_lea.vmem [#allocation8], %s4863_s17 }
  0x60   : > { %v4075_v6 = vld [vmem:[%s4047_s14 + $0x8] sm:$0xff]  ;;  %v4080_v8 = vld [vmem:[%s4047_s14 + $0x10] sm:$0xff]  ;;  %v418_v9 = vadd.f32 %v4069_v4, %v4064_v2  ;;  %v4085_v10 = vld [vmem:[%s4047_s14 + $0x18] sm:$0xff]  ;;  %s5000_s15 = scalar_lea.hbm %s5318_s3, %s4986_s6  ;;  %s2798_s10 = sshll.u32 %s4871_s8, 4  ;;  %s5004_s10 = int_to_ptr.vmem [resolvable:$true] %s2798_s10 }
  0x61   : > { %v367_v7 = vadd.f32 %v4075_v6, %v4072_v5  ;;  %416 = vadd.xlane.f32.xlu0 %v415_v3  ;;  %v4088_v11 = vld [vmem:[%s4047_s14 + $0x120] sm:$0xff]  ;;  %v4091_v12 = vld [vmem:[%s4047_s14 + $0x128] sm:$0xff]  ;;  %v370_v13 = vadd.f32 %v4085_v10, %v4080_v8  ;;  %v4096_v14 = vld [vmem:[%s4047_s14 + $0x130] sm:$0xff]  ;;  %s5007_s30 = scalar_lea.vmem [#allocation10], %s4863_s17  ;;  %s2772_s12 = scalar_lea.sflag [#allocation4], %s4043_s29 }
  0x62   : > { %v4099_v15 = vld [vmem:[%s4047_s14 + $0x138] sm:$0xff]  ;;  %v421_v16 = vadd.f32 %v4091_v12, %v4088_v11  ;;  %v4104_v17 = vld [vmem:[%s4047_s14 + $0x20] sm:$0xff]  ;;  %v4107_v18 = vld [vmem:[%s4047_s14 + $0x28] sm:$0xff]  ;;  %s3858_s26 = smov [#allocation7]  }
  0x63   : > { %368 = vadd.xlane.f32.xlu1 %v367_v7  ;;  %v424_v19 = vadd.f32 %v4099_v15, %v4096_v14  ;;  %v4112_v20 = vld [vmem:[%s4047_s14 + $0x30] sm:$0xff]  ;;  %v4115_v21 = vld [vmem:[%s4047_s14 + $0x38] sm:$0xff]  ;;  %v373_v22 = vadd.f32 %v4107_v18, %v4104_v17  ;;  %v4120_v23 = vld [vmem:[%s4047_s14 + $0x140] sm:$0xff]  ;;  %s3708_s28 = sshll.u32 %s3858_s26, 4  ;;  %s3709_s28 = int_to_ptr.vmem [resolvable:$false] %s3708_s28 }
  0x64   : > { %v4123_v24 = vld [vmem:[%s4047_s14 + $0x148] sm:$0xff]  ;;  %v376_v25 = vadd.f32 %v4115_v21, %v4112_v20  ;;  %v4128_v26 = vld [vmem:[%s4047_s14 + $0x150] sm:$0xff]  ;;  %v4131_v27 = vld [vmem:[%s4047_s14 + $0x158] sm:$0xff]  ;;  %p3711_p11 = scmp.lt.s32.totalorder %s5004_s10, %s3709_s28 }
  0x65   : > { %419 = vadd.xlane.f32.xlu0 %v418_v9  ;;  %v427_v28 = vadd.f32 %v4123_v24, %v4120_v23  ;;  %v4136_v29 = vld [vmem:[%s4047_s14 + $0x40] sm:$0xff]  ;;  %v4139_v30 = vld [vmem:[%s4047_s14 + $0x48] sm:$0xff]  ;;  %v430_v31 = vadd.f32 %v4131_v27, %v4128_v26  ;;  %v4144_v32 = vld [vmem:[%s4047_s14 + $0x50] sm:$0xff] }
  0x66   : > { %v4147_v33 = vld [vmem:[%s4047_s14 + $0x58] sm:$0xff]  ;;  %v379_v34 = vadd.f32 %v4139_v30, %v4136_v29  ;;  %v4152_v35 = vld [vmem:[%s4047_s14 + $0x160] sm:$0xff]  ;;  %v4155_v36 = vld [vmem:[%s4047_s14 + $0x168] sm:$0xff] }
  0x67   : > { %371 = vadd.xlane.f32.xlu1 %v370_v13  ;;  %v382_v37 = vadd.f32 %v4147_v33, %v4144_v32  ;;  %v4160_v38 = vld [vmem:[%s4047_s14 + $0x170] sm:$0xff]  ;;  %v4163_v39 = vld [vmem:[%s4047_s14 + $0x178] sm:$0xff]  ;;  %v4166_v40 = vld [vmem:[%s4047_s14 + $0x60] sm:$0xff]  ;;  %v433_v42 = vadd.f32 %v4155_v36, %v4152_v35 }
  0x68   : > { %v4169_v41 = vld [vmem:[%s4047_s14 + $0x68] sm:$0xff]  ;;  %v4174_v43 = vld [vmem:[%s4047_s14 + $0x70] sm:$0xff]  ;;  %v4177_v44 = vld [vmem:[%s4047_s14 + $0x78] sm:$0xff]  ;;  %v436_v45 = vadd.f32 %v4163_v39, %v4160_v38 }
  0x69   : > { %422 = vadd.xlane.f32.xlu0 %v421_v16  ;;  %v4182_v46 = vld [vmem:[%s4047_s14 + $0x180] sm:$0xff]  ;;  %v4185_v47 = vld [vmem:[%s4047_s14 + $0x188] sm:$0xff]  ;;  %v385_v48 = vadd.f32 %v4169_v41, %v4166_v40  ;;  %v4190_v49 = vld [vmem:[%s4047_s14 + $0x190] sm:$0xff]  ;;  %v388_v51 = vadd.f32 %v4177_v44, %v4174_v43 }
  0x6a   : > { %v4193_v50 = vld [vmem:[%s4047_s14 + $0x198] sm:$0xff]  ;;  %v4198_v52 = vld [vmem:[%s4047_s14 + $0x80] sm:$0xff]  ;;  %v4201_v53 = vld [vmem:[%s4047_s14 + $0x88] sm:$0xff]  ;;  %v439_v54 = vadd.f32 %v4185_v47, %v4182_v46 }
  0x6b   : > { %425 = vadd.xlane.f32.xlu1 %v424_v19  ;;  %v4206_v55 = vld [vmem:[%s4047_s14 + $0x90] sm:$0xff]  ;;  %v4209_v56 = vld [vmem:[%s4047_s14 + $0x98] sm:$0xff]  ;;  %v442_v57 = vadd.f32 %v4193_v50, %v4190_v49  ;;  %v4214_v58 = vld [vmem:[%s4047_s14 + $0x1a0] sm:$0xff]  ;;  %v391_v60 = vadd.f32 %v4201_v53, %v4198_v52 }
  0x6c   : > { %v4217_v59 = vld [vmem:[%s4047_s14 + $0x1a8] sm:$0xff]  ;;  %v4222_v61 = vld [vmem:[%s4047_s14 + $0x1b0] sm:$0xff]  ;;  %v4225_v62 = vld [vmem:[%s4047_s14 + $0x1b8] sm:$0xff]  ;;  %v394_v63 = vadd.f32 %v4209_v56, %v4206_v55 }
  0x6d   : > { %374 = vadd.xlane.f32.xlu0 %v373_v22  ;;  %v4230_v3 = vld [vmem:[%s4047_s14 + $0xa0] sm:$0xff]  ;;  %v4233_v7 = vld [vmem:[%s4047_s14 + $0xa8] sm:$0xff]  ;;  %v445_v9 = vadd.f32 %v4217_v59, %v4214_v58  ;;  %v4238_v13 = vld [vmem:[%s4047_s14 + $0xb0] sm:$0xff]  ;;  %v448_v19 = vadd.f32 %v4225_v62, %v4222_v61 }
  0x6e   : > { %v4241_v16 = vld [vmem:[%s4047_s14 + $0xb8] sm:$0xff]  ;;  %v4246_v22 = vld [vmem:[%s4047_s14 + $0x1c0] sm:$0xff] }
  0x6f   : > { %377 = vadd.xlane.f32.xlu1 %v376_v25  ;;  %v4249_v25 = vld [vmem:[%s4047_s14 + $0x1c8] sm:$0xff] }
  0x70   : > { %5375 = vst [vmem:[#allocation15_spill] sm:$0xff] %v4249_v25 }
  0x71   : > { %428 = vadd.xlane.f32.xlu0 %v427_v28  ;;  %v397_v28 = vadd.f32 %v4233_v7, %v4230_v3 }
  0x73   : > { %431 = vadd.xlane.f32.xlu1 %v430_v31  ;;  %v4254_v31 = vld [vmem:[%s4047_s14 + $0x1d0] sm:$0xff] }
  0x74   : > { %5376 = vst [vmem:[#allocation16_spill] sm:$0xff] %v4254_v31 }
  0x75   : > { %380 = vadd.xlane.f32.xlu0 %v379_v34  ;;  %v4257_v34 = vld [vmem:[%s4047_s14 + $0x1d8] sm:$0xff] }
  0x76   : > { %5377 = vst [vmem:[#allocation17_spill] sm:$0xff] %v4257_v34 }
  0x77   : > { %383 = vadd.xlane.f32.xlu1 %v382_v37  ;;  %v400_v37 = vadd.f32 %v4241_v16, %v4238_v13 }
  0x79   : > { %434 = vadd.xlane.f32.xlu0 %v433_v42  ;;  %v4262_v42 = vld [vmem:[%s4047_s14 + $0xc0] sm:$0xff] }
  0x7b   : > { %437 = vadd.xlane.f32.xlu1 %v436_v45  ;;  %v4265_v45 = vld [vmem:[%s4047_s14 + $0xc8] sm:$0xff] }
  0x7c   : > { %5378 = vst [vmem:[#allocation18_spill] sm:$0xff] %v4265_v45 }
  0x7d   : > { %386 = vadd.xlane.f32.xlu0 %v385_v48  ;;  %v451_v48 = vadd.f32 %v4249_v25, %v4246_v22  ;;  %v4299_v25 = vld [vmem:[%s4047_s14 + $0xe8] sm:$0xff] }
  0x7e   : > { %5384 = vst [vmem:[#allocation24_spill] sm:$0xff] %v4299_v25 }
  0x7f   : > { %389 = vadd.xlane.f32.xlu1 %v388_v51  ;;  %v4270_v51 = vld [vmem:[%s4047_s14 + $0xd0] sm:$0xff] }
  0x81   : > { %440 = vadd.xlane.f32.xlu0 %v439_v54  ;;  %v4273_v54 = vld [vmem:[%s4047_s14 + $0xd8] sm:$0xff] }
  0x82   : > { %5379 = vst [vmem:[#allocation19_spill] sm:$0xff] %v4273_v54 }
  0x83   : > { %443 = vadd.xlane.f32.xlu1 %v442_v57  ;;  %v454_v57 = vadd.f32 %v4257_v34, %v4254_v31  ;;  %v4296_v31 = vld [vmem:[%s4047_s14 + $0xe0] sm:$0xff] }
  0x84   : > { %5383 = vst [vmem:[#allocation23_spill] sm:$0xff] %v4296_v31 }
  0x85   : > { %392 = vadd.xlane.f32.xlu0 %v391_v60  ;;  %v4278_v60 = vld [vmem:[%s4047_s14 + $0x1e0] sm:$0xff] }
  0x86   : > { %5380 = vst [vmem:[#allocation20_spill] sm:$0xff] %v4278_v60 }
  0x87   : > { %395 = vadd.xlane.f32.xlu1 %v394_v63  ;;  %v4281_v63 = vld [vmem:[%s4047_s14 + $0x1e8] sm:$0xff] }
  0x88   : > { %5381 = vst [vmem:[#allocation21_spill] sm:$0xff] %v4281_v63  ;;  %v457_v34 = vadd.f32 %v4281_v63, %v4278_v60  ;;  %v3440_v63 = vld [vmem:[#allocation5] ss:$24 sps:$4 sm:$0xff]   ;;  %v3441_v60 = vld [vmem:[#allocation5 + $0x34] ss:$24 sps:$4 sm:$0xff]  }
  0x89   : > { %446 = vadd.xlane.f32.xlu0 %v445_v9  ;;  %v403_v9 = vadd.f32 %v4265_v45, %v4262_v42  ;;  %v4307_v45 = vld [vmem:[%s4047_s14 + $0xf8] sm:$0xff] }
  0x8a   : > { %5386 = vst [vmem:[#allocation26_spill] sm:$0xff] %v4307_v45 }
  0x8b   : > { %449 = vadd.xlane.f32.xlu1 %v448_v19  ;;  %v406_v19 = vadd.f32 %v4273_v54, %v4270_v51  ;;  %v409_v54 = vadd.f32 %v4299_v25, %v4296_v31  ;;  %v3446_v25 = vld [vmem:[#allocation5 + $0x60] ss:$24 sps:$4 sm:$0xff]  }
  0x8d   : > { %398 = vadd.xlane.f32.xlu0 %v397_v28  ;;  %v4288_v28 = vld [vmem:[%s4047_s14 + $0x1f0] sm:$0xff] }
  0x8f   : > { %401 = vadd.xlane.f32.xlu1 %v400_v37  ;;  %v4291_v37 = vld [vmem:[%s4047_s14 + $0x1f8] sm:$0xff] }
  0x90   : > { %5382 = vst [vmem:[#allocation22_spill] sm:$0xff] %v4291_v37 }
  0x91   : > { %452 = vadd.xlane.f32.xlu0 %v451_v48  ;;  %v460_v48 = vadd.f32 %v4291_v37, %v4288_v28  ;;  %v3443_v37 = vld [vmem:[#allocation5 + $0x30] ss:$24 sps:$4 sm:$0xff]  }
  0x93   : > { %455 = vadd.xlane.f32.xlu1 %v454_v57  ;;  %v4304_v57 = vld [vmem:[%s4047_s14 + $0xf0] sm:$0xff]  ;;  %s3704_s14 = scalar_lea.vmem %s5004_s10, 4096 }
  0x94   : > { %5385 = vst [vmem:[#allocation25_spill] sm:$0xff] %v4304_v57  ;;  %p3705_p6 = scmp.ne.s32.totalorder %s5004_s10, %s3704_s14 }
  0x95   : > { %404 = vadd.xlane.f32.xlu0 %v403_v9  ;;  %v412_v9 = vadd.f32 %v4307_v45, %v4304_v57 }
  0x96   : > { %p3706_p8 = pnand %p3705_p6, %p3987_p10 }
  0x97   : > { %407 = vadd.xlane.f32.xlu1 %v406_v19  ;;  %v3438_v19 = vld [vmem:[#allocation5 + $0x4] ss:$24 sps:$4 sm:$0xff]  }
  0x98   : > { %3317 = vmatprep.subr.bf16.mxu1 %v3438_v19  ;;  %1520 = vmatprep.subr.bf16.mxu0 %v3438_v19  ;;  %v3452_v19 = vld [vmem:[#allocation5 + $0xc0] ss:$24 sps:$4 sm:$0xff]   ;;  %p3707_p12 = pneg %p3706_p8 }
  0x99   : > { %458 = vadd.xlane.f32.xlu0 %v457_v34  ;;  %3333 = vmatpush1.bf16.msra.mxu1 %v3440_v63  ;;  %v3444_v34 = vld [vmem:[#allocation5 + $0x64] ss:$24 sps:$4 sm:$0xff]  }
  0x9a   : > { %1521 = vmatpush1.bf16.msra.mxu0 %v3440_v63  ;;  %3318 = vmatprep.subr.bf16.mxu1 %v3441_v60  ;;  %v3453_v63 = vld [vmem:[#allocation5 + $0xf4] ss:$24 sps:$4 sm:$0xff]  }
  0x9b   : > { %461 = vadd.xlane.f32.xlu1 %v460_v48  ;;  %1522 = vmatprep.subr.bf16.mxu0 %v3441_v60  ;;  %v3447_v48 = vld [vmem:[#allocation5 + $0x94] ss:$24 sps:$4 sm:$0xff]   ;;  %v3455_v60 = vld [vmem:[#allocation5 + $0xf0] ss:$24 sps:$4 sm:$0xff]  }
  0x9d   : > { %410 = vadd.xlane.f32.xlu0 %v409_v54  ;;  %3334 = vmatpush1.bf16.msra.mxu1 %v3443_v37  ;;  %v3449_v54 = vld [vmem:[#allocation5 + $0x90] ss:$24 sps:$4 sm:$0xff]  }
  0x9e   : > { %1523 = vmatpush1.bf16.msra.mxu0 %v3443_v37  ;;  %3319 = vmatprep.subr.bf16.mxu1 %v3444_v34  ;;  %v3456_v37 = vld [vmem:[#allocation5 + $0x124] ss:$24 sps:$4 sm:$0xff]  }
  0x9f   : > { %413 = vadd.xlane.f32.xlu1 %v412_v9  ;;  %1524 = vmatprep.subr.bf16.mxu0 %v3444_v34  ;;  %v3450_v9 = vld [vmem:[#allocation5 + $0xc4] ss:$24 sps:$4 sm:$0xff]   ;;  %v3458_v34 = vld [vmem:[#allocation5 + $0x120] ss:$24 sps:$4 sm:$0xff]  }
  0xa1   : > { %3335 = vmatpush1.bf16.msra.mxu1 %v3446_v25 }
  0xa2   : > { %1525 = vmatpush1.bf16.msra.mxu0 %v3446_v25  ;;  %3320 = vmatprep.subr.bf16.mxu1 %v3447_v48  ;;  %v3459_v25 = vld [vmem:[#allocation5 + $0x154] ss:$24 sps:$4 sm:$0xff]  }
  0xa3   : > { %1526 = vmatprep.subr.bf16.mxu0 %v3447_v48  ;;  %v3461_v48 = vld [vmem:[#allocation5 + $0x150] ss:$24 sps:$4 sm:$0xff]  }
  0xa5   : > { %3336 = vmatpush1.bf16.msra.mxu1 %v3449_v54 }
  0xa6   : > { %1527 = vmatpush1.bf16.msra.mxu0 %v3449_v54  ;;  %3321 = vmatprep.subr.bf16.mxu1 %v3450_v9  ;;  %v3462_v54 = vld [vmem:[#allocation5 + $0x184] ss:$24 sps:$4 sm:$0xff]  }
  0xa7   : > { %1528 = vmatprep.subr.bf16.mxu0 %v3450_v9  ;;  %v3464_v9 = vld [vmem:[#allocation5 + $0x180] ss:$24 sps:$4 sm:$0xff]  }
  0xa9   : > { %3337 = vmatpush1.bf16.msra.mxu1 %v3452_v19 }
  0xaa   : > { %1529 = vmatpush1.bf16.msra.mxu0 %v3452_v19  ;;  %3322 = vmatprep.subr.bf16.mxu1 %v3453_v63  ;;  %v3465_v19 = vld [vmem:[#allocation5 + $0x1b4] ss:$24 sps:$4 sm:$0xff]  }
  0xab   : > { %1530 = vmatprep.subr.bf16.mxu0 %v3453_v63  ;;  %v3467_v63 = vld [vmem:[#allocation5 + $0x1b0] ss:$24 sps:$4 sm:$0xff]  }
  0xad   : > { %3338 = vmatpush1.bf16.msra.mxu1 %v3455_v60 }
  0xae   : > { %1531 = vmatpush1.bf16.msra.mxu0 %v3455_v60  ;;  %3323 = vmatprep.subr.bf16.mxu1 %v3456_v37 }
  0xaf   : > { %1532 = vmatprep.subr.bf16.mxu0 %v3456_v37 }
  0xb1   : > { %3339 = vmatpush1.bf16.msra.mxu1 %v3458_v34 }
  0xb2   : > { %1533 = vmatpush1.bf16.msra.mxu0 %v3458_v34  ;;  %3324 = vmatprep.subr.bf16.mxu1 %v3459_v25 }
  0xb3   : > { %1534 = vmatprep.subr.bf16.mxu0 %v3459_v25 }
  0xb5   : > { %3340 = vmatpush1.bf16.msra.mxu1 %v3461_v48 }
  0xb6   : > { %1535 = vmatpush1.bf16.msra.mxu0 %v3461_v48  ;;  %3325 = vmatprep.subr.bf16.mxu1 %v3462_v54 }
  0xb7   : > { %1536 = vmatprep.subr.bf16.mxu0 %v3462_v54 }
  0xb9   : > { %3341 = vmatpush1.bf16.msra.mxu1 %v3464_v9 }
  0xba   : > { %1537 = vmatpush1.bf16.msra.mxu0 %v3464_v9  ;;  %3326 = vmatprep.subr.bf16.mxu1 %v3465_v19 }
  0xbb   : > { %1538 = vmatprep.subr.bf16.mxu0 %v3465_v19 }
  0xbd   : > { %3342 = vmatpush1.bf16.msra.mxu1 %v3467_v63 }
  0xbe   : > { %1539 = vmatpush1.bf16.msra.mxu0 %v3467_v63 }
  0xee   : > { %v417_v60 = vpop.xlane.xlu0 %416 }
  0xef   : > { %v480_v37 = vmul.f32 0.00390625, %v417_v60 }
  0xf0   : > { %v369_v34 = vpop.xlane.xlu1 %368 }
  0xf1   : > { %v464_v45 = vmul.f32 0.00390625, %v369_v34  ;;  %v4314_v25 = vsub.f32 %v4058_v0, %v480_v37  ;;  %v4317_v48 = vsub.f32 %v4061_v1, %v480_v37 }
  0xf2   : > { %v420_v57 = vpop.xlane.xlu0 %419 }
  0xf3   : > { %5387 = vst [vmem:[#allocation27_spill] sm:$0xff] %v4314_v25  ;;  %5388 = vst [vmem:[#allocation28_spill] sm:$0xff] %v4317_v48  ;;  %v4320_v54 = vsub.f32 %v4072_v5, %v464_v45  ;;  %v4323_v9 = vsub.f32 %v4075_v6, %v464_v45  ;;  %v481_v19 = vmul.f32 0.00390625, %v420_v57  ;;  %v592_v63 = vmul.f32 %v4314_v25, %v4314_v25 }
  0xf4   : > { %v372_v31 = vpop.xlane.xlu1 %371  ;;  %v593_v60 = vmul.f32 %v4317_v48, %v4317_v48 }
  0xf5   : > { %5389 = vst [vmem:[#allocation29_spill] sm:$0xff] %v4320_v54  ;;  %5390 = vst [vmem:[#allocation30_spill] sm:$0xff] %v4323_v9  ;;  %v465_v0 = vmul.f32 0.00390625, %v372_v31  ;;  %v560_v1 = vmul.f32 %v4320_v54, %v4320_v54  ;;  %v561_v37 = vmul.f32 %v4323_v9, %v4323_v9  ;;  %v4334_v5 = vsub.f32 %v4064_v2, %v481_v19 }
  0xf6   : > { %v4337_v6 = vsub.f32 %v4069_v4, %v481_v19  ;;  %v672_v45 = vadd.f32 %v593_v60, %v592_v63  ;;  %v423_v57 = vpop.xlane.xlu0 %422 }
  0xf7   : > { %v4340_v34 = vsub.f32 %v4080_v8, %v465_v0  ;;  %v4343_v25 = vsub.f32 %v4085_v10, %v465_v0  ;;  %v482_v31 = vmul.f32 0.00390625, %v423_v57  ;;  %v594_v9 = vmul.f32 %v4334_v5, %v4334_v5 }
  0xf8   : > { %673 = vadd.xlane.f32.xlu0 %v672_v45  ;;  %v426_v54 = vpop.xlane.xlu1 %425  ;;  %v595_v2 = vmul.f32 %v4337_v6, %v4337_v6  ;;  %v624_v48 = vadd.f32 %v561_v37, %v560_v1 }
  0xf9   : > { %v483_v4 = vmul.f32 0.00390625, %v426_v54  ;;  %v562_v19 = vmul.f32 %v4340_v34, %v4340_v34  ;;  %v563_v8 = vmul.f32 %v4343_v25, %v4343_v25  ;;  %v4354_v10 = vsub.f32 %v4088_v11, %v482_v31 }
  0xfa   : > { %v4357_v63 = vsub.f32 %v4091_v12, %v482_v31  ;;  %v675_v60 = vadd.f32 %v595_v2, %v594_v9  ;;  %v375_v0 = vpop.xlane.xlu0 %374 }
  0xfb   : > { %v4360_v45 = vsub.f32 %v4096_v14, %v483_v4  ;;  %v4363_v1 = vsub.f32 %v4099_v15, %v483_v4  ;;  %v466_v54 = vmul.f32 0.00390625, %v375_v0  ;;  %v596_v57 = vmul.f32 %v4354_v10, %v4354_v10 }
  0xfc   : > { %676 = vadd.xlane.f32.xlu1 %v675_v60  ;;  %625 = vadd.xlane.f32.xlu0 %v624_v48  ;;  %v378_v37 = vpop.xlane.xlu1 %377  ;;  %v597_v11 = vmul.f32 %v4357_v63, %v4357_v63  ;;  %v627_v12 = vadd.f32 %v563_v8, %v562_v19 }
  0xfd   : > { %v467_v31 = vmul.f32 0.00390625, %v378_v37  ;;  %v598_v9 = vmul.f32 %v4360_v45, %v4360_v45  ;;  %v599_v14 = vmul.f32 %v4363_v1, %v4363_v1  ;;  %v4374_v15 = vsub.f32 %v4104_v17, %v466_v54 }
  0xfe   : > { %v4377_v48 = vsub.f32 %v4107_v18, %v466_v54  ;;  %v678_v2 = vadd.f32 %v597_v11, %v596_v57  ;;  %v429_v4 = vpop.xlane.xlu0 %428 }
  0xff   : > { %v4380_v60 = vsub.f32 %v4112_v20, %v467_v31  ;;  %v4383_v19 = vsub.f32 %v4115_v21, %v467_v31  ;;  %v484_v8 = vmul.f32 0.00390625, %v429_v4  ;;  %v564_v37 = vmul.f32 %v4374_v15, %v4374_v15 }
 0x100   : > { %679 = vadd.xlane.f32.xlu0 %v678_v2  ;;  %628 = vadd.xlane.f32.xlu1 %v627_v12  ;;  %v432_v0 = vpop.xlane.xlu1 %431  ;;  %v565_v17 = vmul.f32 %v4377_v48, %v4377_v48  ;;  %v681_v18 = vadd.f32 %v599_v14, %v598_v9 }
 0x101   : > { %v485_v54 = vmul.f32 0.00390625, %v432_v0  ;;  %v566_v57 = vmul.f32 %v4380_v60, %v4380_v60  ;;  %v567_v20 = vmul.f32 %v4383_v19, %v4383_v19  ;;  %v4394_v21 = vsub.f32 %v4120_v23, %v484_v8 }
 0x102   : > { %v4397_v11 = vsub.f32 %v4123_v24, %v484_v8  ;;  %v630_v12 = vadd.f32 %v565_v17, %v564_v37  ;;  %v381_v31 = vpop.xlane.xlu0 %380  ;;  %v3468_v8 = vld [vmem:[#allocation5 + $0x1e4] ss:$24 sps:$4 sm:$0xff]   ;;  %v3470_v17 = vld [vmem:[#allocation5 + $0x1e0] ss:$24 sps:$4 sm:$0xff]  }
 0x103   : > { %v4400_v2 = vsub.f32 %v4128_v26, %v485_v54  ;;  %v4403_v9 = vsub.f32 %v4131_v27, %v485_v54  ;;  %v468_v14 = vmul.f32 0.00390625, %v381_v31  ;;  %v600_v0 = vmul.f32 %v4394_v21, %v4394_v21  ;;  %3327 = vmatprep.subr.bf16.mxu1 %v3468_v8  ;;  %1540 = vmatprep.subr.bf16.mxu0 %v3468_v8  ;;  %v3471_v8 = vld [vmem:[#allocation5 + $0x214] ss:$24 sps:$4 sm:$0xff]  }
 0x104   : > { %631 = vadd.xlane.f32.xlu0 %v630_v12  ;;  %682 = vadd.xlane.f32.xlu1 %v681_v18  ;;  %v384_v4 = vpop.xlane.xlu1 %383  ;;  %v601_v23 = vmul.f32 %v4397_v11, %v4397_v11  ;;  %v633_v24 = vadd.f32 %v567_v20, %v566_v57 }
 0x105   : > { %v469_v37 = vmul.f32 0.00390625, %v384_v4  ;;  %v602_v26 = vmul.f32 %v4400_v2, %v4400_v2  ;;  %v603_v27 = vmul.f32 %v4403_v9, %v4403_v9  ;;  %v4414_v54 = vsub.f32 %v4136_v29, %v468_v14  ;;  %3343 = vmatpush1.bf16.msra.mxu1 %v3470_v17  ;;  %1541 = vmatpush1.bf16.msra.mxu0 %v3470_v17 }
 0x106   : > { %v4417_v18 = vsub.f32 %v4139_v30, %v468_v14  ;;  %v684_v12 = vadd.f32 %v601_v23, %v600_v0  ;;  %v435_v31 = vpop.xlane.xlu0 %434  ;;  %3328 = vmatprep.subr.bf16.mxu1 %v3471_v8  ;;  %1542 = vmatprep.subr.bf16.mxu0 %v3471_v8 }
 0x107   : > { %5391 = vst [vmem:[#allocation31_spill] sm:$0xff] %v4414_v54  ;;  %v4420_v57 = vsub.f32 %v4144_v32, %v469_v37  ;;  %v4423_v20 = vsub.f32 %v4147_v33, %v469_v37  ;;  %v486_v4 = vmul.f32 0.00390625, %v435_v31  ;;  %v568_v30 = vmul.f32 %v4414_v54, %v4414_v54 }
 0x108   : > { %685 = vadd.xlane.f32.xlu0 %v684_v12  ;;  %634 = vadd.xlane.f32.xlu1 %v633_v24  ;;  %v438_v29 = vpop.xlane.xlu1 %437  ;;  %v569_v14 = vmul.f32 %v4417_v18, %v4417_v18  ;;  %v687_v0 = vadd.f32 %v603_v27, %v602_v26  ;;  %v3473_v12 = vld [vmem:[#allocation5 + $0x210] ss:$24 sps:$4 sm:$0xff]  }
 0x109   : > { %v487_v23 = vmul.f32 0.00390625, %v438_v29  ;;  %v570_v32 = vmul.f32 %v4420_v57, %v4420_v57  ;;  %v571_v33 = vmul.f32 %v4423_v20, %v4423_v20  ;;  %v4434_v37 = vsub.f32 %v4152_v35, %v486_v4  ;;  %3344 = vmatpush1.bf16.msra.mxu1 %v3473_v12  ;;  %1543 = vmatpush1.bf16.msra.mxu0 %v3473_v12 }
 0x10a   : > { %v4437_v24 = vsub.f32 %v4155_v36, %v486_v4  ;;  %v636_v17 = vadd.f32 %v569_v14, %v568_v30  ;;  %v387_v31 = vpop.xlane.xlu0 %386  ;;  %v3474_v14 = vld [vmem:[#allocation5 + $0x244] ss:$24 sps:$4 sm:$0xff]  }
 0x10b   : > { %v4440_v54 = vsub.f32 %v4160_v38, %v487_v23  ;;  %v4443_v26 = vsub.f32 %v4163_v39, %v487_v23  ;;  %v470_v27 = vmul.f32 0.00390625, %v387_v31  ;;  %v604_v35 = vmul.f32 %v4434_v37, %v4434_v37  ;;  %3329 = vmatprep.subr.bf16.mxu1 %v3474_v14  ;;  %1544 = vmatprep.subr.bf16.mxu0 %v3474_v14 }
 0x10c   : > { %637 = vadd.xlane.f32.xlu0 %v636_v17  ;;  %688 = vadd.xlane.f32.xlu1 %v687_v0  ;;  %v390_v29 = vpop.xlane.xlu1 %389  ;;  %v605_v36 = vmul.f32 %v4437_v24, %v4437_v24  ;;  %v639_v4 = vadd.f32 %v571_v33, %v570_v32  ;;  %v3476_v17 = vld [vmem:[#allocation5 + $0x240] ss:$24 sps:$4 sm:$0xff]  }
 0x10d   : > { %v471_v30 = vmul.f32 0.00390625, %v390_v29  ;;  %v606_v38 = vmul.f32 %v4440_v54, %v4440_v54  ;;  %v607_v39 = vmul.f32 %v4443_v26, %v4443_v26  ;;  %v4454_v0 = vsub.f32 %v4166_v40, %v470_v27  ;;  %3345 = vmatpush1.bf16.msra.mxu1 %v3476_v17  ;;  %1545 = vmatpush1.bf16.msra.mxu0 %v3476_v17 }
 0x10e   : > { %v4457_v23 = vsub.f32 %v4169_v41, %v470_v27  ;;  %v690_v8 = vadd.f32 %v605_v36, %v604_v35  ;;  %v441_v31 = vpop.xlane.xlu0 %440  ;;  %v3477_v36 = vld [vmem:[#allocation5 + $0x274] ss:$24 sps:$4 sm:$0xff]  }
 0x10f   : > { %v4460_v32 = vsub.f32 %v4174_v43, %v471_v30  ;;  %v4463_v33 = vsub.f32 %v4177_v44, %v471_v30  ;;  %v488_v29 = vmul.f32 0.00390625, %v441_v31  ;;  %v572_v40 = vmul.f32 %v4454_v0, %v4454_v0  ;;  %3330 = vmatprep.subr.bf16.mxu1 %v3477_v36  ;;  %1546 = vmatprep.subr.bf16.mxu0 %v3477_v36 }
 0x110   : > { %691 = vadd.xlane.f32.xlu0 %v690_v8  ;;  %640 = vadd.xlane.f32.xlu1 %v639_v4  ;;  %v444_v12 = vpop.xlane.xlu1 %443  ;;  %v573_v41 = vmul.f32 %v4457_v23, %v4457_v23  ;;  %v693_v27 = vadd.f32 %v607_v39, %v606_v38  ;;  %v3479_v8 = vld [vmem:[#allocation5 + $0x270] ss:$24 sps:$4 sm:$0xff]  }
 0x111   : > { %v489_v35 = vmul.f32 0.00390625, %v444_v12  ;;  %v574_v43 = vmul.f32 %v4460_v32, %v4460_v32  ;;  %v575_v44 = vmul.f32 %v4463_v33, %v4463_v33  ;;  %v4474_v4 = vsub.f32 %v4182_v46, %v488_v29  ;;  %3346 = vmatpush1.bf16.msra.mxu1 %v3479_v8  ;;  %1547 = vmatpush1.bf16.msra.mxu0 %v3479_v8 }
 0x112   : > { %v4477_v30 = vsub.f32 %v4185_v47, %v488_v29  ;;  %v642_v14 = vadd.f32 %v573_v41, %v572_v40  ;;  %v393_v31 = vpop.xlane.xlu0 %392  ;;  %v3480_v41 = vld [vmem:[#allocation5 + $0x2a4] ss:$24 sps:$4 sm:$0xff]  }
 0x113   : > { %v4480_v38 = vsub.f32 %v4190_v49, %v489_v35  ;;  %v4483_v39 = vsub.f32 %v4193_v50, %v489_v35  ;;  %v472_v12 = vmul.f32 0.00390625, %v393_v31  ;;  %v608_v46 = vmul.f32 %v4474_v4, %v4474_v4  ;;  %3331 = vmatprep.subr.bf16.mxu1 %v3480_v41  ;;  %1548 = vmatprep.subr.bf16.mxu0 %v3480_v41 }
 0x114   : > { %643 = vadd.xlane.f32.xlu0 %v642_v14  ;;  %694 = vadd.xlane.f32.xlu1 %v693_v27  ;;  %v396_v17 = vpop.xlane.xlu1 %395  ;;  %v609_v47 = vmul.f32 %v4477_v30, %v4477_v30  ;;  %v645_v29 = vadd.f32 %v575_v44, %v574_v43  ;;  %v3482_v14 = vld [vmem:[#allocation5 + $0x2a0] ss:$24 sps:$4 sm:$0xff]  }
 0x115   : > { %v473_v40 = vmul.f32 0.00390625, %v396_v17  ;;  %v610_v49 = vmul.f32 %v4480_v38, %v4480_v38  ;;  %v611_v50 = vmul.f32 %v4483_v39, %v4483_v39  ;;  %v4494_v27 = vsub.f32 %v4198_v52, %v472_v12  ;;  %3347 = vmatpush1.bf16.msra.mxu1 %v3482_v14  ;;  %1549 = vmatpush1.bf16.msra.mxu0 %v3482_v14 }
 0x116   : > { %v4497_v35 = vsub.f32 %v4201_v53, %v472_v12  ;;  %v696_v36 = vadd.f32 %v609_v47, %v608_v46  ;;  %v447_v31 = vpop.xlane.xlu0 %446  ;;  %v3483_v47 = vld [vmem:[#allocation5 + $0x2d4] ss:$24 sps:$4 sm:$0xff]  }
 0x117   : > { %v4500_v43 = vsub.f32 %v4206_v55, %v473_v40  ;;  %v4503_v44 = vsub.f32 %v4209_v56, %v473_v40  ;;  %v490_v17 = vmul.f32 0.00390625, %v447_v31  ;;  %v576_v52 = vmul.f32 %v4494_v27, %v4494_v27  ;;  %3332 = vmatprep.subr.bf16.mxu1 %v3483_v47  ;;  %1550 = vmatprep.subr.bf16.mxu0 %v3483_v47  ;;  %v3488_v47 = vld [vmem:[#allocation5 + $0xc] ss:$24 sps:$4 sm:$0xff]  }
 0x118   : > { %697 = vadd.xlane.f32.xlu0 %v696_v36  ;;  %646 = vadd.xlane.f32.xlu1 %v645_v29  ;;  %v450_v8 = vpop.xlane.xlu1 %449  ;;  %v577_v53 = vmul.f32 %v4497_v35, %v4497_v35  ;;  %v699_v12 = vadd.f32 %v611_v50, %v610_v49  ;;  %v3485_v36 = vld [vmem:[#allocation5 + $0x2d0] ss:$24 sps:$4 sm:$0xff]  }
 0x119   : > { %v491_v46 = vmul.f32 0.00390625, %v450_v8  ;;  %v578_v55 = vmul.f32 %v4500_v43, %v4500_v43  ;;  %v579_v56 = vmul.f32 %v4503_v44, %v4503_v44  ;;  %v4514_v29 = vsub.f32 %v4214_v58, %v490_v17  ;;  %3348 = vmatpush1.bf16.msra.mxu1 %v3485_v36  ;;  %1551 = vmatpush1.bf16.msra.mxu0 %v3485_v36 }
 0x11a   : > { %v4517_v40 = vsub.f32 %v4217_v59, %v490_v17  ;;  %v648_v41 = vadd.f32 %v577_v53, %v576_v52  ;;  %v399_v31 = vpop.xlane.xlu0 %398  ;;  %1713 = vmatprep.subr.bf16.mxu1 %v3488_v47 }
 0x11b   : > { %v4520_v49 = vsub.f32 %v4222_v61, %v491_v46  ;;  %v4523_v50 = vsub.f32 %v4225_v62, %v491_v46  ;;  %v474_v8 = vmul.f32 0.00390625, %v399_v31  ;;  %v612_v58 = vmul.f32 %v4514_v29, %v4514_v29 }
 0x11c   : > { %649 = vadd.xlane.f32.xlu0 %v648_v41  ;;  %700 = vadd.xlane.f32.xlu1 %v699_v12  ;;  %v402_v14 = vpop.xlane.xlu1 %401  ;;  %v613_v59 = vmul.f32 %v4517_v40, %v4517_v40  ;;  %v651_v17 = vadd.f32 %v579_v56, %v578_v55 }
 0x11d   : > { %v475_v52 = vmul.f32 0.00390625, %v402_v14  ;;  %v614_v61 = vmul.f32 %v4520_v49, %v4520_v49  ;;  %v615_v62 = vmul.f32 %v4523_v50, %v4523_v50  ;;  %v4534_v53 = vsub.f32 %v4230_v3, %v474_v8 }
 0x11e   : > { %v4537_v12 = vsub.f32 %v4233_v7, %v474_v8  ;;  %v702_v46 = vadd.f32 %v613_v59, %v612_v58  ;;  %v453_v41 = vpop.xlane.xlu0 %452  ;;  %v5396_v59 = vld [vmem:[#allocation15_spill] sm:$0xff] }
 0x11f   : > { %5392 = vst [vmem:[#allocation32_spill] sm:$0xff] %v4534_v53  ;;  %v4540_v55 = vsub.f32 %v4238_v13, %v475_v52  ;;  %v4543_v56 = vsub.f32 %v4241_v16, %v475_v52  ;;  %v492_v31 = vmul.f32 0.00390625, %v453_v41  ;;  %v580_v3 = vmul.f32 %v4534_v53, %v4534_v53  ;;  %v5397_v53 = vld [vmem:[#allocation16_spill] sm:$0xff] }
 0x120   : > { %5393 = vst [vmem:[#allocation33_spill] sm:$0xff] %v4537_v12  ;;  %703 = vadd.xlane.f32.xlu0 %v702_v46  ;;  %652 = vadd.xlane.f32.xlu1 %v651_v17  ;;  %v456_v14 = vpop.xlane.xlu1 %455  ;;  %v581_v7 = vmul.f32 %v4537_v12, %v4537_v12  ;;  %v705_v36 = vadd.f32 %v615_v62, %v614_v61  ;;  %v3491_v46 = vld [vmem:[#allocation5 + $0x14] ss:$24 sps:$4 sm:$0xff]  }
 0x121   : > { %5394 = vst [vmem:[#allocation34_spill] sm:$0xff] %v4540_v55  ;;  %v493_v8 = vmul.f32 0.00390625, %v456_v14  ;;  %v582_v58 = vmul.f32 %v4540_v55, %v4540_v55  ;;  %v583_v13 = vmul.f32 %v4543_v56, %v4543_v56  ;;  %v4554_v16 = vsub.f32 %v4246_v22, %v492_v31  ;;  %v5399_v61 = vld [vmem:[#allocation17_spill] sm:$0xff]  ;;  %1906 = vmatprep.subr.bf16.mxu0 %v3491_v46 }
 0x122   : > { %v4557_v17 = vsub.f32 %v5396_v59, %v492_v31  ;;  %v654_v52 = vadd.f32 %v581_v7, %v580_v3  ;;  %v405_v41 = vpop.xlane.xlu0 %404 }
 0x123   : > { %5395 = vst [vmem:[#allocation35_spill] sm:$0xff] %v4554_v16  ;;  %v4560_v12 = vsub.f32 %v5397_v53, %v493_v8  ;;  %v4563_v62 = vsub.f32 %v5399_v61, %v493_v8  ;;  %v476_v14 = vmul.f32 0.00390625, %v405_v41  ;;  %v616_v22 = vmul.f32 %v4554_v16, %v4554_v16 }
 0x124   : > { %655 = vadd.xlane.f32.xlu0 %v654_v52  ;;  %706 = vadd.xlane.f32.xlu1 %v705_v36  ;;  %v408_v55 = vpop.xlane.xlu1 %407  ;;  %v617_v47 = vmul.f32 %v4557_v17, %v4557_v17  ;;  %v657_v31 = vadd.f32 %v583_v13, %v582_v58  ;;  %v5401_v36 = vld [vmem:[#allocation18_spill] sm:$0xff]  ;;  %v5404_v58 = vld [vmem:[#allocation19_spill] sm:$0xff] }
 0x125   : > { %5398 = vst [vmem:[#allocation15_spill] sm:$0xff] %v4560_v12  ;;  %v477_v3 = vmul.f32 0.00390625, %v408_v55  ;;  %v618_v7 = vmul.f32 %v4560_v12, %v4560_v12  ;;  %v619_v53 = vmul.f32 %v4563_v62, %v4563_v62  ;;  %v4574_v8 = vsub.f32 %v4262_v42, %v476_v14 }
 0x126   : > { %v4577_v59 = vsub.f32 %v5401_v36, %v476_v14  ;;  %v708_v52 = vadd.f32 %v617_v47, %v616_v22  ;;  %v459_v41 = vpop.xlane.xlu0 %458  ;;  %v5406_v47 = vld [vmem:[#allocation20_spill] sm:$0xff] }
 0x127   : > { %5400 = vst [vmem:[#allocation16_spill] sm:$0xff] %v4574_v8  ;;  %v4580_v61 = vsub.f32 %v4270_v51, %v477_v3  ;;  %v4583_v55 = vsub.f32 %v5404_v58, %v477_v3  ;;  %v494_v13 = vmul.f32 0.00390625, %v459_v41  ;;  %v584_v46 = vmul.f32 %v4574_v8, %v4574_v8 }
 0x128   : > { %5402 = vst [vmem:[#allocation17_spill] sm:$0xff] %v4577_v59  ;;  %709 = vadd.xlane.f32.xlu0 %v708_v52  ;;  %658 = vadd.xlane.f32.xlu1 %v657_v31  ;;  %v462_v12 = vpop.xlane.xlu1 %461  ;;  %v585_v42 = vmul.f32 %v4577_v59, %v4577_v59  ;;  %v711_v14 = vadd.f32 %v619_v53, %v618_v7  ;;  %v5408_v52 = vld [vmem:[#allocation21_spill] sm:$0xff]  ;;  %v5411_v59 = vld [vmem:[#allocation22_spill] sm:$0xff] }
 0x129   : > { %5403 = vst [vmem:[#allocation18_spill] sm:$0xff] %v4580_v61  ;;  %5405 = vst [vmem:[#allocation19_spill] sm:$0xff] %v4583_v55  ;;  %v495_v36 = vmul.f32 0.00390625, %v462_v12  ;;  %v586_v22 = vmul.f32 %v4580_v61, %v4580_v61  ;;  %v587_v51 = vmul.f32 %v4583_v55, %v4583_v55  ;;  %v4594_v3 = vsub.f32 %v5406_v47, %v494_v13  ;;  %v5419_v55 = vld [vmem:[#allocation26_spill] sm:$0xff] }
 0x12a   : > { %v4597_v31 = vsub.f32 %v5408_v52, %v494_v13  ;;  %v660_v41 = vadd.f32 %v585_v42, %v584_v46  ;;  %v411_v58 = vpop.xlane.xlu0 %410 }
 0x12b   : > { %5407 = vst [vmem:[#allocation20_spill] sm:$0xff] %v4594_v3  ;;  %v4600_v8 = vsub.f32 %v4288_v28, %v495_v36  ;;  %v4603_v7 = vsub.f32 %v5411_v59, %v495_v36  ;;  %v478_v12 = vmul.f32 0.00390625, %v411_v58  ;;  %v620_v61 = vmul.f32 %v4594_v3, %v4594_v3  ;;  %v5413_v59 = vld [vmem:[#allocation23_spill] sm:$0xff]  ;;  %v5415_v36 = vld [vmem:[#allocation24_spill] sm:$0xff]  ;;  %v5417_v58 = vld [vmem:[#allocation25_spill] sm:$0xff] }
 0x12c   : > { %5409 = vst [vmem:[#allocation21_spill] sm:$0xff] %v4597_v31  ;;  %661 = vadd.xlane.f32.xlu0 %v660_v41  ;;  %712 = vadd.xlane.f32.xlu1 %v711_v14  ;;  %v414_v53 = vpop.xlane.xlu1 %413  ;;  %v621_v47 = vmul.f32 %v4597_v31, %v4597_v31  ;;  %v663_v13 = vadd.f32 %v587_v51, %v586_v22 }
 0x12d   : > { %5410 = vst [vmem:[#allocation36_spill] sm:$0xff] %v4600_v8  ;;  %5412 = vst [vmem:[#allocation22_spill] sm:$0xff] %v4603_v7  ;;  %v479_v52 = vmul.f32 0.00390625, %v414_v53  ;;  %v622_v46 = vmul.f32 %v4600_v8, %v4600_v8  ;;  %v623_v28 = vmul.f32 %v4603_v7, %v4603_v7  ;;  %v4614_v42 = vsub.f32 %v5413_v59, %v478_v12 }
 0x12e   : > { %v4617_v14 = vsub.f32 %v5415_v36, %v478_v12  ;;  %v714_v41 = vadd.f32 %v621_v47, %v620_v61 }
 0x12f   : > { %5414 = vst [vmem:[#allocation23_spill] sm:$0xff] %v4614_v42  ;;  %v4620_v3 = vsub.f32 %v5417_v58, %v479_v52  ;;  %v4623_v31 = vsub.f32 %v5419_v55, %v479_v52  ;;  %v588_v22 = vmul.f32 %v4614_v42, %v4614_v42  ;;  %v717_v53 = vadd.f32 %v623_v28, %v622_v46 }
 0x130   : > { %5416 = vst [vmem:[#allocation24_spill] sm:$0xff] %v4617_v14  ;;  %715 = vadd.xlane.f32.xlu0 %v714_v41  ;;  %664 = vadd.xlane.f32.xlu1 %v663_v13  ;;  %v589_v51 = vmul.f32 %v4617_v14, %v4617_v14 }
 0x131   : > { %5418 = vst [vmem:[#allocation25_spill] sm:$0xff] %v4620_v3  ;;  %5420 = vst [vmem:[#allocation26_spill] sm:$0xff] %v4623_v31  ;;  %v590_v12 = vmul.f32 %v4620_v3, %v4620_v3  ;;  %v591_v61 = vmul.f32 %v4623_v31, %v4623_v31 }
 0x132   : > { %v666_v47 = vadd.f32 %v589_v51, %v588_v22 }
 0x133   : > { %v669_v55 = vadd.f32 %v591_v61, %v590_v12 }
 0x134   : > { %667 = vadd.xlane.f32.xlu0 %v666_v47  ;;  %718 = vadd.xlane.f32.xlu1 %v717_v53 }
 0x138   : > { %670 = vadd.xlane.f32.xlu1 %v669_v55 }
 0x185   : > { %v674_v52 = vpop.xlane.xlu0 %673 }
 0x186   : > { %v736_v13 = vmul.f32 0.00390625, %v674_v52 }
 0x188   : > { %v768_v59 = vadd.f32 1e-06, %v736_v13 }
 0x189   : > { %v626_v36 = vpop.xlane.xlu0 %625  ;;  %v677_v41 = vpop.xlane.xlu1 %676 }
 0x18a   : > { %v720_v58 = vmul.f32 0.00390625, %v626_v36  ;;  %v737_v42 = vmul.f32 0.00390625, %v677_v41  ;;  %3582 = vrsqrt.f32 %v768_v59 }
 0x18c   : > { %v769_v14 = vadd.f32 1e-06, %v737_v42  ;;  %v752_v46 = vadd.f32 1e-06, %v720_v58 }
 0x18d   : > { %v680_v28 = vpop.xlane.xlu0 %679  ;;  %v629_v3 = vpop.xlane.xlu1 %628 }
 0x18e   : > { %v738_v8 = vmul.f32 0.00390625, %v680_v28  ;;  %v721_v7 = vmul.f32 0.00390625, %v629_v3  ;;  %3584 = vrsqrt.f32 %v769_v14 }
 0x18f   : > { %3586 = vrsqrt.f32 %v752_v46 }
 0x190   : > { %v753_v22 = vadd.f32 1e-06, %v721_v7  ;;  %v770_v51 = vadd.f32 1e-06, %v738_v8 }
 0x191   : > { %v632_v53 = vpop.xlane.xlu0 %631  ;;  %v683_v12 = vpop.xlane.xlu1 %682 }
 0x192   : > { %v722_v61 = vmul.f32 0.00390625, %v632_v53  ;;  %v739_v47 = vmul.f32 0.00390625, %v683_v12  ;;  %3588 = vrsqrt.f32 %v753_v22  ;;  %v5421_v53 = vld [vmem:[#allocation28_spill] sm:$0xff] }
 0x193   : > { %3590 = vrsqrt.f32 %v770_v51 }
 0x194   : > { %v771_v55 = vadd.f32 1e-06, %v739_v47  ;;  %v754_v52 = vadd.f32 1e-06, %v722_v61  ;;  %v3583_v41 = vpop.eup %3582  ;;  %v5422_v61 = vld [vmem:[#allocation27_spill] sm:$0xff] }
 0x195   : > { %v686_v13 = vpop.xlane.xlu0 %685  ;;  %v635_v42 = vpop.xlane.xlu1 %634  ;;  %v849_v12 = vmul.f32 %v3583_v41, %v5421_v53  ;;  %v848_v47 = vmul.f32 %v3583_v41, %v5422_v61  ;;  %v3494_v53 = vld [vmem:[#allocation5 + $0x3c] ss:$24 sps:$4 sm:$0xff]  }
 0x196   : > { %v740_v59 = vmul.f32 0.00390625, %v686_v13  ;;  %v723_v36 = vmul.f32 0.00390625, %v635_v42  ;;  %3592 = vrsqrt.f32 %v771_v55 }
 0x197   : > { %3594 = vrsqrt.f32 %v754_v52 }
 0x198   : > { %v755_v58 = vadd.f32 1e-06, %v723_v36  ;;  %v3585_v3 = vpop.eup %3584  ;;  %v772_v7 = vadd.f32 1e-06, %v740_v59  ;;  %v3486_v36 = vld [vmem:[#allocation5 + $0x8] ss:$24 sps:$4 sm:$0xff]  }
 0x199   : > { %v638_v14 = vpop.xlane.xlu0 %637  ;;  %v689_v8 = vpop.xlane.xlu1 %688  ;;  %v851_v22 = vmul.f32 %v3585_v3, %v4337_v6  ;;  %v850_v13 = vmul.f32 %v3585_v3, %v4334_v5 }
 0x19a   : > { %v724_v46 = vmul.f32 0.00390625, %v638_v14  ;;  %v741_v28 = vmul.f32 0.00390625, %v689_v8  ;;  %v3587_v51 = vpop.eup %3586  ;;  %3596 = vrsqrt.f32 %v755_v58  ;;  %v5425_v58 = vld [vmem:[#allocation30_spill] sm:$0xff] }
 0x19b   : > { %v4637_v55 = vpack.c.bf16 %v851_v22, %v849_v12  ;;  %3598 = vrsqrt.f32 %v772_v7  ;;  %v4639_v8 = vpack.c.bf16 %v850_v13, %v848_v47  ;;  %v817_v41 = vmul.f32 %v3587_v51, %v5425_v58  ;;  %v3489_v22 = vld [vmem:[#allocation5 + $0x10] ss:$24 sps:$4 sm:$0xff]  }
 0x19c   : > { %v773_v42 = vadd.f32 1e-06, %v741_v28  ;;  %v3589_v52 = vpop.eup %3588  ;;  %v756_v59 = vadd.f32 1e-06, %v724_v46  ;;  %v5426_v28 = vld [vmem:[#allocation29_spill] sm:$0xff] }
 0x19d   : > { %5423 = vst [vmem:[#allocation28_spill] sm:$0xff] %v4637_v55  ;;  %v692_v31 = vpop.xlane.xlu0 %691  ;;  %v641_v14 = vpop.xlane.xlu1 %640  ;;  %5424 = vst [vmem:[#allocation27_spill] sm:$0xff] %v4639_v8  ;;  %1632 = vmatprep.mubr.bf16.mxu1 %v4637_v55  ;;  %v819_v5 = vmul.f32 %v3589_v52, %v4343_v25  ;;  %v816_v7 = vmul.f32 %v3587_v51, %v5426_v28  ;;  %v818_v46 = vmul.f32 %v3589_v52, %v4340_v34 }
 0x19e   : > { %v742_v16 = vmul.f32 0.00390625, %v692_v31  ;;  %v725_v6 = vmul.f32 0.00390625, %v641_v14  ;;  %v3591_v3 = vpop.eup %3590  ;;  %3600 = vrsqrt.f32 %v773_v42  ;;  %1633 = vmatmul.mubr.bf16.vlgmr.msra.gmra.mrb[0].mxu1 %v4639_v8  ;;  %v3492_v31 = vld [vmem:[#allocation5 + $0x38] ss:$24 sps:$4 sm:$0xff]   ;;  %v3497_v42 = vld [vmem:[#allocation5 + $0x44] ss:$24 sps:$4 sm:$0xff]  }
 0x19f   : > { %1714 = vmatpush1.bf16.msra.mxu1 %v3486_v36  ;;  %v4647_v61 = vpack.c.bf16 %v819_v5, %v817_v41  ;;  %3602 = vrsqrt.f32 %v756_v59  ;;  %v4649_v25 = vpack.c.bf16 %v818_v46, %v816_v7  ;;  %v3500_v8 = vld [vmem:[#allocation5 + $0x6c] ss:$24 sps:$4 sm:$0xff]   ;;  %v853_v51 = vmul.f32 %v3591_v3, %v4357_v63  ;;  %v3495_v41 = vld [vmem:[#allocation5 + $0x40] ss:$24 sps:$4 sm:$0xff]  }
 0x1a0   : > { %v757_v12 = vadd.f32 1e-06, %v725_v6  ;;  %v3593_v47 = vpop.eup %3592  ;;  %v774_v13 = vadd.f32 1e-06, %v742_v16  ;;  %1715 = vmatprep.subr.bf16.mxu1 %v3494_v53  ;;  %v852_v16 = vmul.f32 %v3591_v3, %v4354_v10  ;;  %v3498_v5 = vld [vmem:[#allocation5 + $0x68] ss:$24 sps:$4 sm:$0xff]  }
 0x1a1   : > { %v644_v14 = vpop.xlane.xlu0 %643  ;;  %v695_v58 = vpop.xlane.xlu1 %694  ;;  %1552 = vmatprep.mubr.bf16.mxu0 %v4647_v61  ;;  %v855_v36 = vmul.f32 %v3593_v47, %v4363_v1  ;;  %v854_v59 = vmul.f32 %v3593_v47, %v4360_v45  ;;  %v3506_v10 = vld [vmem:[#allocation5 + $0x9c] ss:$24 sps:$4 sm:$0xff]  }
 0x1a2   : > { %v726_v55 = vmul.f32 0.00390625, %v644_v14  ;;  %v743_v34 = vmul.f32 0.00390625, %v695_v58  ;;  %v3595_v52 = vpop.eup %3594  ;;  %3604 = vrsqrt.f32 %v757_v12  ;;  %1553 = vmatmul.mubr.bf16.vlgmr.msra.gmra.mrb[0].mxu0 %v4649_v25  ;;  %v3503_v12 = vld [vmem:[#allocation5 + $0x74] ss:$24 sps:$4 sm:$0xff]   ;;  %v3501_v58 = vld [vmem:[#allocation5 + $0x70] ss:$24 sps:$4 sm:$0xff]  }
 0x1a3   : > { %1907 = vmatpush1.bf16.msra.mxu0 %v3489_v22  ;;  %1716 = vmatpush1.bf16.msra.mxu1 %v3492_v31  ;;  %v4657_v53 = vpack.c.bf16 %v855_v36, %v853_v51  ;;  %3606 = vrsqrt.f32 %v774_v13  ;;  %v4659_v46 = vpack.c.bf16 %v854_v59, %v852_v16  ;;  %v821_v22 = vmul.f32 %v3595_v52, %v4377_v48  ;;  %v3509_v16 = vld [vmem:[#allocation5 + $0xa4] ss:$24 sps:$4 sm:$0xff]  }
 0x1a4   : > { %v775_v6 = vadd.f32 1e-06, %v743_v34  ;;  %v3597_v28 = vpop.eup %3596  ;;  %v758_v63 = vadd.f32 1e-06, %v726_v55  ;;  %1908 = vmatprep.subr.bf16.mxu0 %v3497_v42  ;;  %1717 = vmatprep.subr.bf16.mxu1 %v3500_v8  ;;  %v820_v55 = vmul.f32 %v3595_v52, %v4374_v15  ;;  %v3504_v42 = vld [vmem:[#allocation5 + $0x98] ss:$24 sps:$4 sm:$0xff]  }
 0x1a5   : > { %v698_v7 = vpop.xlane.xlu0 %697  ;;  %v647_v1 = vpop.xlane.xlu1 %646  ;;  %1642 = vmatprep.mubr.bf16.mxu1 %v4657_v53  ;;  %v823_v31 = vmul.f32 %v3597_v28, %v4383_v19  ;;  %v822_v13 = vmul.f32 %v3597_v28, %v4380_v60  ;;  %v3512_v15 = vld [vmem:[#allocation5 + $0xcc] ss:$24 sps:$4 sm:$0xff]  }
 0x1a6   : > { %v744_v3 = vmul.f32 0.00390625, %v698_v7  ;;  %v727_v45 = vmul.f32 0.00390625, %v647_v1  ;;  %v3599_v47 = vpop.eup %3598  ;;  %3608 = vrsqrt.f32 %v775_v6  ;;  %1643 = vmatmul.mubr.bf16.gmra.mrb[4].mxu1 %v4659_v46  ;;  %v3507_v1 = vld [vmem:[#allocation5 + $0xa0] ss:$24 sps:$4 sm:$0xff]  }
 0x1a7   : > { %1909 = vmatpush1.bf16.msra.mxu0 %v3495_v41  ;;  %1718 = vmatpush1.bf16.msra.mxu1 %v3498_v5  ;;  %v4667_v8 = vpack.c.bf16 %v823_v31, %v821_v22  ;;  %3610 = vrsqrt.f32 %v758_v63  ;;  %v4669_v36 = vpack.c.bf16 %v822_v13, %v820_v55  ;;  %v857_v59 = vmul.f32 %v3599_v47, %v4397_v11  ;;  %v3515_v22 = vld [vmem:[#allocation5 + $0xd4] ss:$24 sps:$4 sm:$0xff]  }
 0x1a8   : > { %v759_v14 = vadd.f32 1e-06, %v727_v45  ;;  %v3601_v34 = vpop.eup %3600  ;;  %v776_v48 = vadd.f32 1e-06, %v744_v3  ;;  %1910 = vmatprep.subr.bf16.mxu0 %v3503_v12  ;;  %1719 = vmatprep.subr.bf16.mxu1 %v3506_v10  ;;  %v856_v5 = vmul.f32 %v3599_v47, %v4394_v21  ;;  %v3510_v12 = vld [vmem:[#allocation5 + $0xc8] ss:$24 sps:$4 sm:$0xff]  }
 0x1a9   : > { %v650_v51 = vpop.xlane.xlu0 %649  ;;  %v701_v19 = vpop.xlane.xlu1 %700  ;;  %1562 = vmatprep.mubr.bf16.mxu0 %v4667_v8  ;;  %v859_v6 = vmul.f32 %v3601_v34, %v4403_v9  ;;  %v858_v28 = vmul.f32 %v3601_v34, %v4400_v2  ;;  %v3518_v21 = vld [vmem:[#allocation5 + $0xfc] ss:$24 sps:$4 sm:$0xff]  }
 0x1aa   : > { %v728_v52 = vmul.f32 0.00390625, %v650_v51  ;;  %v745_v60 = vmul.f32 0.00390625, %v701_v19  ;;  %v3603_v41 = vpop.eup %3602  ;;  %3612 = vrsqrt.f32 %v759_v14  ;;  %1563 = vmatmul.mubr.bf16.gmra.mrb[4].mxu0 %v4669_v36  ;;  %v5427_v14 = vld [vmem:[#allocation31_spill] sm:$0xff]  ;;  %v3513_v51 = vld [vmem:[#allocation5 + $0xd0] ss:$24 sps:$4 sm:$0xff]  }
 0x1ab   : > { %1911 = vmatpush1.bf16.msra.mxu0 %v3501_v58  ;;  %1720 = vmatpush1.bf16.msra.mxu1 %v3504_v42  ;;  %v4677_v7 = vpack.c.bf16 %v859_v6, %v857_v59  ;;  %3614 = vrsqrt.f32 %v776_v48  ;;  %v4679_v45 = vpack.c.bf16 %v858_v28, %v856_v5  ;;  %v825_v47 = vmul.f32 %v3603_v41, %v4417_v18  ;;  %v3516_v19 = vld [vmem:[#allocation5 + $0xf8] ss:$24 sps:$4 sm:$0xff]   ;;  %v3524_v59 = vld [vmem:[#allocation5 + $0x12c] ss:$24 sps:$4 sm:$0xff]  }
 0x1ac   : > { %v777_v63 = vadd.f32 1e-06, %v745_v60  ;;  %v3605_v10 = vpop.eup %3604  ;;  %v760_v11 = vadd.f32 1e-06, %v728_v52  ;;  %1912 = vmatprep.subr.bf16.mxu0 %v3509_v16  ;;  %1721 = vmatprep.subr.bf16.mxu1 %v3512_v15  ;;  %v824_v58 = vmul.f32 %v3603_v41, %v5427_v14  ;;  %v3521_v60 = vld [vmem:[#allocation5 + $0x104] ss:$24 sps:$4 sm:$0xff]  }
 0x1ad   : > { %v704_v3 = vpop.xlane.xlu0 %703  ;;  %v653_v9 = vpop.xlane.xlu1 %652  ;;  %1652 = vmatprep.mubr.bf16.mxu1 %v4677_v7  ;;  %v827_v55 = vmul.f32 %v3605_v10, %v4423_v20  ;;  %v826_v42 = vmul.f32 %v3605_v10, %v4420_v57  ;;  %v3525_v14 = vld [vmem:[#allocation5 + $0x130] ss:$24 sps:$4 sm:$0xff]  }
 0x1ae   : > { %v746_v31 = vmul.f32 0.00390625, %v704_v3  ;;  %v729_v2 = vmul.f32 0.00390625, %v653_v9  ;;  %v3607_v13 = vpop.eup %3606  ;;  %3616 = vrsqrt.f32 %v777_v63  ;;  %1653 = vmatmul.mubr.bf16.gmra.mrb[8].mxu1 %v4679_v45  ;;  %v3519_v63 = vld [vmem:[#allocation5 + $0x100] ss:$24 sps:$4 sm:$0xff]  }
 0x1af   : > { %1913 = vmatpush1.bf16.msra.mxu0 %v3507_v1  ;;  %1722 = vmatpush1.bf16.msra.mxu1 %v3510_v12  ;;  %v4687_v48 = vpack.c.bf16 %v827_v55, %v825_v47  ;;  %3618 = vrsqrt.f32 %v760_v11  ;;  %v4689_v52 = vpack.c.bf16 %v826_v42, %v824_v58  ;;  %v861_v41 = vmul.f32 %v3607_v13, %v4437_v24  ;;  %v3522_v9 = vld [vmem:[#allocation5 + $0x128] ss:$24 sps:$4 sm:$0xff]  }
 0x1b0   : > { %v761_v34 = vadd.f32 1e-06, %v729_v2  ;;  %v3609_v16 = vpop.eup %3608  ;;  %v778_v18 = vadd.f32 1e-06, %v746_v31  ;;  %1914 = vmatprep.subr.bf16.mxu0 %v3515_v22  ;;  %1723 = vmatprep.subr.bf16.mxu1 %v3518_v21  ;;  %v860_v1 = vmul.f32 %v3607_v13, %v4434_v37  ;;  %v3527_v31 = vld [vmem:[#allocation5 + $0x134] ss:$24 sps:$4 sm:$0xff]  }
 0x1b1   : > { %v656_v15 = vpop.xlane.xlu0 %655  ;;  %v707_v20 = vpop.xlane.xlu1 %706  ;;  %1572 = vmatprep.mubr.bf16.mxu0 %v4687_v48  ;;  %v863_v5 = vmul.f32 %v3609_v16, %v4443_v26  ;;  %v862_v12 = vmul.f32 %v3609_v16, %v4440_v54  ;;  %v3530_v2 = vld [vmem:[#allocation5 + $0x15c] ss:$24 sps:$4 sm:$0xff]   ;;  %v3528_v16 = vld [vmem:[#allocation5 + $0x158] ss:$24 sps:$4 sm:$0xff]  }
 0x1b2   : > { %v730_v6 = vmul.f32 0.00390625, %v656_v15  ;;  %v747_v57 = vmul.f32 0.00390625, %v707_v20  ;;  %v3611_v28 = vpop.eup %3610  ;;  %3620 = vrsqrt.f32 %v761_v34  ;;  %1573 = vmatmul.mubr.bf16.gmra.mrb[8].mxu0 %v4689_v52  ;;  %v3533_v20 = vld [vmem:[#allocation5 + $0x164] ss:$24 sps:$4 sm:$0xff]  }
 0x1b3   : > { %1915 = vmatpush1.bf16.msra.mxu0 %v3513_v51  ;;  %1724 = vmatpush1.bf16.msra.mxu1 %v3516_v19  ;;  %v4697_v3 = vpack.c.bf16 %v863_v5, %v861_v41  ;;  %3622 = vrsqrt.f32 %v778_v18  ;;  %v4699_v21 = vpack.c.bf16 %v862_v12, %v860_v1  ;;  %v829_v47 = vmul.f32 %v3611_v28, %v4457_v23  ;;  %v3531_v1 = vld [vmem:[#allocation5 + $0x160] ss:$24 sps:$4 sm:$0xff]  }
 0x1b4   : > { %v762_v10 = vadd.f32 1e-06, %v730_v6  ;;  %v779_v11 = vadd.f32 1e-06, %v747_v57  ;;  %v3613_v22 = vpop.eup %3612  ;;  %1916 = vmatprep.subr.bf16.mxu0 %v3521_v60  ;;  %1725 = vmatprep.subr.bf16.mxu1 %v3524_v59  ;;  %v828_v58 = vmul.f32 %v3611_v28, %v4454_v0  ;;  %v3536_v60 = vld [vmem:[#allocation5 + $0x18c] ss:$24 sps:$4 sm:$0xff]  }
 0x1b5   : > { %v710_v24 = vpop.xlane.xlu0 %709  ;;  %v659_v26 = vpop.xlane.xlu1 %658  ;;  %1662 = vmatprep.mubr.bf16.mxu1 %v4697_v3  ;;  %v831_v55 = vmul.f32 %v3613_v22, %v4463_v33  ;;  %v830_v42 = vmul.f32 %v3613_v22, %v4460_v32  ;;  %v3534_v12 = vld [vmem:[#allocation5 + $0x188] ss:$24 sps:$4 sm:$0xff]   ;;  %v3539_v22 = vld [vmem:[#allocation5 + $0x194] ss:$24 sps:$4 sm:$0xff]  }
 0x1b6   : > { %v748_v37 = vmul.f32 0.00390625, %v710_v24  ;;  %v731_v54 = vmul.f32 0.00390625, %v659_v26  ;;  %v3615_v13 = vpop.eup %3614  ;;  %3624 = vrsqrt.f32 %v779_v11  ;;  %1663 = vmatmul.mubr.bf16.gmra.mrb[12].mxu1 %v4699_v21 }
 0x1b7   : > { %3626 = vrsqrt.f32 %v762_v10  ;;  %1917 = vmatpush1.bf16.msra.mxu0 %v3519_v63  ;;  %1726 = vmatpush1.bf16.msra.mxu1 %v3522_v9  ;;  %v4707_v19 = vpack.c.bf16 %v831_v55, %v829_v47  ;;  %v4709_v15 = vpack.c.bf16 %v830_v42, %v828_v58  ;;  %v865_v59 = vmul.f32 %v3615_v13, %v4477_v30 }
 0x1b8   : > { %v780_v34 = vadd.f32 1e-06, %v748_v37  ;;  %v763_v51 = vadd.f32 1e-06, %v731_v54  ;;  %v3617_v23 = vpop.eup %3616  ;;  %1918 = vmatprep.subr.bf16.mxu0 %v3527_v31  ;;  %1727 = vmatprep.subr.bf16.mxu1 %v3530_v2  ;;  %v864_v41 = vmul.f32 %v3615_v13, %v4474_v4  ;;  %v3542_v4 = vld [vmem:[#allocation5 + $0x1bc] ss:$24 sps:$4 sm:$0xff]  }
 0x1b9   : > { %v662_v18 = vpop.xlane.xlu0 %661  ;;  %v713_v33 = vpop.xlane.xlu1 %712  ;;  %1582 = vmatprep.mubr.bf16.mxu0 %v4707_v19  ;;  %v867_v6 = vmul.f32 %v3617_v23, %v4483_v39  ;;  %v866_v5 = vmul.f32 %v3617_v23, %v4480_v38  ;;  %v3537_v13 = vld [vmem:[#allocation5 + $0x190] ss:$24 sps:$4 sm:$0xff]  }
 0x1ba   : > { %v732_v0 = vmul.f32 0.00390625, %v662_v18  ;;  %v749_v32 = vmul.f32 0.00390625, %v713_v33  ;;  %v3619_v57 = vpop.eup %3618  ;;  %3628 = vrsqrt.f32 %v763_v51  ;;  %1583 = vmatmul.mubr.bf16.gmra.mrb[12].mxu0 %v4709_v15  ;;  %v3545_v51 = vld [vmem:[#allocation5 + $0x1c4] ss:$24 sps:$4 sm:$0xff]  }
 0x1bb   : > { %3630 = vrsqrt.f32 %v780_v34  ;;  %1919 = vmatpush1.bf16.msra.mxu0 %v3525_v14  ;;  %1728 = vmatpush1.bf16.msra.mxu1 %v3528_v16  ;;  %v4717_v63 = vpack.c.bf16 %v867_v6, %v865_v59  ;;  %v4719_v9 = vpack.c.bf16 %v866_v5, %v864_v41  ;;  %v833_v26 = vmul.f32 %v3619_v57, %v4497_v35  ;;  %v3540_v14 = vld [vmem:[#allocation5 + $0x1b8] ss:$24 sps:$4 sm:$0xff]  }
 0x1bc   : > { %v781_v28 = vadd.f32 1e-06, %v749_v32  ;;  %v3621_v10 = vpop.eup %3620  ;;  %v764_v30 = vadd.f32 1e-06, %v732_v0  ;;  %1920 = vmatprep.subr.bf16.mxu0 %v3533_v20  ;;  %1729 = vmatprep.subr.bf16.mxu1 %v3536_v60  ;;  %v832_v37 = vmul.f32 %v3619_v57, %v4494_v27  ;;  %v3548_v27 = vld [vmem:[#allocation5 + $0x1ec] ss:$24 sps:$4 sm:$0xff]  }
 0x1bd   : > { %v716_v11 = vpop.xlane.xlu0 %715  ;;  %v665_v39 = vpop.xlane.xlu1 %664  ;;  %1672 = vmatprep.mubr.bf16.mxu1 %v4717_v63  ;;  %v835_v31 = vmul.f32 %v3621_v10, %v4503_v44  ;;  %v834_v54 = vmul.f32 %v3621_v10, %v4500_v43  ;;  %v3543_v20 = vld [vmem:[#allocation5 + $0x1c0] ss:$24 sps:$4 sm:$0xff]   ;;  %v5428_v5 = vld [vmem:[#allocation33_spill] sm:$0xff] }
 0x1be   : > { %v750_v24 = vmul.f32 0.00390625, %v716_v11  ;;  %v733_v38 = vmul.f32 0.00390625, %v665_v39  ;;  %v3623_v2 = vpop.eup %3622  ;;  %3632 = vrsqrt.f32 %v781_v28  ;;  %1673 = vmatmul.mubr.bf16.gmra.mrb[16].mxu1 %v4719_v9  ;;  %v3546_v57 = vld [vmem:[#allocation5 + $0x1e8] ss:$24 sps:$4 sm:$0xff]   ;;  %v5430_v39 = vld [vmem:[#allocation34_spill] sm:$0xff] }
 0x1bf   : > { %1921 = vmatpush1.bf16.msra.mxu0 %v3531_v1  ;;  %1730 = vmatpush1.bf16.msra.mxu1 %v3534_v12  ;;  %v4727_v55 = vpack.c.bf16 %v835_v31, %v833_v26  ;;  %3634 = vrsqrt.f32 %v764_v30  ;;  %v4729_v34 = vpack.c.bf16 %v834_v54, %v832_v37  ;;  %v869_v18 = vmul.f32 %v3623_v2, %v4517_v40  ;;  %v3551_v1 = vld [vmem:[#allocation5 + $0x1f4] ss:$24 sps:$4 sm:$0xff]   ;;  %v3552_v31 = vld [vmem:[#allocation5 + $0x218] ss:$24 sps:$4 sm:$0xff]  }
 0x1c0   : > { %v765_v47 = vadd.f32 1e-06, %v733_v38  ;;  %v3625_v58 = vpop.eup %3624  ;;  %v782_v35 = vadd.f32 1e-06, %v750_v24  ;;  %1922 = vmatprep.subr.bf16.mxu0 %v3539_v22  ;;  %1731 = vmatprep.subr.bf16.mxu1 %v3542_v4  ;;  %v868_v60 = vmul.f32 %v3623_v2, %v4514_v29  ;;  %v5429_v29 = vld [vmem:[#allocation32_spill] sm:$0xff] }
 0x1c1   : > { %v668_v42 = vpop.xlane.xlu0 %667  ;;  %v719_v44 = vpop.xlane.xlu1 %718  ;;  %1592 = vmatprep.mubr.bf16.mxu0 %v4727_v55  ;;  %v871_v33 = vmul.f32 %v3625_v58, %v4523_v50  ;;  %v870_v0 = vmul.f32 %v3625_v58, %v4520_v49  ;;  %v3554_v49 = vld [vmem:[#allocation5 + $0x21c] ss:$24 sps:$4 sm:$0xff]   ;;  %v3549_v38 = vld [vmem:[#allocation5 + $0x1f0] ss:$24 sps:$4 sm:$0xff]   ;;  %v3560_v54 = vld [vmem:[#allocation5 + $0x24c] ss:$24 sps:$4 sm:$0xff]  }
 0x1c2   : > { %v3627_v16 = vpop.eup %3626  ;;  %v734_v43 = vmul.f32 0.00390625, %v668_v42  ;;  %v751_v23 = vmul.f32 0.00390625, %v719_v44  ;;  %3636 = vrsqrt.f32 %v765_v47  ;;  %1593 = vmatmul.mubr.bf16.gmra.mrb[16].mxu0 %v4729_v34  ;;  %v5432_v58 = vld [vmem:[#allocation15_spill] sm:$0xff] }
 0x1c3   : > { %1923 = vmatpush1.bf16.msra.mxu0 %v3537_v13  ;;  %1732 = vmatpush1.bf16.msra.mxu1 %v3540_v14  ;;  %v4737_v6 = vpack.c.bf16 %v871_v33, %v869_v18  ;;  %3638 = vrsqrt.f32 %v782_v35  ;;  %v4739_v50 = vpack.c.bf16 %v870_v0, %v868_v60  ;;  %v837_v28 = vmul.f32 %v3627_v16, %v5428_v5  ;;  %v5431_v13 = vld [vmem:[#allocation35_spill] sm:$0xff]  ;;  %v5435_v60 = vld [vmem:[#allocation16_spill] sm:$0xff] }
 0x1c4   : > { %v766_v32 = vadd.f32 1e-06, %v734_v43  ;;  %v783_v59 = vadd.f32 1e-06, %v751_v23  ;;  %v3629_v41 = vpop.eup %3628  ;;  %1924 = vmatprep.subr.bf16.mxu0 %v3545_v51  ;;  %1733 = vmatprep.subr.bf16.mxu1 %v3548_v27  ;;  %v836_v12 = vmul.f32 %v3627_v16, %v5429_v29  ;;  %v3555_v51 = vld [vmem:[#allocation5 + $0x220] ss:$24 sps:$4 sm:$0xff]  }
 0x1c5   : > { %v671_v40 = vpop.xlane.xlu1 %670  ;;  %v3631_v10 = vpop.eup %3630  ;;  %1682 = vmatprep.mubr.bf16.mxu1 %v4737_v6  ;;  %v839_v11 = vmul.f32 %v3629_v41, %v4543_v56  ;;  %v838_v22 = vmul.f32 %v3629_v41, %v5430_v39  ;;  %v3557_v56 = vld [vmem:[#allocation5 + $0x224] ss:$24 sps:$4 sm:$0xff]   ;;  %v3558_v27 = vld [vmem:[#allocation5 + $0x248] ss:$24 sps:$4 sm:$0xff]   ;;  %v3563_v43 = vld [vmem:[#allocation5 + $0x254] ss:$24 sps:$4 sm:$0xff]  }
 0x1c6   : > { %3640 = vrsqrt.f32 %v766_v32  ;;  %v735_v30 = vmul.f32 0.00390625, %v671_v40  ;;  %1683 = vmatmul.mubr.bf16.gmra.mrb[20].mxu1 %v4739_v50  ;;  %v873_v37 = vmul.f32 %v3631_v10, %v4557_v17  ;;  %v872_v14 = vmul.f32 %v3631_v10, %v5431_v13  ;;  %v5433_v23 = vld [vmem:[#allocation17_spill] sm:$0xff]  ;;  %v5434_v33 = vld [vmem:[#allocation19_spill] sm:$0xff]  ;;  %v5436_v32 = vld [vmem:[#allocation18_spill] sm:$0xff] }
 0x1c7   : > { %3642 = vrsqrt.f32 %v783_v59  ;;  %1925 = vmatpush1.bf16.msra.mxu0 %v3543_v20  ;;  %1734 = vmatpush1.bf16.msra.mxu1 %v3546_v57  ;;  %v4747_v24 = vpack.c.bf16 %v839_v11, %v837_v28  ;;  %v4749_v26 = vpack.c.bf16 %v838_v22, %v836_v12  ;;  %v3561_v5 = vld [vmem:[#allocation5 + $0x250] ss:$24 sps:$4 sm:$0xff]   ;;  %v3569_v12 = vld [vmem:[#allocation5 + $0x284] ss:$24 sps:$4 sm:$0xff]  }
 0x1c8   : > { %v767_v4 = vadd.f32 1e-06, %v735_v30  ;;  %v3633_v2 = vpop.eup %3632  ;;  %1926 = vmatprep.subr.bf16.mxu0 %v3551_v1  ;;  %1735 = vmatprep.subr.bf16.mxu1 %v3554_v49  ;;  %v3564_v1 = vld [vmem:[#allocation5 + $0x278] ss:$24 sps:$4 sm:$0xff]   ;;  %v3572_v49 = vld [vmem:[#allocation5 + $0x2ac] ss:$24 sps:$4 sm:$0xff]  }
 0x1c9   : > { %1602 = vmatprep.mubr.bf16.mxu0 %v4747_v24  ;;  %v875_v47 = vmul.f32 %v3633_v2, %v4563_v62  ;;  %v874_v35 = vmul.f32 %v3633_v2, %v5432_v58  ;;  %v3635_v42 = vpop.eup %3634  ;;  %v3566_v62 = vld [vmem:[#allocation5 + $0x27c] ss:$24 sps:$4 sm:$0xff]   ;;  %v5439_v22 = vld [vmem:[#allocation20_spill] sm:$0xff] }
 0x1ca   : > { %3644 = vrsqrt.f32 %v767_v4  ;;  %1603 = vmatmul.mubr.bf16.gmra.mrb[20].mxu0 %v4749_v26  ;;  %v841_v18 = vmul.f32 %v3635_v42, %v5433_v23  ;;  %v840_v0 = vmul.f32 %v3635_v42, %v5435_v60  ;;  %v5437_v10 = vld [vmem:[#allocation21_spill] sm:$0xff]  ;;  %v5438_v11 = vld [vmem:[#allocation22_spill] sm:$0xff]  ;;  %v5441_v13 = vld [vmem:[#allocation24_spill] sm:$0xff] }
 0x1cb   : > { %1927 = vmatpush1.bf16.msra.mxu0 %v3549_v38  ;;  %1736 = vmatpush1.bf16.msra.mxu1 %v3552_v31  ;;  %v4757_v44 = vpack.c.bf16 %v875_v47, %v873_v37  ;;  %v4759_v17 = vpack.c.bf16 %v874_v35, %v872_v14  ;;  %v5440_v38 = vld [vmem:[#allocation36_spill] sm:$0xff]  ;;  %v5442_v58 = vld [vmem:[#allocation26_spill] sm:$0xff]  ;;  %v5443_v42 = vld [vmem:[#allocation23_spill] sm:$0xff] }
 0x1cc   : > { %v3637_v16 = vpop.eup %3636  ;;  %1928 = vmatprep.subr.bf16.mxu0 %v3557_v56  ;;  %1737 = vmatprep.subr.bf16.mxu1 %v3560_v54  ;;  %v3567_v56 = vld [vmem:[#allocation5 + $0x280] ss:$24 sps:$4 sm:$0xff]   ;;  %v3581_v60 = vld [vmem:[#allocation5 + $0x2e4] ss:$24 sps:$4 sm:$0xff]  }
 0x1cd   : > { %1692 = vmatprep.mubr.bf16.mxu1 %v4757_v44  ;;  %v843_v20 = vmul.f32 %v3637_v16, %v5434_v33  ;;  %v842_v59 = vmul.f32 %v3637_v16, %v5436_v32  ;;  %v3639_v57 = vpop.eup %3638  ;;  %v3570_v47 = vld [vmem:[#allocation5 + $0x2a8] ss:$24 sps:$4 sm:$0xff]  }
 0x1ce   : > { %1693 = vmatmul.mubr.bf16.gmra.mrb[24].mxu1 %v4759_v17  ;;  %v877_v30 = vmul.f32 %v3639_v57, %v5437_v10  ;;  %v876_v4 = vmul.f32 %v3639_v57, %v5439_v22  ;;  %v3573_v33 = vld [vmem:[#allocation5 + $0x2b0] ss:$24 sps:$4 sm:$0xff]  }
 0x1cf   : > { %1929 = vmatpush1.bf16.msra.mxu0 %v3555_v51  ;;  %1738 = vmatpush1.bf16.msra.mxu1 %v3558_v27  ;;  %v4767_v40 = vpack.c.bf16 %v843_v20, %v841_v18  ;;  %v4769_v28 = vpack.c.bf16 %v842_v59, %v840_v0  ;;  %v5444_v27 = vld [vmem:[#allocation25_spill] sm:$0xff]  ;;  %v3579_v0 = vld [vmem:[#allocation5 + $0x2e0] ss:$24 sps:$4 sm:$0xff]  }
 0x1d0   : > { %v3641_v41 = vpop.eup %3640  ;;  %1930 = vmatprep.subr.bf16.mxu0 %v3563_v43  ;;  %1739 = vmatprep.subr.bf16.mxu1 %v3566_v62  ;;  %v3575_v43 = vld [vmem:[#allocation5 + $0x2b4] ss:$24 sps:$4 sm:$0xff]   ;;  %v3576_v20 = vld [vmem:[#allocation5 + $0x2d8] ss:$24 sps:$4 sm:$0xff]  }
 0x1d1   : > { %v3643_v29 = vpop.eup %3642  ;;  %1612 = vmatprep.mubr.bf16.mxu0 %v4767_v40  ;;  %v845_v14 = vmul.f32 %v3641_v41, %v5441_v13  ;;  %v844_v51 = vmul.f32 %v3641_v41, %v5443_v42  ;;  %v3578_v62 = vld [vmem:[#allocation5 + $0x2dc] ss:$24 sps:$4 sm:$0xff]  }
 0x1d2   : > { %v879_v39 = vmul.f32 %v3643_v29, %v5438_v11  ;;  %v878_v31 = vmul.f32 %v3643_v29, %v5440_v38  ;;  %1613 = vmatmul.mubr.bf16.gmra.mrb[24].mxu0 %v4769_v28 }
 0x1d3   : > { %1931 = vmatpush1.bf16.msra.mxu0 %v3561_v5  ;;  %1740 = vmatpush1.bf16.msra.mxu1 %v3564_v1 }
 0x1d4   : > { %v3645_v2 = vpop.eup %3644  ;;  %v4777_v37 = vpack.c.bf16 %v879_v39, %v877_v30  ;;  %v4779_v54 = vpack.c.bf16 %v878_v31, %v876_v4  ;;  %1932 = vmatprep.subr.bf16.mxu0 %v3569_v12  ;;  %1741 = vmatprep.subr.bf16.mxu1 %v3572_v49 }
 0x1d5   : > { %v847_v35 = vmul.f32 %v3645_v2, %v5442_v58  ;;  %v846_v16 = vmul.f32 %v3645_v2, %v5444_v27 }
 0x1d6   : > { %1702 = vmatprep.mubr.bf16.mxu1 %v4777_v37 }
 0x1d7   : > { %1703 = vmatmul.mubr.bf16.gmra.mrb[28].mxu1 %v4779_v54  ;;  %v895_v23 = vpack.c.bf16 %v847_v35, %v845_v14  ;;  %v894_v18 = vpack.c.bf16 %v846_v16, %v844_v51  ;;  %1933 = vmatpush1.bf16.msra.mxu0 %v3567_v56 }
 0x1d8   : > { %1742 = vmatpush1.bf16.msra.mxu1 %v3570_v47  ;;  %1745 = vmatprep.mubr.bf16.mxu1 %v4647_v61 }
 0x1d9   : > { %1622 = vmatprep.mubr.bf16.mxu0 %v895_v23  ;;  %1934 = vmatprep.subr.bf16.mxu0 %v3575_v43 }
 0x1da   : > { %1743 = vmatprep.subr.bf16.mxu1 %v3578_v62  ;;  %1623 = vmatmul.mubr.bf16.gmra.mrb[28].mxu0 %v894_v18 }
 0x1db   : > { %1935 = vmatpush1.bf16.msra.mxu0 %v3573_v33  ;;  %1938 = vmatprep.mubr.bf16.mxu0 %v4647_v61  ;;  %v5445_v61 = vld [vmem:[#allocation28_spill] sm:$0xff] }
 0x1dc   : > { %1744 = vmatpush1.bf16.msra.mxu1 %v3576_v20  ;;  %1936 = vmatprep.subr.bf16.mxu0 %v3581_v60 }
 0x1df   : > { %1746 = vmatmul.mubr.bf16.vlgmr.msra.gmra.mrb[32].mxu1 %v4649_v25  ;;  %1937 = vmatpush1.bf16.msra.mxu0 %v3579_v0 }
 0x1e0   : > { %1755 = vmatprep.mubr.bf16.mxu1 %v4667_v8 }
 0x1e2   : > { %1939 = vmatmul.mubr.bf16.vlgmr.msra.gmra.mrb[32].mxu0 %v4649_v25  ;;  %v5446_v25 = vld [vmem:[#allocation27_spill] sm:$0xff] }
 0x1e3   : > { %1948 = vmatprep.mubr.bf16.mxu0 %v4667_v8 }
 0x1e7   : > { %1756 = vmatmul.mubr.bf16.gmra.mrb[36].mxu1 %v4669_v36 }
 0x1e8   : > { %1765 = vmatprep.mubr.bf16.mxu1 %v4687_v48 }
 0x1ea   : > { %1949 = vmatmul.mubr.bf16.gmra.mrb[36].mxu0 %v4669_v36  ;;  %v4853_v36 = vld [vmem:[%s5317_s2] sm:$0x3f] }
 0x1eb   : > { %1958 = vmatprep.mubr.bf16.mxu0 %v4687_v48 }
 0x1ef   : > { %1766 = vmatmul.mubr.bf16.gmra.mrb[40].mxu1 %v4689_v52 }
 0x1f0   : > { %1775 = vmatprep.mubr.bf16.mxu1 %v4707_v19 }
 0x1f2   : > { %1959 = vmatmul.mubr.bf16.gmra.mrb[40].mxu0 %v4689_v52 }
 0x1f3   : > { %1968 = vmatprep.mubr.bf16.mxu0 %v4707_v19 }
 0x1f7   : > { %1776 = vmatmul.mubr.bf16.gmra.mrb[44].mxu1 %v4709_v15 }
 0x1f8   : > { %1785 = vmatprep.mubr.bf16.mxu1 %v4727_v55 }
 0x1fa   : > { %1969 = vmatmul.mubr.bf16.gmra.mrb[44].mxu0 %v4709_v15 }
 0x1fb   : > { %1978 = vmatprep.mubr.bf16.mxu0 %v4727_v55 }
 0x1ff   : > { %1786 = vmatmul.mubr.bf16.gmra.mrb[48].mxu1 %v4729_v34 }
 0x200   : > { %1795 = vmatprep.mubr.bf16.mxu1 %v4747_v24 }
 0x202   : > { %1979 = vmatmul.mubr.bf16.gmra.mrb[48].mxu0 %v4729_v34 }
 0x203   : > { %1988 = vmatprep.mubr.bf16.mxu0 %v4747_v24 }
 0x207   : > { %1796 = vmatmul.mubr.bf16.gmra.mrb[52].mxu1 %v4749_v26 }
 0x208   : > { %1805 = vmatprep.mubr.bf16.mxu1 %v4767_v40 }
 0x20a   : > { %1989 = vmatmul.mubr.bf16.gmra.mrb[52].mxu0 %v4749_v26 }
 0x20b   : > { %1998 = vmatprep.mubr.bf16.mxu0 %v4767_v40 }
 0x20f   : > { %1806 = vmatmul.mubr.bf16.gmra.mrb[56].mxu1 %v4769_v28 }
 0x210   : > { %1815 = vmatprep.mubr.bf16.mxu1 %v895_v23 }
 0x212   : > { %1999 = vmatmul.mubr.bf16.gmra.mrb[56].mxu0 %v4769_v28 }
 0x213   : > { %2008 = vmatprep.mubr.bf16.mxu0 %v895_v23 }
 0x217   : > { %1816 = vmatmul.mubr.bf16.gmra.mrb[60].mxu1 %v894_v18 }
 0x218   : > { %1825 = vmatprep.mubr.bf16.mxu1 %v5445_v61 }
 0x21a   : > { %2009 = vmatmul.mubr.bf16.gmra.mrb[60].mxu0 %v894_v18 }
 0x21b   : > { %2018 = vmatprep.mubr.bf16.mxu0 %v5445_v61 }
 0x21f   : > { %1826 = vmatmul.mubr.bf16.gmra.mrb[64].mxu1 %v5446_v25 }
 0x220   : > { %1835 = vmatprep.mubr.bf16.mxu1 %v4657_v53 }
 0x222   : > { %2019 = vmatmul.mubr.bf16.gmra.mrb[64].mxu0 %v5446_v25 }
 0x223   : > { %2028 = vmatprep.mubr.bf16.mxu0 %v4657_v53  ;;  %v1010_v53 = vlaneseq }
 0x227   : > { %1836 = vmatmul.mubr.bf16.gmra.mrb[68].mxu1 %v4659_v46 }
 0x228   : > { %1845 = vmatprep.mubr.bf16.mxu1 %v4677_v7 }
 0x22a   : > { %2029 = vmatmul.mubr.bf16.gmra.mrb[68].mxu0 %v4659_v46  ;;  %v4847_v46 = vshrl.u32 %v1010_v53, 7 }
 0x22b   : > { %2038 = vmatprep.mubr.bf16.mxu0 %v4677_v7 }
 0x22c   : > { %v1012_v8 = vsub.s32 0, %v4847_v46  ;;  %v1016_v7 = vsub.s32 1, %v4847_v46 }
 0x22e   : > { %v4860_v48 = vrot.slane %v4853_v36, %v1016_v7 }
 0x22f   : > { %1846 = vmatmul.mubr.bf16.gmra.mrb[72].mxu1 %v4679_v45 }
 0x230   : > { %1855 = vmatprep.mubr.bf16.mxu1 %v4697_v3 }
 0x232   : > { %2039 = vmatmul.mubr.bf16.gmra.mrb[72].mxu0 %v4679_v45  ;;  %v4857_v45 = vrot.slane %v4853_v36, %v1012_v8 }
 0x233   : > { %2048 = vmatprep.mubr.bf16.mxu0 %v4697_v3 }
 0x237   : > { %1856 = vmatmul.mubr.bf16.gmra.mrb[76].mxu1 %v4699_v21 }
 0x238   : > { %1865 = vmatprep.mubr.bf16.mxu1 %v4717_v63 }
 0x23a   : > { %2049 = vmatmul.mubr.bf16.gmra.mrb[76].mxu0 %v4699_v21 }
 0x23b   : > { %2058 = vmatprep.mubr.bf16.mxu0 %v4717_v63 }
 0x23f   : > { %1866 = vmatmul.mubr.bf16.gmra.mrb[80].mxu1 %v4719_v9 }
 0x240   : > { %1875 = vmatprep.mubr.bf16.mxu1 %v4737_v6 }
 0x242   : > { %2059 = vmatmul.mubr.bf16.gmra.mrb[80].mxu0 %v4719_v9 }
 0x243   : > { %2068 = vmatprep.mubr.bf16.mxu0 %v4737_v6 }
 0x247   : > { %1876 = vmatmul.mubr.bf16.gmra.mrb[84].mxu1 %v4739_v50 }
 0x248   : > { %1885 = vmatprep.mubr.bf16.mxu1 %v4757_v44 }
 0x24a   : > { %2069 = vmatmul.mubr.bf16.gmra.mrb[84].mxu0 %v4739_v50 }
 0x24b   : > { %2078 = vmatprep.mubr.bf16.mxu0 %v4757_v44 }
 0x24f   : > { %1886 = vmatmul.mubr.bf16.gmra.mrb[88].mxu1 %v4759_v17 }
 0x250   : > { %1895 = vmatprep.mubr.bf16.mxu1 %v4777_v37 }
 0x252   : > { %2079 = vmatmul.mubr.bf16.gmra.mrb[88].mxu0 %v4759_v17 }
 0x253   : > { %2088 = vmatprep.mubr.bf16.mxu0 %v4777_v37 }
 0x257   : > { %1896 = vmatmul.mubr.bf16.gmra.mrb[92].mxu1 %v4779_v54 }
 0x25a   : > { %2089 = vmatmul.mubr.bf16.gmra.mrb[92].mxu0 %v4779_v54 }
 0x271   : > { %v1634_v52 = vpop.f32.mrb[0].mxu1 }
 0x272   : > { %v1635_v3 = vadd.f32 %v1634_v52, %v4857_v45  ;;  %v1636_v21 = vpop.f32.mrb[1].mxu1 }
 0x273   : > { %v1637_v19 = vadd.f32 %v1636_v21, %v4860_v48  ;;  %v1638_v15 = vpop.f32.mrb[2].mxu1 }
 0x274   : > { %v1639_v63 = vadd.f32 %v1638_v15, %v4857_v45  ;;  %v1640_v9 = vpop.f32.mrb[3].mxu1 }
 0x275   : > { %v3234_v55 = vpack.c.bf16 %v1637_v19, %v1635_v3  ;;  %v1641_v34 = vadd.f32 %v1640_v9, %v4860_v48  ;;  %v1554_v6 = vpop.f32.mrb[0].mxu0 }
 0x276   : > { %v1555_v50 = vadd.f32 %v1554_v6, %v4857_v45  ;;  %v1556_v24 = vpop.f32.mrb[1].mxu0 }
 0x277   : > { %2307 = vst [vmem:[%s4871_s8 + $0x80] sm:$0xff] %v3234_v55  ;;  %v3235_v26 = vpack.c.bf16 %v1641_v34, %v1639_v63  ;;  %v1557_v44 = vadd.f32 %v1556_v24, %v4860_v48  ;;  %v1558_v17 = vpop.f32.mrb[2].mxu0 }
 0x278   : > { %v1559_v32 = vadd.f32 %v1558_v17, %v4857_v45  ;;  %v1560_v59 = vpop.f32.mrb[3].mxu0 }
 0x279   : > { %2308 = vst [vmem:[%s4871_s8 + $0x88] sm:$0xff] %v3235_v26  ;;  %v3218_v57 = vpack.c.bf16 %v1557_v44, %v1555_v50  ;;  %v1561_v41 = vadd.f32 %v1560_v59, %v4860_v48  ;;  %v1644_v40 = vpop.f32.mrb[4].mxu1 }
 0x27a   : > { %v1645_v5 = vadd.f32 %v1644_v40, %v4857_v45  ;;  %v1646_v28 = vpop.f32.mrb[5].mxu1 }
 0x27b   : > { %2291 = vst [vmem:[%s4871_s8] sm:$0xff] %v3218_v57  ;;  %v3219_v1 = vpack.c.bf16 %v1561_v41, %v1559_v32  ;;  %v1647_v29 = vadd.f32 %v1646_v28, %v4860_v48  ;;  %v1648_v12 = vpop.f32.mrb[6].mxu1 }
 0x27c   : > { %v1649_v49 = vadd.f32 %v1648_v12, %v4857_v45  ;;  %v1650_v10 = vpop.f32.mrb[7].mxu1 }
 0x27d   : > { %2292 = vst [vmem:[%s4871_s8 + $0x8] sm:$0xff] %v3219_v1  ;;  %v3236_v30 = vpack.c.bf16 %v1647_v29, %v1645_v5  ;;  %v1651_v11 = vadd.f32 %v1650_v10, %v4860_v48  ;;  %v1564_v39 = vpop.f32.mrb[4].mxu0 }
 0x27e   : > { %v1565_v22 = vadd.f32 %v1564_v39, %v4857_v45  ;;  %v1566_v4 = vpop.f32.mrb[5].mxu0 }
 0x27f   : > { %2309 = vst [vmem:[%s4871_s8 + $0x90] sm:$0xff] %v3236_v30  ;;  %v3237_v38 = vpack.c.bf16 %v1651_v11, %v1649_v49  ;;  %v1567_v31 = vadd.f32 %v1566_v4, %v4860_v48  ;;  %v1568_v2 = vpop.f32.mrb[6].mxu0 }
 0x280   : > { %v1569_v37 = vadd.f32 %v1568_v2, %v4857_v45  ;;  %v1570_v56 = vpop.f32.mrb[7].mxu0 }
 0x281   : > { %2310 = vst [vmem:[%s4871_s8 + $0x98] sm:$0xff] %v3237_v38  ;;  %v3220_v54 = vpack.c.bf16 %v1567_v31, %v1565_v22  ;;  %v1571_v47 = vadd.f32 %v1570_v56, %v4860_v48  ;;  %v1654_v13 = vpop.f32.mrb[8].mxu1 }
 0x282   : > { %v1655_v14 = vadd.f32 %v1654_v13, %v4857_v45  ;;  %v1656_v58 = vpop.f32.mrb[9].mxu1 }
 0x283   : > { %2293 = vst [vmem:[%s4871_s8 + $0x10] sm:$0xff] %v3220_v54  ;;  %v3221_v35 = vpack.c.bf16 %v1571_v47, %v1569_v37  ;;  %v1657_v42 = vadd.f32 %v1656_v58, %v4860_v48  ;;  %v1658_v51 = vpop.f32.mrb[10].mxu1 }
 0x284   : > { %v1659_v27 = vadd.f32 %v1658_v51, %v4857_v45  ;;  %v1660_v16 = vpop.f32.mrb[11].mxu1 }
 0x285   : > { %2294 = vst [vmem:[%s4871_s8 + $0x18] sm:$0xff] %v3221_v35  ;;  %v3238_v43 = vpack.c.bf16 %v1657_v42, %v1655_v14  ;;  %v1661_v62 = vadd.f32 %v1660_v16, %v4860_v48  ;;  %v1574_v23 = vpop.f32.mrb[8].mxu0 }
 0x286   : > { %v1575_v18 = vadd.f32 %v1574_v23, %v4857_v45  ;;  %v1576_v33 = vpop.f32.mrb[9].mxu0 }
 0x287   : > { %2311 = vst [vmem:[%s4871_s8 + $0xa0] sm:$0xff] %v3238_v43  ;;  %v3239_v20 = vpack.c.bf16 %v1661_v62, %v1659_v27  ;;  %v1577_v60 = vadd.f32 %v1576_v33, %v4860_v48  ;;  %v1578_v0 = vpop.f32.mrb[10].mxu0 }
 0x288   : > { %v1579_v61 = vadd.f32 %v1578_v0, %v4857_v45  ;;  %v1580_v25 = vpop.f32.mrb[11].mxu0 }
 0x289   : > { %2312 = vst [vmem:[%s4871_s8 + $0xa8] sm:$0xff] %v3239_v20  ;;  %v3222_v53 = vpack.c.bf16 %v1577_v60, %v1575_v18  ;;  %v1581_v8 = vadd.f32 %v1580_v25, %v4860_v48  ;;  %v1664_v7 = vpop.f32.mrb[12].mxu1 }
 0x28a   : > { %v1665_v52 = vadd.f32 %v1664_v7, %v4857_v45  ;;  %v1666_v3 = vpop.f32.mrb[13].mxu1 }
 0x28b   : > { %2295 = vst [vmem:[%s4871_s8 + $0x20] sm:$0xff] %v3222_v53  ;;  %v3223_v21 = vpack.c.bf16 %v1581_v8, %v1579_v61  ;;  %v1667_v19 = vadd.f32 %v1666_v3, %v4860_v48  ;;  %v1668_v15 = vpop.f32.mrb[14].mxu1 }
 0x28c   : > { %v1669_v63 = vadd.f32 %v1668_v15, %v4857_v45  ;;  %v1670_v9 = vpop.f32.mrb[15].mxu1 }
 0x28d   : > { %2296 = vst [vmem:[%s4871_s8 + $0x28] sm:$0xff] %v3223_v21  ;;  %v3240_v55 = vpack.c.bf16 %v1667_v19, %v1665_v52  ;;  %v1671_v34 = vadd.f32 %v1670_v9, %v4860_v48  ;;  %v1584_v6 = vpop.f32.mrb[12].mxu0 }
 0x28e   : > { %v1585_v50 = vadd.f32 %v1584_v6, %v4857_v45  ;;  %v1586_v24 = vpop.f32.mrb[13].mxu0 }
 0x28f   : > { %2313 = vst [vmem:[%s4871_s8 + $0xb0] sm:$0xff] %v3240_v55  ;;  %v3241_v26 = vpack.c.bf16 %v1671_v34, %v1669_v63  ;;  %v1587_v44 = vadd.f32 %v1586_v24, %v4860_v48  ;;  %v1588_v17 = vpop.f32.mrb[14].mxu0 }
 0x290   : > { %v1589_v32 = vadd.f32 %v1588_v17, %v4857_v45  ;;  %v1590_v59 = vpop.f32.mrb[15].mxu0 }
 0x291   : > { %2314 = vst [vmem:[%s4871_s8 + $0xb8] sm:$0xff] %v3241_v26  ;;  %v3224_v57 = vpack.c.bf16 %v1587_v44, %v1585_v50  ;;  %v1591_v41 = vadd.f32 %v1590_v59, %v4860_v48  ;;  %v1674_v40 = vpop.f32.mrb[16].mxu1 }
 0x292   : > { %v1675_v5 = vadd.f32 %v1674_v40, %v4857_v45  ;;  %v1676_v28 = vpop.f32.mrb[17].mxu1 }
 0x293   : > { %2297 = vst [vmem:[%s4871_s8 + $0x30] sm:$0xff] %v3224_v57  ;;  %v3225_v1 = vpack.c.bf16 %v1591_v41, %v1589_v32  ;;  %v1677_v29 = vadd.f32 %v1676_v28, %v4860_v48  ;;  %v1678_v12 = vpop.f32.mrb[18].mxu1 }
 0x294   : > { %v1679_v49 = vadd.f32 %v1678_v12, %v4857_v45  ;;  %v1680_v10 = vpop.f32.mrb[19].mxu1 }
 0x295   : > { %2298 = vst [vmem:[%s4871_s8 + $0x38] sm:$0xff] %v3225_v1  ;;  %v3242_v30 = vpack.c.bf16 %v1677_v29, %v1675_v5  ;;  %v1681_v11 = vadd.f32 %v1680_v10, %v4860_v48  ;;  %v1594_v39 = vpop.f32.mrb[16].mxu0  ;;  %v1020_v1 = vsub.s32 2, %v4847_v46  ;;  %v1024_v10 = vsub.s32 3, %v4847_v46 }
 0x296   : > { %v1595_v22 = vadd.f32 %v1594_v39, %v4857_v45  ;;  %v1596_v4 = vpop.f32.mrb[17].mxu0 }
 0x297   : > { %2315 = vst [vmem:[%s4871_s8 + $0xc0] sm:$0xff] %v3242_v30  ;;  %v3243_v38 = vpack.c.bf16 %v1681_v11, %v1679_v49  ;;  %v1597_v31 = vadd.f32 %v1596_v4, %v4860_v48  ;;  %v1598_v2 = vpop.f32.mrb[18].mxu0 }
 0x298   : > { %v1599_v37 = vadd.f32 %v1598_v2, %v4857_v45  ;;  %v1600_v56 = vpop.f32.mrb[19].mxu0  ;;  %v4960_v2 = vrot.slane %v4853_v36, %v1020_v1 }
 0x299   : > { %2316 = vst [vmem:[%s4871_s8 + $0xc8] sm:$0xff] %v3243_v38  ;;  %v3226_v54 = vpack.c.bf16 %v1597_v31, %v1595_v22  ;;  %v1601_v47 = vadd.f32 %v1600_v56, %v4860_v48  ;;  %v1684_v13 = vpop.f32.mrb[20].mxu1 }
 0x29a   : > { %v1685_v14 = vadd.f32 %v1684_v13, %v4857_v45  ;;  %v1686_v58 = vpop.f32.mrb[21].mxu1  ;;  %v4966_v13 = vrot.slane %v4853_v36, %v1024_v10 }
 0x29b   : > { %2299 = vst [vmem:[%s4871_s8 + $0x40] sm:$0xff] %v3226_v54  ;;  %v3227_v35 = vpack.c.bf16 %v1601_v47, %v1599_v37  ;;  %v1687_v42 = vadd.f32 %v1686_v58, %v4860_v48  ;;  %v1688_v51 = vpop.f32.mrb[22].mxu1  ;;  %v1028_v37 = vsub.s32 4, %v4847_v46 }
 0x29c   : > { %v1689_v27 = vadd.f32 %v1688_v51, %v4857_v45  ;;  %v1690_v16 = vpop.f32.mrb[23].mxu1 }
 0x29d   : > { %2300 = vst [vmem:[%s4871_s8 + $0x48] sm:$0xff] %v3227_v35  ;;  %v3244_v43 = vpack.c.bf16 %v1687_v42, %v1685_v14  ;;  %v1691_v62 = vadd.f32 %v1690_v16, %v4860_v48  ;;  %v1604_v23 = vpop.f32.mrb[20].mxu0  ;;  %v1032_v14 = vsub.s32 5, %v4847_v46 }
 0x29e   : > { %v1605_v18 = vadd.f32 %v1604_v23, %v4857_v45  ;;  %v1606_v33 = vpop.f32.mrb[21].mxu0 }
 0x29f   : > { %2317 = vst [vmem:[%s4871_s8 + $0xd0] sm:$0xff] %v3244_v43  ;;  %v3245_v20 = vpack.c.bf16 %v1691_v62, %v1689_v27  ;;  %v1607_v60 = vadd.f32 %v1606_v33, %v4860_v48  ;;  %v1608_v0 = vpop.f32.mrb[22].mxu0  ;;  %v4974_v62 = vrot.slane %v4853_v36, %v1028_v37 }
 0x2a0   : > { %v1609_v61 = vadd.f32 %v1608_v0, %v4857_v45  ;;  %v1610_v25 = vpop.f32.mrb[23].mxu0 }
 0x2a1   : > { %2318 = vst [vmem:[%s4871_s8 + $0xd8] sm:$0xff] %v3245_v20  ;;  %v3228_v53 = vpack.c.bf16 %v1607_v60, %v1605_v18  ;;  %v1611_v8 = vadd.f32 %v1610_v25, %v4860_v48  ;;  %v1694_v7 = vpop.f32.mrb[24].mxu1  ;;  %v4979_v18 = vrot.slane %v4853_v36, %v1032_v14 }
 0x2a2   : > { %v1695_v52 = vadd.f32 %v1694_v7, %v4857_v45  ;;  %v1696_v3 = vpop.f32.mrb[25].mxu1 }
 0x2a3   : > { %2301 = vst [vmem:[%s4871_s8 + $0x50] sm:$0xff] %v3228_v53  ;;  %v3229_v21 = vpack.c.bf16 %v1611_v8, %v1609_v61  ;;  %v1697_v19 = vadd.f32 %v1696_v3, %v4860_v48  ;;  %v1698_v15 = vpop.f32.mrb[26].mxu1 }
 0x2a4   : > { %v1699_v63 = vadd.f32 %v1698_v15, %v4857_v45  ;;  %v1700_v9 = vpop.f32.mrb[27].mxu1 }
 0x2a5   : > { %2302 = vst [vmem:[%s4871_s8 + $0x58] sm:$0xff] %v3229_v21  ;;  %v3246_v55 = vpack.c.bf16 %v1697_v19, %v1695_v52  ;;  %v1701_v34 = vadd.f32 %v1700_v9, %v4860_v48  ;;  %v1614_v6 = vpop.f32.mrb[24].mxu0 }
 0x2a6   : > { %v1615_v50 = vadd.f32 %v1614_v6, %v4857_v45  ;;  %v1616_v24 = vpop.f32.mrb[25].mxu0 }
 0x2a7   : > { %2319 = vst [vmem:[%s4871_s8 + $0xe0] sm:$0xff] %v3246_v55  ;;  %v3247_v26 = vpack.c.bf16 %v1701_v34, %v1699_v63  ;;  %v1617_v44 = vadd.f32 %v1616_v24, %v4860_v48  ;;  %v1618_v17 = vpop.f32.mrb[26].mxu0 }
 0x2a8   : > { %v1619_v32 = vadd.f32 %v1618_v17, %v4857_v45  ;;  %v1620_v59 = vpop.f32.mrb[27].mxu0 }
 0x2a9   : > { %2320 = vst [vmem:[%s4871_s8 + $0xe8] sm:$0xff] %v3247_v26  ;;  %v3230_v57 = vpack.c.bf16 %v1617_v44, %v1615_v50  ;;  %v1621_v41 = vadd.f32 %v1620_v59, %v4860_v48 }
 0x2aa   : > { %v1704_v40 = vpop.f32.mrb[28].mxu1 }
 0x2ab   : > { %v1705_v5 = vadd.f32 %v1704_v40, %v4857_v45  ;;  %v1706_v28 = vpop.f32.mrb[29].mxu1  ;;  %2303 = vst [vmem:[%s4871_s8 + $0x60] sm:$0xff] %v3230_v57  ;;  %v3231_v29 = vpack.c.bf16 %v1621_v41, %v1619_v32 }
 0x2ac   : > { %v1707_v12 = vadd.f32 %v1706_v28, %v4860_v48  ;;  %v1708_v49 = vpop.f32.mrb[30].mxu1 }
 0x2ad   : > { %v1709_v30 = vadd.f32 %v1708_v49, %v4857_v45  ;;  %v1710_v11 = vpop.f32.mrb[31].mxu1  ;;  %2304 = vst [vmem:[%s4871_s8 + $0x68] sm:$0xff] %v3231_v29  ;;  %v1624_v4 = vpop.f32.mrb[28].mxu0 }
 0x2ae   : > { %v3248_v39 = vpack.c.bf16 %v1707_v12, %v1705_v5  ;;  %v1711_v22 = vadd.f32 %v1710_v11, %v4860_v48  ;;  %v1625_v38 = vadd.f32 %v1624_v4, %v4857_v45  ;;  %v1626_v31 = vpop.f32.mrb[29].mxu0 }
 0x2af   : > { %v1627_v54 = vadd.f32 %v1626_v31, %v4860_v48  ;;  %v1628_v47 = vpop.f32.mrb[30].mxu0 }
 0x2b0   : > { %2321 = vst [vmem:[%s4871_s8 + $0xf0] sm:$0xff] %v3248_v39  ;;  %v3249_v56 = vpack.c.bf16 %v1711_v22, %v1709_v30  ;;  %v1629_v58 = vadd.f32 %v1628_v47, %v4857_v45  ;;  %v1630_v35 = vpop.f32.mrb[31].mxu0 }
 0x2b1   : > { %v3232_v42 = vpack.c.bf16 %v1627_v54, %v1625_v38  ;;  %v1631_v51 = vadd.f32 %v1630_v35, %v4860_v48 }
 0x2b2   : > { %2322 = vst [vmem:[%s4871_s8 + $0xf8] sm:$0xff] %v3249_v56  ;;  %v1747_v27 = vpop.f32.mrb[32].mxu1 }
 0x2b3   : > { %v1748_v16 = vadd.f32 %v1747_v27, %v4960_v2  ;;  %v1749_v43 = vpop.f32.mrb[33].mxu1  ;;  %2305 = vst [vmem:[%s4871_s8 + $0x70] sm:$0xff] %v3232_v42  ;;  %v3233_v23 = vpack.c.bf16 %v1631_v51, %v1629_v58 }
 0x2b4   : > { %v1750_v46 = vadd.f32 %v1749_v43, %v4966_v13  ;;  %v1751_v45 = vpop.f32.mrb[34].mxu1 }
 0x2b5   : > { %v1752_v33 = vadd.f32 %v1751_v45, %v4960_v2  ;;  %v1753_v48 = vpop.f32.mrb[35].mxu1  ;;  %2306 = vst [vmem:[%s4871_s8 + $0x78] sm:$0xff] %v3233_v23  ;;  %v1940_v0 = vpop.f32.mrb[32].mxu0  ;;  %s3710_s8 = scalar_lea.vmem %s3709_s28, 8192 }
 0x2b6   : > { %v3250_v20 = vpack.c.bf16 %v1750_v46, %v1748_v16  ;;  %v1754_v60 = vadd.f32 %v1753_v48, %v4966_v13  ;;  %v1941_v61 = vadd.f32 %v1940_v0, %v4974_v62  ;;  %v1942_v25 = vpop.f32.mrb[33].mxu0  ;;  %p3712_p0 = scmp.lt.s32.totalorder %s3710_s8, %s3704_s14 }
 0x2b7   : > { %v1943_v53 = vadd.f32 %v1942_v25, %v4979_v18  ;;  %v1944_v8 = vpop.f32.mrb[34].mxu0 }
 0x2b8   : > { %2515 = vst [vmem:[%s4989_s9] sm:$0xff] %v3250_v20  ;;  %v3251_v36 = vpack.c.bf16 %v1754_v60, %v1752_v33  ;;  %v1945_v7 = vadd.f32 %v1944_v8, %v4974_v62  ;;  %v1946_v52 = vpop.f32.mrb[35].mxu0  ;;  %p3713_p5 = por %p3712_p0, %p3711_p11 }
 0x2b9   : > { %v3282_v3 = vpack.c.bf16 %v1943_v53, %v1941_v61  ;;  %v1947_v21 = vadd.f32 %v1946_v52, %v4979_v18 }
 0x2ba   : > { %2516 = vst [vmem:[%s4989_s9 + $0x8] sm:$0xff] %v3251_v36  ;;  %v1757_v19 = vpop.f32.mrb[36].mxu1  ;;  %p3714_p9 = pnand %p3713_p5, %p3707_p12 }
 0x2bb   : > { %v1758_v15 = vadd.f32 %v1757_v19, %v4960_v2  ;;  %v1759_v63 = vpop.f32.mrb[37].mxu1  ;;  %2739 = vst [vmem:[%s5007_s30] sm:$0xff] %v3282_v3  ;;  %v3283_v9 = vpack.c.bf16 %v1947_v21, %v1945_v7 }
 0x2bc   : > { %v1760_v55 = vadd.f32 %v1759_v63, %v4966_v13  ;;  %v1761_v34 = vpop.f32.mrb[38].mxu1 }
 0x2bd   : > { %3717 = shalt.err (!%p3714_p9)
}
 0x2be   : > { %s3718_s17 = scalar_lea.hbm %s5000_s15, 4096  ;;  %s3722_s26 = scalar_lea.hbm %s5318_s3, 8192 }
 0x2bf   : > { %p3719_p1 = scmp.ne.s32.totalorder %s5000_s15, %s3718_s17  ;;  %p3723_p7 = scmp.lt.u32.totalorder %s5000_s15, %s5318_s3 }
 0x2c0   : > { %p3724_p13 = scmp.lt.u32.totalorder %s3722_s26, %s3718_s17  ;;  %p3726_p6 = scmp.lt.u32.totalorder %s3718_s17, %s5000_s15 }
 0x2c1   : > { %p3720_p2 = pnand %p3719_p1, %p3987_p10 }
 0x2c2   : > { %p3725_p4 = por %p3724_p13, %p3723_p7 }
 0x2c3   : > { %p3721_p3 = pneg %p3720_p2 }
 0x2c4   : > { %p3727_p8 = por %p3726_p6, %p3725_p4 }
 0x2c6   : > { %p3728_p12 = pnand %p3727_p8, %p3721_p3 }
 0x2c8   : > { %3731 = shalt.err (!%p3728_p12)
}
 0x2c9   : > { %s3859_s14 = smov 128   ;;  %s3860_s8 = smov 8   ;;  %v1762_v6 = vadd.f32 %v1761_v34, %v4960_v2  ;;  %v1763_v50 = vpop.f32.mrb[39].mxu1  ;;  %2740 = vst [vmem:[%s5007_s30 + $0x8] sm:$0xff] %v3283_v9  ;;  %v3252_v24 = vpack.c.bf16 %v1760_v55, %v1758_v15  ;;  %v1950_v44 = vpop.f32.mrb[36].mxu0 }
 0x2ca   : > { %3355 = dma.vmem_to_hbm [thread:$0]  (%p3987_p10), %s5004_s10, 4096, %s5000_s15, %s2772_s12, %s3859_s14, %s3859_s14, %s3860_s8   ;;  %v1764_v26 = vadd.f32 %v1763_v50, %v4966_v13  ;;  %v1951_v17 = vadd.f32 %v1950_v44, %v4974_v62  ;;  %v1952_v32 = vpop.f32.mrb[37].mxu0  ;;  %v1767_v29 = vpop.f32.mrb[40].mxu1 }
 0x2cb   : > { %2517 = vst [vmem:[%s4989_s9 + $0x10] sm:$0xff] %v3252_v24  ;;  %v1953_v57 = vadd.f32 %v1952_v32, %v4979_v18  ;;  %v1954_v41 = vpop.f32.mrb[38].mxu0  ;;  %v1768_v12 = vadd.f32 %v1767_v29, %v4960_v2  ;;  %v1769_v49 = vpop.f32.mrb[41].mxu1  ;;  %s2776_s25 = sand.u32 1, %s3924_s24   ;;  %s2817_s29 = sshll.u32 %s4989_s9, 4  ;;  %s5220_s29 = int_to_ptr.vmem [resolvable:$true] %s2817_s29 }
 0x2cc   : > { %v3253_v59 = vpack.c.bf16 %v1764_v26, %v1762_v6  ;;  %v1955_v40 = vadd.f32 %v1954_v41, %v4974_v62  ;;  %v1956_v5 = vpop.f32.mrb[39].mxu0  ;;  %v1770_v30 = vadd.f32 %v1769_v49, %v4966_v13  ;;  %v1771_v11 = vpop.f32.mrb[42].mxu1  ;;  %s5218_s10 = scalar_lea.hbm %s5319_s4, %s4986_s6  ;;  %s2836_s12 = sshll.u32 %s5007_s30, 4  ;;  %s5262_s12 = int_to_ptr.vmem [resolvable:$true] %s2836_s12 }
 0x2cd   : > { %v3284_v28 = vpack.c.bf16 %v1953_v57, %v1951_v17  ;;  %v1957_v1 = vadd.f32 %v1956_v5, %v4979_v18  ;;  %v1772_v39 = vadd.f32 %v1771_v11, %v4960_v2  ;;  %v1773_v22 = vpop.f32.mrb[43].mxu1  ;;  %v1960_v31 = vpop.f32.mrb[40].mxu0  ;;  %s5226_s17 = scalar_lea.sflag [#allocation9], %s2776_s25  ;;  %s3732_s21 = scalar_lea.vmem %s5220_s29, 4096 }
 0x2ce   : > { %2518 = vst [vmem:[%s4989_s9 + $0x18] sm:$0xff] %v3253_v59  ;;  %v3254_v4 = vpack.c.bf16 %v1770_v30, %v1768_v12  ;;  %v1774_v38 = vadd.f32 %v1773_v22, %v4966_v13  ;;  %v1961_v37 = vadd.f32 %v1960_v31, %v4974_v62  ;;  %v1962_v56 = vpop.f32.mrb[41].mxu0  ;;  %v1777_v27 = vpop.f32.mrb[44].mxu1  ;;  %p3733_p11 = scmp.ne.s32.totalorder %s5220_s29, %s3732_s21  ;;  %s3861_s16 = smov [#allocation8]  }
 0x2cf   : > { %2741 = vst [vmem:[%s5007_s30 + $0x10] sm:$0xff] %v3284_v28  ;;  %v3285_v10 = vpack.c.bf16 %v1957_v1, %v1955_v40  ;;  %v1963_v47 = vadd.f32 %v1962_v56, %v4979_v18  ;;  %v1964_v14 = vpop.f32.mrb[42].mxu0  ;;  %v1778_v16 = vadd.f32 %v1777_v27, %v4960_v2  ;;  %v1779_v43 = vpop.f32.mrb[45].mxu1  ;;  %s3736_s26 = sshll.u32 %s3861_s16, 4  ;;  %s3737_s26 = int_to_ptr.vmem [resolvable:$false] %s3736_s26 }
 0x2d0   : > { %2519 = vst [vmem:[%s4989_s9 + $0x20] sm:$0xff] %v3254_v4  ;;  %v3255_v54 = vpack.c.bf16 %v1774_v38, %v1772_v39  ;;  %v1965_v58 = vadd.f32 %v1964_v14, %v4974_v62  ;;  %v1966_v35 = vpop.f32.mrb[43].mxu0  ;;  %v1780_v46 = vadd.f32 %v1779_v43, %v4966_v13  ;;  %v1781_v45 = vpop.f32.mrb[46].mxu1  ;;  %p3734_p0 = pnand %p3733_p11, %p3987_p10  ;;  %s3738_s28 = scalar_lea.vmem %s3737_s26, 8192 }
 0x2d1   : > { %2742 = vst [vmem:[%s5007_s30 + $0x18] sm:$0xff] %v3285_v10  ;;  %v3286_v42 = vpack.c.bf16 %v1963_v47, %v1961_v37  ;;  %v1967_v51 = vadd.f32 %v1966_v35, %v4979_v18  ;;  %v1782_v33 = vadd.f32 %v1781_v45, %v4960_v2  ;;  %v1783_v48 = vpop.f32.mrb[47].mxu1  ;;  %v1970_v0 = vpop.f32.mrb[44].mxu0  ;;  %p3739_p9 = scmp.lt.s32.totalorder %s5220_s29, %s3737_s26  ;;  %p3740_p1 = scmp.lt.s32.totalorder %s3738_s28, %s3732_s21 }
 0x2d2   : > { %2520 = vst [vmem:[%s4989_s9 + $0x28] sm:$0xff] %v3255_v54  ;;  %v3256_v20 = vpack.c.bf16 %v1780_v46, %v1778_v16  ;;  %v1784_v60 = vadd.f32 %v1783_v48, %v4966_v13  ;;  %v1971_v61 = vadd.f32 %v1970_v0, %v4974_v62  ;;  %v1972_v25 = vpop.f32.mrb[45].mxu0  ;;  %v1787_v19 = vpop.f32.mrb[48].mxu1  ;;  %p3735_p5 = pneg %p3734_p0 }
 0x2d3   : > { %2743 = vst [vmem:[%s5007_s30 + $0x20] sm:$0xff] %v3286_v42  ;;  %v3287_v23 = vpack.c.bf16 %v1967_v51, %v1965_v58  ;;  %v1973_v53 = vadd.f32 %v1972_v25, %v4979_v18  ;;  %v1974_v8 = vpop.f32.mrb[46].mxu0  ;;  %v1788_v15 = vadd.f32 %v1787_v19, %v4960_v2  ;;  %v1789_v63 = vpop.f32.mrb[49].mxu1  ;;  %p3741_p2 = por %p3740_p1, %p3739_p9 }
 0x2d4   : > { %2521 = vst [vmem:[%s4989_s9 + $0x30] sm:$0xff] %v3256_v20  ;;  %v3257_v36 = vpack.c.bf16 %v1784_v60, %v1782_v33  ;;  %v1975_v7 = vadd.f32 %v1974_v8, %v4974_v62  ;;  %v1976_v52 = vpop.f32.mrb[47].mxu0  ;;  %v1790_v55 = vadd.f32 %v1789_v63, %v4966_v13  ;;  %v1791_v34 = vpop.f32.mrb[50].mxu1 }
 0x2d5   : > { %2744 = vst [vmem:[%s5007_s30 + $0x28] sm:$0xff] %v3287_v23  ;;  %v3288_v3 = vpack.c.bf16 %v1973_v53, %v1971_v61  ;;  %v1977_v21 = vadd.f32 %v1976_v52, %v4979_v18  ;;  %v1792_v6 = vadd.f32 %v1791_v34, %v4960_v2  ;;  %v1793_v50 = vpop.f32.mrb[51].mxu1  ;;  %v1980_v44 = vpop.f32.mrb[48].mxu0  ;;  %p3742_p3 = pnand %p3741_p2, %p3735_p5 }
 0x2d6   : > { %2522 = vst [vmem:[%s4989_s9 + $0x38] sm:$0xff] %v3257_v36  ;;  %v3258_v24 = vpack.c.bf16 %v1790_v55, %v1788_v15  ;;  %v1794_v26 = vadd.f32 %v1793_v50, %v4966_v13  ;;  %v1981_v17 = vadd.f32 %v1980_v44, %v4974_v62  ;;  %v1982_v32 = vpop.f32.mrb[49].mxu0 }
 0x2d7   : > { %2745 = vst [vmem:[%s5007_s30 + $0x30] sm:$0xff] %v3288_v3  ;;  %v3289_v9 = vpack.c.bf16 %v1977_v21, %v1975_v7  ;;  %v1983_v57 = vadd.f32 %v1982_v32, %v4979_v18  ;;  %v1984_v41 = vpop.f32.mrb[50].mxu0 }
 0x2d8   : > { %2523 = vst [vmem:[%s4989_s9 + $0x40] sm:$0xff] %v3258_v24  ;;  %v3259_v59 = vpack.c.bf16 %v1794_v26, %v1792_v6  ;;  %v1985_v40 = vadd.f32 %v1984_v41, %v4974_v62  ;;  %v1986_v5 = vpop.f32.mrb[51].mxu0 }
 0x2d9   : > { %2746 = vst [vmem:[%s5007_s30 + $0x38] sm:$0xff] %v3289_v9  ;;  %v3290_v28 = vpack.c.bf16 %v1983_v57, %v1981_v17  ;;  %v1987_v1 = vadd.f32 %v1986_v5, %v4979_v18 }
 0x2da   : > { %2524 = vst [vmem:[%s4989_s9 + $0x48] sm:$0xff] %v3259_v59  ;;  %v1797_v29 = vpop.f32.mrb[52].mxu1 }
 0x2db   : > { %v1798_v12 = vadd.f32 %v1797_v29, %v4960_v2  ;;  %v1799_v49 = vpop.f32.mrb[53].mxu1  ;;  %2747 = vst [vmem:[%s5007_s30 + $0x40] sm:$0xff] %v3290_v28  ;;  %v3291_v10 = vpack.c.bf16 %v1987_v1, %v1985_v40 }
 0x2dc   : > { %v1800_v30 = vadd.f32 %v1799_v49, %v4966_v13  ;;  %v1801_v11 = vpop.f32.mrb[54].mxu1 }
 0x2dd   : > { %v1802_v39 = vadd.f32 %v1801_v11, %v4960_v2  ;;  %v1803_v22 = vpop.f32.mrb[55].mxu1  ;;  %2748 = vst [vmem:[%s5007_s30 + $0x48] sm:$0xff] %v3291_v10  ;;  %v1990_v31 = vpop.f32.mrb[52].mxu0 }
 0x2de   : > { %v3260_v4 = vpack.c.bf16 %v1800_v30, %v1798_v12  ;;  %v1804_v38 = vadd.f32 %v1803_v22, %v4966_v13  ;;  %v1991_v37 = vadd.f32 %v1990_v31, %v4974_v62  ;;  %v1992_v56 = vpop.f32.mrb[53].mxu0 }
 0x2df   : > { %v1993_v47 = vadd.f32 %v1992_v56, %v4979_v18  ;;  %v1994_v14 = vpop.f32.mrb[54].mxu0 }
 0x2e0   : > { %2525 = vst [vmem:[%s4989_s9 + $0x50] sm:$0xff] %v3260_v4  ;;  %v3261_v54 = vpack.c.bf16 %v1804_v38, %v1802_v39  ;;  %v1995_v58 = vadd.f32 %v1994_v14, %v4974_v62  ;;  %v1996_v35 = vpop.f32.mrb[55].mxu0 }
 0x2e1   : > { %v3292_v42 = vpack.c.bf16 %v1993_v47, %v1991_v37  ;;  %v1997_v51 = vadd.f32 %v1996_v35, %v4979_v18 }
 0x2e2   : > { %2526 = vst [vmem:[%s4989_s9 + $0x58] sm:$0xff] %v3261_v54  ;;  %v1807_v27 = vpop.f32.mrb[56].mxu1 }
 0x2e3   : > { %v1808_v16 = vadd.f32 %v1807_v27, %v4960_v2  ;;  %v1809_v43 = vpop.f32.mrb[57].mxu1  ;;  %2749 = vst [vmem:[%s5007_s30 + $0x50] sm:$0xff] %v3292_v42  ;;  %v3293_v23 = vpack.c.bf16 %v1997_v51, %v1995_v58 }
 0x2e4   : > { %v1810_v46 = vadd.f32 %v1809_v43, %v4966_v13  ;;  %v1811_v45 = vpop.f32.mrb[58].mxu1 }
 0x2e5   : > { %v1812_v33 = vadd.f32 %v1811_v45, %v4960_v2  ;;  %v1813_v48 = vpop.f32.mrb[59].mxu1  ;;  %2750 = vst [vmem:[%s5007_s30 + $0x58] sm:$0xff] %v3293_v23  ;;  %v2000_v0 = vpop.f32.mrb[56].mxu0 }
 0x2e6   : > { %v3262_v20 = vpack.c.bf16 %v1810_v46, %v1808_v16  ;;  %v1814_v60 = vadd.f32 %v1813_v48, %v4966_v13  ;;  %v2001_v61 = vadd.f32 %v2000_v0, %v4974_v62  ;;  %v2002_v25 = vpop.f32.mrb[57].mxu0 }
 0x2e7   : > { %v2003_v53 = vadd.f32 %v2002_v25, %v4979_v18  ;;  %v2004_v8 = vpop.f32.mrb[58].mxu0 }
 0x2e8   : > { %2527 = vst [vmem:[%s4989_s9 + $0x60] sm:$0xff] %v3262_v20  ;;  %v3263_v36 = vpack.c.bf16 %v1814_v60, %v1812_v33  ;;  %v2005_v7 = vadd.f32 %v2004_v8, %v4974_v62  ;;  %v2006_v52 = vpop.f32.mrb[59].mxu0 }
 0x2e9   : > { %v3294_v3 = vpack.c.bf16 %v2003_v53, %v2001_v61  ;;  %v2007_v21 = vadd.f32 %v2006_v52, %v4979_v18 }
 0x2ea   : > { %2528 = vst [vmem:[%s4989_s9 + $0x68] sm:$0xff] %v3263_v36  ;;  %v1817_v19 = vpop.f32.mrb[60].mxu1 }
 0x2eb   : > { %v1818_v15 = vadd.f32 %v1817_v19, %v4960_v2  ;;  %v1819_v63 = vpop.f32.mrb[61].mxu1  ;;  %2751 = vst [vmem:[%s5007_s30 + $0x60] sm:$0xff] %v3294_v3  ;;  %v3295_v9 = vpack.c.bf16 %v2007_v21, %v2005_v7 }
 0x2ec   : > { %v1820_v55 = vadd.f32 %v1819_v63, %v4966_v13  ;;  %v1821_v34 = vpop.f32.mrb[62].mxu1 }
 0x2ed   : > { %v1822_v6 = vadd.f32 %v1821_v34, %v4960_v2  ;;  %v1823_v50 = vpop.f32.mrb[63].mxu1  ;;  %2752 = vst [vmem:[%s5007_s30 + $0x68] sm:$0xff] %v3295_v9  ;;  %v2010_v44 = vpop.f32.mrb[60].mxu0 }
 0x2ee   : > { %v3264_v24 = vpack.c.bf16 %v1820_v55, %v1818_v15  ;;  %v1824_v26 = vadd.f32 %v1823_v50, %v4966_v13  ;;  %v2011_v17 = vadd.f32 %v2010_v44, %v4974_v62  ;;  %v2012_v32 = vpop.f32.mrb[61].mxu0 }
 0x2ef   : > { %v2013_v57 = vadd.f32 %v2012_v32, %v4979_v18  ;;  %v2014_v41 = vpop.f32.mrb[62].mxu0 }
 0x2f0   : > { %2529 = vst [vmem:[%s4989_s9 + $0x70] sm:$0xff] %v3264_v24  ;;  %v3265_v59 = vpack.c.bf16 %v1824_v26, %v1822_v6  ;;  %v2015_v40 = vadd.f32 %v2014_v41, %v4974_v62  ;;  %v2016_v5 = vpop.f32.mrb[63].mxu0 }
 0x2f1   : > { %v3296_v28 = vpack.c.bf16 %v2013_v57, %v2011_v17  ;;  %v2017_v1 = vadd.f32 %v2016_v5, %v4979_v18 }
 0x2f2   : > { %2530 = vst [vmem:[%s4989_s9 + $0x78] sm:$0xff] %v3265_v59  ;;  %v1827_v29 = vpop.f32.mrb[64].mxu1 }
 0x2f3   : > { %v1828_v12 = vadd.f32 %v1827_v29, %v4960_v2  ;;  %v1829_v49 = vpop.f32.mrb[65].mxu1  ;;  %2753 = vst [vmem:[%s5007_s30 + $0x70] sm:$0xff] %v3296_v28  ;;  %v3297_v10 = vpack.c.bf16 %v2017_v1, %v2015_v40 }
 0x2f4   : > { %v1830_v30 = vadd.f32 %v1829_v49, %v4966_v13  ;;  %v1831_v11 = vpop.f32.mrb[66].mxu1 }
 0x2f5   : > { %v1832_v39 = vadd.f32 %v1831_v11, %v4960_v2  ;;  %v1833_v22 = vpop.f32.mrb[67].mxu1  ;;  %2754 = vst [vmem:[%s5007_s30 + $0x78] sm:$0xff] %v3297_v10  ;;  %v2020_v31 = vpop.f32.mrb[64].mxu0 }
 0x2f6   : > { %v3266_v4 = vpack.c.bf16 %v1830_v30, %v1828_v12  ;;  %v1834_v38 = vadd.f32 %v1833_v22, %v4966_v13  ;;  %v2021_v37 = vadd.f32 %v2020_v31, %v4974_v62  ;;  %v2022_v56 = vpop.f32.mrb[65].mxu0 }
 0x2f7   : > { %v2023_v47 = vadd.f32 %v2022_v56, %v4979_v18  ;;  %v2024_v14 = vpop.f32.mrb[66].mxu0 }
 0x2f8   : > { %2531 = vst [vmem:[%s4989_s9 + $0x80] sm:$0xff] %v3266_v4  ;;  %v3267_v54 = vpack.c.bf16 %v1834_v38, %v1832_v39  ;;  %v2025_v58 = vadd.f32 %v2024_v14, %v4974_v62  ;;  %v2026_v35 = vpop.f32.mrb[67].mxu0 }
 0x2f9   : > { %v3298_v42 = vpack.c.bf16 %v2023_v47, %v2021_v37  ;;  %v2027_v51 = vadd.f32 %v2026_v35, %v4979_v18 }
 0x2fa   : > { %2532 = vst [vmem:[%s4989_s9 + $0x88] sm:$0xff] %v3267_v54  ;;  %v1837_v27 = vpop.f32.mrb[68].mxu1 }
 0x2fb   : > { %v1838_v16 = vadd.f32 %v1837_v27, %v4960_v2  ;;  %v1839_v43 = vpop.f32.mrb[69].mxu1  ;;  %2755 = vst [vmem:[%s5007_s30 + $0x80] sm:$0xff] %v3298_v42  ;;  %v3299_v23 = vpack.c.bf16 %v2027_v51, %v2025_v58 }
 0x2fc   : > { %v1840_v46 = vadd.f32 %v1839_v43, %v4966_v13  ;;  %v1841_v45 = vpop.f32.mrb[70].mxu1 }
 0x2fd   : > { %v1842_v33 = vadd.f32 %v1841_v45, %v4960_v2  ;;  %v1843_v48 = vpop.f32.mrb[71].mxu1  ;;  %2756 = vst [vmem:[%s5007_s30 + $0x88] sm:$0xff] %v3299_v23  ;;  %v2030_v0 = vpop.f32.mrb[68].mxu0 }
 0x2fe   : > { %v3268_v20 = vpack.c.bf16 %v1840_v46, %v1838_v16  ;;  %v1844_v60 = vadd.f32 %v1843_v48, %v4966_v13  ;;  %v2031_v61 = vadd.f32 %v2030_v0, %v4974_v62  ;;  %v2032_v25 = vpop.f32.mrb[69].mxu0 }
 0x2ff   : > { %v2033_v53 = vadd.f32 %v2032_v25, %v4979_v18  ;;  %v2034_v8 = vpop.f32.mrb[70].mxu0 }
 0x300   : > { %2533 = vst [vmem:[%s4989_s9 + $0x90] sm:$0xff] %v3268_v20  ;;  %v3269_v36 = vpack.c.bf16 %v1844_v60, %v1842_v33  ;;  %v2035_v7 = vadd.f32 %v2034_v8, %v4974_v62  ;;  %v2036_v52 = vpop.f32.mrb[71].mxu0 }
 0x301   : > { %v3300_v3 = vpack.c.bf16 %v2033_v53, %v2031_v61  ;;  %v2037_v21 = vadd.f32 %v2036_v52, %v4979_v18 }
 0x302   : > { %2534 = vst [vmem:[%s4989_s9 + $0x98] sm:$0xff] %v3269_v36  ;;  %v1847_v19 = vpop.f32.mrb[72].mxu1 }
 0x303   : > { %v1848_v15 = vadd.f32 %v1847_v19, %v4960_v2  ;;  %v1849_v63 = vpop.f32.mrb[73].mxu1  ;;  %2757 = vst [vmem:[%s5007_s30 + $0x90] sm:$0xff] %v3300_v3  ;;  %v3301_v9 = vpack.c.bf16 %v2037_v21, %v2035_v7 }
 0x304   : > { %v1850_v55 = vadd.f32 %v1849_v63, %v4966_v13  ;;  %v1851_v34 = vpop.f32.mrb[74].mxu1 }
 0x305   : > { %v1852_v6 = vadd.f32 %v1851_v34, %v4960_v2  ;;  %v1853_v50 = vpop.f32.mrb[75].mxu1  ;;  %2758 = vst [vmem:[%s5007_s30 + $0x98] sm:$0xff] %v3301_v9  ;;  %v2040_v44 = vpop.f32.mrb[72].mxu0 }
 0x306   : > { %v3270_v24 = vpack.c.bf16 %v1850_v55, %v1848_v15  ;;  %v1854_v26 = vadd.f32 %v1853_v50, %v4966_v13  ;;  %v2041_v17 = vadd.f32 %v2040_v44, %v4974_v62  ;;  %v2042_v32 = vpop.f32.mrb[73].mxu0 }
 0x307   : > { %v2043_v57 = vadd.f32 %v2042_v32, %v4979_v18  ;;  %v2044_v41 = vpop.f32.mrb[74].mxu0 }
 0x308   : > { %2535 = vst [vmem:[%s4989_s9 + $0xa0] sm:$0xff] %v3270_v24  ;;  %v3271_v59 = vpack.c.bf16 %v1854_v26, %v1852_v6  ;;  %v2045_v40 = vadd.f32 %v2044_v41, %v4974_v62  ;;  %v2046_v5 = vpop.f32.mrb[75].mxu0 }
 0x309   : > { %v3302_v28 = vpack.c.bf16 %v2043_v57, %v2041_v17  ;;  %v2047_v1 = vadd.f32 %v2046_v5, %v4979_v18 }
 0x30a   : > { %2536 = vst [vmem:[%s4989_s9 + $0xa8] sm:$0xff] %v3271_v59  ;;  %v1857_v29 = vpop.f32.mrb[76].mxu1 }
 0x30b   : > { %v1858_v12 = vadd.f32 %v1857_v29, %v4960_v2  ;;  %v1859_v49 = vpop.f32.mrb[77].mxu1  ;;  %2759 = vst [vmem:[%s5007_s30 + $0xa0] sm:$0xff] %v3302_v28  ;;  %v3303_v10 = vpack.c.bf16 %v2047_v1, %v2045_v40 }
 0x30c   : > { %v1860_v30 = vadd.f32 %v1859_v49, %v4966_v13  ;;  %v1861_v11 = vpop.f32.mrb[78].mxu1 }
 0x30d   : > { %v1862_v39 = vadd.f32 %v1861_v11, %v4960_v2  ;;  %v1863_v22 = vpop.f32.mrb[79].mxu1  ;;  %2760 = vst [vmem:[%s5007_s30 + $0xa8] sm:$0xff] %v3303_v10  ;;  %v2050_v31 = vpop.f32.mrb[76].mxu0 }
 0x30e   : > { %v3272_v4 = vpack.c.bf16 %v1860_v30, %v1858_v12  ;;  %v1864_v38 = vadd.f32 %v1863_v22, %v4966_v13  ;;  %v2051_v37 = vadd.f32 %v2050_v31, %v4974_v62  ;;  %v2052_v56 = vpop.f32.mrb[77].mxu0 }
 0x30f   : > { %v2053_v47 = vadd.f32 %v2052_v56, %v4979_v18  ;;  %v2054_v14 = vpop.f32.mrb[78].mxu0 }
 0x310   : > { %2537 = vst [vmem:[%s4989_s9 + $0xb0] sm:$0xff] %v3272_v4  ;;  %v3273_v54 = vpack.c.bf16 %v1864_v38, %v1862_v39  ;;  %v2055_v58 = vadd.f32 %v2054_v14, %v4974_v62  ;;  %v2056_v35 = vpop.f32.mrb[79].mxu0 }
 0x311   : > { %v3304_v42 = vpack.c.bf16 %v2053_v47, %v2051_v37  ;;  %v2057_v51 = vadd.f32 %v2056_v35, %v4979_v18 }
 0x312   : > { %2538 = vst [vmem:[%s4989_s9 + $0xb8] sm:$0xff] %v3273_v54  ;;  %v1867_v27 = vpop.f32.mrb[80].mxu1 }
 0x313   : > { %v1868_v16 = vadd.f32 %v1867_v27, %v4960_v2  ;;  %v1869_v43 = vpop.f32.mrb[81].mxu1  ;;  %2761 = vst [vmem:[%s5007_s30 + $0xb0] sm:$0xff] %v3304_v42  ;;  %v3305_v23 = vpack.c.bf16 %v2057_v51, %v2055_v58 }
 0x314   : > { %v1870_v46 = vadd.f32 %v1869_v43, %v4966_v13  ;;  %v1871_v45 = vpop.f32.mrb[82].mxu1 }
 0x315   : > { %v1872_v33 = vadd.f32 %v1871_v45, %v4960_v2  ;;  %v1873_v48 = vpop.f32.mrb[83].mxu1  ;;  %2762 = vst [vmem:[%s5007_s30 + $0xb8] sm:$0xff] %v3305_v23  ;;  %v2060_v0 = vpop.f32.mrb[80].mxu0 }
 0x316   : > { %v3274_v20 = vpack.c.bf16 %v1870_v46, %v1868_v16  ;;  %v1874_v60 = vadd.f32 %v1873_v48, %v4966_v13  ;;  %v2061_v61 = vadd.f32 %v2060_v0, %v4974_v62  ;;  %v2062_v25 = vpop.f32.mrb[81].mxu0 }
 0x317   : > { %v2063_v53 = vadd.f32 %v2062_v25, %v4979_v18  ;;  %v2064_v8 = vpop.f32.mrb[82].mxu0 }
 0x318   : > { %2539 = vst [vmem:[%s4989_s9 + $0xc0] sm:$0xff] %v3274_v20  ;;  %v3275_v36 = vpack.c.bf16 %v1874_v60, %v1872_v33  ;;  %v2065_v7 = vadd.f32 %v2064_v8, %v4974_v62  ;;  %v2066_v52 = vpop.f32.mrb[83].mxu0 }
 0x319   : > { %v3306_v3 = vpack.c.bf16 %v2063_v53, %v2061_v61  ;;  %v2067_v21 = vadd.f32 %v2066_v52, %v4979_v18 }
 0x31a   : > { %2540 = vst [vmem:[%s4989_s9 + $0xc8] sm:$0xff] %v3275_v36  ;;  %v1877_v19 = vpop.f32.mrb[84].mxu1 }
 0x31b   : > { %v1878_v15 = vadd.f32 %v1877_v19, %v4960_v2  ;;  %v1879_v63 = vpop.f32.mrb[85].mxu1  ;;  %2763 = vst [vmem:[%s5007_s30 + $0xc0] sm:$0xff] %v3306_v3  ;;  %v3307_v9 = vpack.c.bf16 %v2067_v21, %v2065_v7 }
 0x31c   : > { %v1880_v55 = vadd.f32 %v1879_v63, %v4966_v13  ;;  %v1881_v34 = vpop.f32.mrb[86].mxu1 }
 0x31d   : > { %v1882_v6 = vadd.f32 %v1881_v34, %v4960_v2  ;;  %v1883_v50 = vpop.f32.mrb[87].mxu1  ;;  %2764 = vst [vmem:[%s5007_s30 + $0xc8] sm:$0xff] %v3307_v9  ;;  %v2070_v44 = vpop.f32.mrb[84].mxu0 }
 0x31e   : > { %v3276_v24 = vpack.c.bf16 %v1880_v55, %v1878_v15  ;;  %v1884_v26 = vadd.f32 %v1883_v50, %v4966_v13  ;;  %v2071_v17 = vadd.f32 %v2070_v44, %v4974_v62  ;;  %v2072_v32 = vpop.f32.mrb[85].mxu0 }
 0x31f   : > { %v2073_v57 = vadd.f32 %v2072_v32, %v4979_v18  ;;  %v2074_v41 = vpop.f32.mrb[86].mxu0 }
 0x320   : > { %2541 = vst [vmem:[%s4989_s9 + $0xd0] sm:$0xff] %v3276_v24  ;;  %v3277_v59 = vpack.c.bf16 %v1884_v26, %v1882_v6  ;;  %v2075_v40 = vadd.f32 %v2074_v41, %v4974_v62  ;;  %v2076_v5 = vpop.f32.mrb[87].mxu0 }
 0x321   : > { %v3308_v28 = vpack.c.bf16 %v2073_v57, %v2071_v17  ;;  %v2077_v1 = vadd.f32 %v2076_v5, %v4979_v18 }
 0x322   : > { %2542 = vst [vmem:[%s4989_s9 + $0xd8] sm:$0xff] %v3277_v59  ;;  %v1887_v29 = vpop.f32.mrb[88].mxu1 }
 0x323   : > { %v1888_v12 = vadd.f32 %v1887_v29, %v4960_v2  ;;  %v1889_v49 = vpop.f32.mrb[89].mxu1  ;;  %2765 = vst [vmem:[%s5007_s30 + $0xd0] sm:$0xff] %v3308_v28  ;;  %v3309_v10 = vpack.c.bf16 %v2077_v1, %v2075_v40 }
 0x324   : > { %v1890_v30 = vadd.f32 %v1889_v49, %v4966_v13  ;;  %v1891_v11 = vpop.f32.mrb[90].mxu1 }
 0x325   : > { %v1892_v39 = vadd.f32 %v1891_v11, %v4960_v2  ;;  %v1893_v22 = vpop.f32.mrb[91].mxu1  ;;  %2766 = vst [vmem:[%s5007_s30 + $0xd8] sm:$0xff] %v3309_v10  ;;  %v2080_v31 = vpop.f32.mrb[88].mxu0 }
 0x326   : > { %v3278_v4 = vpack.c.bf16 %v1890_v30, %v1888_v12  ;;  %v1894_v38 = vadd.f32 %v1893_v22, %v4966_v13  ;;  %v2081_v37 = vadd.f32 %v2080_v31, %v4974_v62  ;;  %v2082_v56 = vpop.f32.mrb[89].mxu0 }
 0x327   : > { %v2083_v47 = vadd.f32 %v2082_v56, %v4979_v18  ;;  %v2084_v14 = vpop.f32.mrb[90].mxu0 }
 0x328   : > { %2543 = vst [vmem:[%s4989_s9 + $0xe0] sm:$0xff] %v3278_v4  ;;  %v3279_v54 = vpack.c.bf16 %v1894_v38, %v1892_v39  ;;  %v2085_v58 = vadd.f32 %v2084_v14, %v4974_v62  ;;  %v2086_v35 = vpop.f32.mrb[91].mxu0 }
 0x329   : > { %v3310_v42 = vpack.c.bf16 %v2083_v47, %v2081_v37  ;;  %v2087_v51 = vadd.f32 %v2086_v35, %v4979_v18 }
 0x32a   : > { %2544 = vst [vmem:[%s4989_s9 + $0xe8] sm:$0xff] %v3279_v54  ;;  %v1897_v27 = vpop.f32.mrb[92].mxu1 }
 0x32b   : > { %v1898_v16 = vadd.f32 %v1897_v27, %v4960_v2  ;;  %v1899_v43 = vpop.f32.mrb[93].mxu1  ;;  %2767 = vst [vmem:[%s5007_s30 + $0xe0] sm:$0xff] %v3310_v42  ;;  %v3311_v23 = vpack.c.bf16 %v2087_v51, %v2085_v58 }
 0x32c   : > { %v1900_v46 = vadd.f32 %v1899_v43, %v4966_v13  ;;  %v1901_v45 = vpop.f32.mrb[94].mxu1 }
 0x32d   : > { %v1902_v33 = vadd.f32 %v1901_v45, %v4960_v2  ;;  %v1903_v48 = vpop.f32.mrb[95].mxu1  ;;  %2768 = vst [vmem:[%s5007_s30 + $0xe8] sm:$0xff] %v3311_v23  ;;  %v2090_v0 = vpop.f32.mrb[92].mxu0 }
 0x32e   : > { %v3280_v20 = vpack.c.bf16 %v1900_v46, %v1898_v16  ;;  %v1904_v60 = vadd.f32 %v1903_v48, %v4966_v13  ;;  %v2091_v61 = vadd.f32 %v2090_v0, %v4974_v62  ;;  %v2092_v25 = vpop.f32.mrb[93].mxu0 }
 0x32f   : > { %v2093_v53 = vadd.f32 %v2092_v25, %v4979_v18  ;;  %v2094_v8 = vpop.f32.mrb[94].mxu0 }
 0x330   : > { %2545 = vst [vmem:[%s4989_s9 + $0xf0] sm:$0xff] %v3280_v20  ;;  %v3281_v36 = vpack.c.bf16 %v1904_v60, %v1902_v33  ;;  %v2095_v2 = vadd.f32 %v2094_v8, %v4974_v62  ;;  %v2096_v13 = vpop.f32.mrb[95].mxu0 }
 0x331   : > { %v3312_v7 = vpack.c.bf16 %v2093_v53, %v2091_v61  ;;  %v2097_v52 = vadd.f32 %v2096_v13, %v4979_v18 }
 0x332   : > { %2546 = vst [vmem:[%s4989_s9 + $0xf8] sm:$0xff] %v3281_v36 }
 0x333   : > { %3745 = shalt.err (!%p3742_p3)
}
 0x334   : > { %s3746_s9 = scalar_lea.hbm %s5218_s10, 4096  ;;  %s3750_s15 = scalar_lea.hbm %s5319_s4, 8192 }
 0x335   : > { %p3747_p7 = scmp.ne.s32.totalorder %s5218_s10, %s3746_s9  ;;  %p3751_p6 = scmp.lt.u32.totalorder %s5218_s10, %s5319_s4 }
 0x336   : > { %p3752_p8 = scmp.lt.u32.totalorder %s3750_s15, %s3746_s9  ;;  %p3754_p11 = scmp.lt.u32.totalorder %s3746_s9, %s5218_s10 }
 0x337   : > { %p3748_p13 = pnand %p3747_p7, %p3987_p10 }
 0x338   : > { %p3753_p12 = por %p3752_p8, %p3751_p6 }
 0x339   : > { %p3749_p4 = pneg %p3748_p13 }
 0x33a   : > { %p3755_p0 = por %p3754_p11, %p3753_p12 }
 0x33c   : > { %p3756_p5 = pnand %p3755_p0, %p3749_p4 }
 0x33e   : > { %3759 = shalt.err (!%p3756_p5)
}
 0x33f   : > { %3356 = dma.vmem_to_hbm [thread:$0]  (%p3987_p10), %s5220_s29, 4096, %s5218_s10, %s5226_s17, %s3859_s14, %s3859_s14, %s3860_s8   ;;  %v3313_v62 = vpack.c.bf16 %v2097_v52, %v2095_v2 }
 0x340   : > { %2769 = vst [vmem:[%s5007_s30 + $0xf0] sm:$0xff] %v3312_v7  ;;  %s5258_s9 = scalar_lea.hbm %s5320_s5, %s4986_s6  ;;  %s3760_s25 = scalar_lea.vmem %s5262_s12, 4096 }
 0x341   : > { %2770 = vst [vmem:[%s5007_s30 + $0xf8] sm:$0xff] %v3313_v62  ;;  %p3761_p9 = scmp.ne.s32.totalorder %s5262_s12, %s3760_s25  ;;  %s3862_s29 = smov [#allocation10]  }
 0x342   : > { %s3764_s10 = sshll.u32 %s3862_s29, 4  ;;  %s3765_s10 = int_to_ptr.vmem [resolvable:$false] %s3764_s10 }
 0x343   : > { %p3762_p1 = pnand %p3761_p9, %p3987_p10  ;;  %s3766_s24 = scalar_lea.vmem %s3765_s10, 8192 }
 0x344   : > { %p3767_p3 = scmp.lt.s32.totalorder %s5262_s12, %s3765_s10  ;;  %p3768_p7 = scmp.lt.s32.totalorder %s3766_s24, %s3760_s25 }
 0x345   : > { %p3763_p2 = pneg %p3762_p1 }
 0x346   : > { %p3769_p13 = por %p3768_p7, %p3767_p3 }
 0x348   : > { %p3770_p4 = pnand %p3769_p13, %p3763_p2 }
 0x34a   : > { %3773 = shalt.err (!%p3770_p4)
}
 0x34b   : > { %s3774_s6 = scalar_lea.hbm %s5258_s9, 4096  ;;  %s3778_s16 = scalar_lea.hbm %s5320_s5, 8192 }
 0x34c   : > { %p3775_p6 = scmp.ne.s32.totalorder %s5258_s9, %s3774_s6  ;;  %p3779_p11 = scmp.lt.u32.totalorder %s5258_s9, %s5320_s5 }
 0x34d   : > { %p3780_p0 = scmp.lt.u32.totalorder %s3778_s16, %s3774_s6  ;;  %p3782_p9 = scmp.lt.u32.totalorder %s3774_s6, %s5258_s9 }
 0x34e   : > { %p3776_p8 = pnand %p3775_p6, %p3987_p10 }
 0x34f   : > { %p3781_p5 = por %p3780_p0, %p3779_p11 }
 0x350   : > { %p3777_p12 = pneg %p3776_p8 }
 0x351   : > { %p3783_p1 = por %p3782_p9, %p3781_p5 }
 0x353   : > { %p3784_p2 = pnand %p3783_p1, %p3777_p12 }
 0x355   : > { %3787 = shalt.err (!%p3784_p2)
}
 0x356   : > { %3357 = dma.vmem_to_hbm [thread:$0]  (%p3987_p10), %s5262_s12, 4096, %s5258_s9, %s5226_s17, %s3859_s14, %s3859_s14, %s3860_s8  }
 0x357 PF: > { %s2851_s28 = sand.u32 1, %s3830_s18   ;;  %p5447_p3 = scmp.ne.s32.totalorder %s5364_s27, 0 }
 0x358   : > { %p5448_p7 = scmp.ge.s32.totalorder %s3850_s23, 2  ;;  %s2852_s25 = scalar_lea.sflag [#allocation4], %s2851_s28 }
 0x35a   : > { %p3370_p13 = pnand %p5448_p7, %p5447_p3 }
 0x35c   : > { %3821 = dma.done.wait (!%p3370_p13), %s2852_s25, 4096  }
 0x35d   : > { %3823 = vsyncadd (!%p3370_p13), %s2852_s25, 4294963200  ;;  %s5449_s11 = sadd.s32 4294967294, %s3850_s23  }
 0x35e   : > { %s2860_s29 = sand.u32 1, %s5449_s11  }
 0x35f   : > { %s2861_s10 = scalar_lea.sflag [#allocation9], %s2860_s29 }
 0x360   : > { %3825 = dma.done.wait (!%p3370_p13), %s2861_s10, 8192  }
 0x361   : > { %3827 = vsyncadd (!%p3370_p13), %s2861_s10, 4294959104  ;;  %s26_s23 = sadd.s32 1, %s3850_s23   ;;  %s5450_s18 = smov %s3834_s19 }
 0x362   : > { %p23_p10 = scmp.ge.s32.totalorder %s26_s23, 4   ;;  %s5451_s19 = smov %s3838_s20 }
 0x363   : > { %s5452_s20 = smov %s3996_s13  ;;  %s5453_s21 = smov %s3846_s22 }
 0x364   : > { %s5454_s22 = smov %s5456_s7  ;;  %25 = sbr.rel (!%p23_p10) target bundleno = 9 (0x9), region = 113 }
 0x36b   :  { %2875 = vsyncpa [#allocation3], 1 }
 0x36c   :  { %2877 = vsyncpa [#allocation3 + $0x1], 1 }
 0x36d   :  { %2878 = vsyncpa [#allocation6], 1 }
 0x36e   :  { %2879 = vsyncpa [#allocation4], 1 }
 0x36f   :  { %2881 = vsyncpa [#allocation4 + $0x1], 1 }
 0x370   :  { %2882 = vsyncpa [#allocation9], 1 }
 0x371   :  { %2884 = vsyncpa [#allocation9 + $0x1], 1 }

// kernel: tpu_custom_call.1
= control target key start
LH: loop header
LB: loop body
LE: loop exit
PB: predicated region body
PF: predicated region fallthrough
CT: control target
= control target key end

     0   :  { %11 = vsyncpa [#allocation3], 0  ;;  %s5315_s0 = inlined_call_operand.hbm [shape: f32[2,256,256], index: 0, kind: input, shape index: {}]   ;;  %s5316_s1 = inlined_call_operand.hbm [shape: bf16[256,768], index: 1, kind: input, shape index: {}]   ;;  %s5317_s2 = inlined_call_operand.vmem [shape: f32[1,768], index: 2, kind: input, shape index: {}]   ;;  %s5318_s3 = inlined_call_operand.hbm [shape: bf16[2,256,256], index: 3, kind: output, shape index: {0}]   ;;  %s5319_s4 = inlined_call_operand.hbm [shape: bf16[2,256,256], index: 4, kind: output, shape index: {1}]   ;;  %s5320_s5 = inlined_call_operand.hbm [shape: bf16[2,256,256], index: 5, kind: output, shape index: {2}]  }
   0x1   :  { %13 = vsyncpa [#allocation3 + $0x1], 0 }
   0x2   :  { %14 = vsyncpa [#allocation6], 0 }
   0x3   :  { %15 = vsyncpa [#allocation4], 0 }
   0x4   :  { %17 = vsyncpa [#allocation4 + $0x1], 0 }
   0x5   :  { %18 = vsyncpa [#allocation9], 0 }
   0x6   :  { %20 = vsyncpa [#allocation9 + $0x1], 0  ;;  %s3893_s18 = smov 0   ;;  %s3895_s19 = smov 0  }
   0x7   :  { %s3897_s20 = smov 0   ;;  %s3899_s21 = smov 0  }
   0x8   :  { %s3901_s22 = smov 0   ;;  %s3903_s23 = smov 0  }
   0x9 LB: > { %s3924_s24 = sadd.s32 4294967295, %s3850_s23   ;;  %s5362_s25 = sadd.s32 4294967294, %s3850_s23   ;;  %s3850_s23 = sphi %s3903_s23, %s26_s23   ;;  %s3846_s22 = sphi %s3901_s22, %s5454_s22   ;;  %s3842_s21 = sphi %s3899_s21, %s5453_s21   ;;  %s3838_s20 = sphi %s3897_s20, %s5452_s20   ;;  %s3834_s19 = sphi %s3895_s19, %s5451_s19   ;;  %s3830_s18 = sphi %s3893_s18, %s5450_s18  }
   0xa   : > { %p60_p0 = scmp.ne.s32.totalorder %s3834_s19, %s3830_s18  ;;  %p5321_p1 = scmp.eq.s32.totalorder %s3924_s24, 0 }
   0xb   : > { %p134_p3 = scmp.eq.s32.totalorder %s5362_s25, 1  ;;  %p3002_p5 = scmp.ge.s32.totalorder %s3850_s23, 1 }
   0xc   : > { %p3935_p4 = por %p5321_p1, %p60_p0  ;;  %p197_p7 = scmp.lt.s32.totalorder %s3850_s23, 3 }
   0xd   : > { %p3940_p6 = por %p134_p3, %p60_p0  ;;  %s3852_s29 = smov [#allocation5]  }
   0xe   : > { %s5363_s26 = scalar_select %p3935_p4, 1, 0 }
   0xf   : > { %s5364_s27 = scalar_select %p3940_p6, 1, 0 }
  0x10   : > { %p3945_p8 = pnand %p3002_p5, %p197_p7  ;;  %s209_s30 = sshll.u32 %s3852_s29, 4  ;;  %s210_s30 = int_to_ptr.vmem [resolvable:$true] %s209_s30 }
  0x11   : > { %s38_s7 = sadd.s32 1, %s3846_s22  ;;  %s3646_s10 = scalar_lea.hbm %s5316_s1, 12288 }
  0x12   : > { %s5365_s28 = scalar_select %p3945_p8, 1, 0 }
  0x13   : > { %p3361_p9 = pneg %p3945_p8  ;;  %p3647_p12 = scmp.ne.s32.totalorder %s5316_s1, %s3646_s10 }
  0x14   : > { %p3653_p5 = scmp.lt.u32.totalorder %s3646_s10, %s5316_s1 }
  0x15   : > { %p3954_p11 = pnand %p3361_p9, %p5321_p1 }
  0x17   : > { %p3648_p13 = pneg %p3954_p11 }
  0x19   : > { %p3649_p0 = pnand %p3648_p13, %p3647_p12 }
  0x1b   : > { %p3650_p3 = pneg %p3649_p0 }
  0x1d   : > { %p3655_p7 = pnand %p3653_p5, %p3650_p3 }
  0x1f   : > { %3658 = shalt.err (!%p3655_p7)
}
  0x20   : > { %s3659_s15 = scalar_lea.vmem %s210_s30, 12288  ;;  %p3667_p2 = scmp.lt.s32.totalorder %s210_s30, %s210_s30 }
  0x21   : > { %p3660_p9 = scmp.ne.s32.totalorder %s210_s30, %s3659_s15  ;;  %p3668_p6 = scmp.lt.s32.totalorder %s3659_s15, %s3659_s15 }
  0x23   : > { %p3662_p10 = pnand %p3660_p9, %p3648_p13  ;;  %p3669_p4 = por %p3668_p6, %p3667_p2 }
  0x25   : > { %p3663_p1 = pneg %p3662_p10 }
  0x27   : > { %p3670_p8 = pnand %p3669_p4, %p3663_p1 }
  0x29   : > { %3673 = shalt.err (!%p3670_p8)
}
  0x2a   : > { %s3853_s16 = smov 384   ;;  %s3854_s17 = smov 24  }
  0x2b   : > { %3364 = dma.hbm_to_vmem [thread:$0]  (!%p3954_p11), %s5316_s1, 12288, %s210_s30, [#allocation6], %s3853_s16, %s3853_s16, %s3854_s17  }
  0x2c   : > { %p40_p1 = scmp.ge.s32.totalorder %s38_s7, 2  ;;  %s47_s9 = sadd.s32 1, %s3838_s20 }
  0x2d   : > { %p54_p2 = scmp.ne.s32.totalorder %s3838_s20, %s3834_s19  ;;  %p55_p4 = scmp.eq.s32.totalorder %s3850_s23, 0 }
  0x2e   : > { %s5456_s7 = smov (%p40_p1, %s38_s7), 0  ;;  %p5368_p8 = scmp.eq.s32.totalorder %s3924_s24, 1 }
  0x2f   : > { %p3981_p6 = por %p55_p4, %p54_p2  ;;  %s42_s6 = ssub.s32 %s3846_s22, %s5456_s7 }
  0x30   : > { %p3987_p10 = por %p5368_p8, %p54_p2  ;;  %p3380_p12 = scmp.lt.s32.totalorder %s3850_s23, 2 }
  0x31   : > { %p45_p11 = scmp.eq.s32.totalorder %s42_s6, 0  ;;  %s226_s30 = sand.u32 1, %s3838_s20  }
  0x32   : > { %s3005_s12 = sshll.u32 %s226_s30, 9  ;;  %s3217_s14 = sshll.u32 %s3846_s22, 13 }
  0x33   : > { %s3996_s13 = scalar_select %p45_p11, %s3838_s20, %s47_s9  }
  0x34   : > { %s4002_s17 = scalar_lea.hbm %s5315_s0, %s3217_s14  ;;  %s230_s29 = scalar_lea.vmem [#allocation2], %s3005_s12 }
  0x35   : > { %s240_s8 = sshll.u32 %s230_s29, 4  ;;  %p4008_p13 = pnand %p3380_p12, %p3981_p6  ;;  %s4004_s8 = int_to_ptr.vmem [resolvable:$true] %s240_s8 }
  0x36   : > { %s4012_s9 = scalar_lea.sflag [#allocation3], %s226_s30  ;;  %s3674_s15 = scalar_lea.hbm %s4002_s17, 8192 }
  0x37   : > { %p3675_p0 = scmp.ne.s32.totalorder %s4002_s17, %s3674_s15  ;;  %p3676_p3 = pneg %p4008_p13 }
  0x38   : > { %s3679_s10 = scalar_lea.hbm %s5315_s0, 16384  ;;  %p3680_p9 = scmp.lt.u32.totalorder %s4002_s17, %s5315_s0 }
  0x39   : > { %p3677_p5 = pnand %p3676_p3, %p3675_p0  ;;  %p3681_p1 = scmp.lt.u32.totalorder %s3679_s10, %s3674_s15 }
  0x3a   : > { %p3683_p4 = scmp.lt.u32.totalorder %s3674_s15, %s4002_s17 }
  0x3b   : > { %p3678_p7 = pneg %p3677_p5  ;;  %p3682_p2 = por %p3681_p1, %p3680_p9 }
  0x3d   : > { %p3684_p6 = por %p3683_p4, %p3682_p2 }
  0x3f   : > { %p3685_p8 = pnand %p3684_p6, %p3678_p7 }
  0x41   : > { %3688 = shalt.err (!%p3685_p8)
}
  0x42   : > { %s3689_s30 = scalar_lea.vmem %s4004_s8, 8192  ;;  %s3855_s12 = smov [#allocation2]  }
  0x43   : > { %p3690_p12 = scmp.ne.s32.totalorder %s4004_s8, %s3689_s30  ;;  %s3694_s14 = sshll.u32 %s3855_s12, 4  ;;  %s3695_s14 = int_to_ptr.vmem [resolvable:$false] %s3694_s14 }
  0x44   : > { %s3696_s16 = scalar_lea.vmem %s3695_s14, 16384  ;;  %p3697_p5 = scmp.lt.s32.totalorder %s4004_s8, %s3695_s14 }
  0x45   : > { %p3692_p11 = pnand %p3690_p12, %p3676_p3  ;;  %p3698_p9 = scmp.lt.s32.totalorder %s3696_s16, %s3689_s30 }
  0x47   : > { %p3693_p0 = pneg %p3692_p11  ;;  %p3699_p1 = por %p3698_p9, %p3697_p5 }
  0x49   : > { %p3700_p2 = pnand %p3699_p1, %p3693_p0 }
  0x4b   : > { %3703 = shalt.err (!%p3700_p2)
}
  0x4c   : > { %s3856_s15 = smov 256   ;;  %s3857_s10 = smov 16  }
  0x4d   : > { %3368 = dma.hbm_to_vmem [thread:$0]  (!%p4008_p13), %s4002_s17, 8192, %s4004_s8, %s4012_s9, %s3856_s15, %s3856_s15, %s3857_s10  }
  0x4e   : > { %p5371_p3 = scmp.ne.s32.totalorder %s5365_s28, 0 }
  0x50   : > { %252 = sbr.rel (%p5371_p3) target bundleno = 855 (0x357), region = 32 }
  0x57   : > { %s4043_s29 = sand.u32 1, %s3834_s19   ;;  %p5372_p7 = scmp.ne.s32.totalorder %s5363_s26, 0 }
  0x58   : > { %s3009_s30 = sshll.u32 %s4043_s29, 9  ;;  %s255_s12 = scalar_lea.sflag [#allocation3], %s4043_s29 }
  0x59   : > { %s4047_s14 = scalar_lea.vmem [#allocation2], %s3009_s30 }
  0x5a   : > { %3813 = dma.done.wait (%p5372_p7), %s255_s12, 8192  }
  0x5b   : > { %3815 = vsyncadd (%p5372_p7), %s255_s12, 4294959104  ;;  %p5373_p13 = scmp.eq.s32.totalorder %s3924_s24, 0 }
  0x5d   : > { %3817 = dma.done.wait (%p5373_p13), [#allocation6], 12288   ;;  %p5374_p4 = pmov %p5373_p13 }
  0x5e   : > { %v4058_v0 = vld [vmem:[%s4047_s14 + $0x100] sm:$0xff]  ;;  %v4061_v1 = vld [vmem:[%s4047_s14 + $0x108] sm:$0xff]  ;;  %v4064_v2 = vld [vmem:[%s4047_s14 + $0x110] sm:$0xff]  ;;  %s4863_s17 = sshll.u32 %s4043_s29, 8  ;;  %s4986_s6 = sshll.u32 %s3842_s21, 12 }
  0x5f   : > { %3819 = vsyncadd (%p5374_p4), [#allocation6], 4294955008  ;;  %v415_v3 = vadd.f32 %v4061_v1, %v4058_v0  ;;  %v4069_v4 = vld [vmem:[%s4047_s14 + $0x118] sm:$0xff]  ;;  %v4072_v5 = vld [vmem:[%s4047_s14] sm:$0xff]  ;;  %s4871_s8 = scalar_lea.vmem [#allocation7], %s4863_s17  ;;  %s4989_s9 = scalar_lea.vmem [#allocation8], %s4863_s17 }
  0x60   : > { %v4075_v6 = vld [vmem:[%s4047_s14 + $0x8] sm:$0xff]  ;;  %v4080_v8 = vld [vmem:[%s4047_s14 + $0x10] sm:$0xff]  ;;  %v418_v9 = vadd.f32 %v4069_v4, %v4064_v2  ;;  %v4085_v10 = vld [vmem:[%s4047_s14 + $0x18] sm:$0xff]  ;;  %s5000_s15 = scalar_lea.hbm %s5318_s3, %s4986_s6  ;;  %s2798_s10 = sshll.u32 %s4871_s8, 4  ;;  %s5004_s10 = int_to_ptr.vmem [resolvable:$true] %s2798_s10 }
  0x61   : > { %v367_v7 = vadd.f32 %v4075_v6, %v4072_v5  ;;  %416 = vadd.xlane.f32.xlu0 %v415_v3  ;;  %v4088_v11 = vld [vmem:[%s4047_s14 + $0x120] sm:$0xff]  ;;  %v4091_v12 = vld [vmem:[%s4047_s14 + $0x128] sm:$0xff]  ;;  %v370_v13 = vadd.f32 %v4085_v10, %v4080_v8  ;;  %v4096_v14 = vld [vmem:[%s4047_s14 + $0x130] sm:$0xff]  ;;  %s5007_s30 = scalar_lea.vmem [#allocation10], %s4863_s17  ;;  %s2772_s12 = scalar_lea.sflag [#allocation4], %s4043_s29 }
  0x62   : > { %v4099_v15 = vld [vmem:[%s4047_s14 + $0x138] sm:$0xff]  ;;  %v421_v16 = vadd.f32 %v4091_v12, %v4088_v11  ;;  %v4104_v17 = vld [vmem:[%s4047_s14 + $0x20] sm:$0xff]  ;;  %v4107_v18 = vld [vmem:[%s4047_s14 + $0x28] sm:$0xff]  ;;  %s3858_s26 = smov [#allocation7]  }
  0x63   : > { %368 = vadd.xlane.f32.xlu1 %v367_v7  ;;  %v424_v19 = vadd.f32 %v4099_v15, %v4096_v14  ;;  %v4112_v20 = vld [vmem:[%s4047_s14 + $0x30] sm:$0xff]  ;;  %v4115_v21 = vld [vmem:[%s4047_s14 + $0x38] sm:$0xff]  ;;  %v373_v22 = vadd.f32 %v4107_v18, %v4104_v17  ;;  %v4120_v23 = vld [vmem:[%s4047_s14 + $0x140] sm:$0xff]  ;;  %s3708_s28 = sshll.u32 %s3858_s26, 4  ;;  %s3709_s28 = int_to_ptr.vmem [resolvable:$false] %s3708_s28 }
  0x64   : > { %v4123_v24 = vld [vmem:[%s4047_s14 + $0x148] sm:$0xff]  ;;  %v376_v25 = vadd.f32 %v4115_v21, %v4112_v20  ;;  %v4128_v26 = vld [vmem:[%s4047_s14 + $0x150] sm:$0xff]  ;;  %v4131_v27 = vld [vmem:[%s4047_s14 + $0x158] sm:$0xff]  ;;  %p3711_p11 = scmp.lt.s32.totalorder %s5004_s10, %s3709_s28 }
  0x65   : > { %419 = vadd.xlane.f32.xlu0 %v418_v9  ;;  %v427_v28 = vadd.f32 %v4123_v24, %v4120_v23  ;;  %v4136_v29 = vld [vmem:[%s4047_s14 + $0x40] sm:$0xff]  ;;  %v4139_v30 = vld [vmem:[%s4047_s14 + $0x48] sm:$0xff]  ;;  %v430_v31 = vadd.f32 %v4131_v27, %v4128_v26  ;;  %v4144_v32 = vld [vmem:[%s4047_s14 + $0x50] sm:$0xff] }
  0x66   : > { %v4147_v33 = vld [vmem:[%s4047_s14 + $0x58] sm:$0xff]  ;;  %v379_v34 = vadd.f32 %v4139_v30, %v4136_v29  ;;  %v4152_v35 = vld [vmem:[%s4047_s14 + $0x160] sm:$0xff]  ;;  %v4155_v36 = vld [vmem:[%s4047_s14 + $0x168] sm:$0xff] }
  0x67   : > { %371 = vadd.xlane.f32.xlu1 %v370_v13  ;;  %v382_v37 = vadd.f32 %v4147_v33, %v4144_v32  ;;  %v4160_v38 = vld [vmem:[%s4047_s14 + $0x170] sm:$0xff]  ;;  %v4163_v39 = vld [vmem:[%s4047_s14 + $0x178] sm:$0xff]  ;;  %v4166_v40 = vld [vmem:[%s4047_s14 + $0x60] sm:$0xff]  ;;  %v433_v42 = vadd.f32 %v4155_v36, %v4152_v35 }
  0x68   : > { %v4169_v41 = vld [vmem:[%s4047_s14 + $0x68] sm:$0xff]  ;;  %v4174_v43 = vld [vmem:[%s4047_s14 + $0x70] sm:$0xff]  ;;  %v4177_v44 = vld [vmem:[%s4047_s14 + $0x78] sm:$0xff]  ;;  %v436_v45 = vadd.f32 %v4163_v39, %v4160_v38 }
  0x69   : > { %422 = vadd.xlane.f32.xlu0 %v421_v16  ;;  %v4182_v46 = vld [vmem:[%s4047_s14 + $0x180] sm:$0xff]  ;;  %v4185_v47 = vld [vmem:[%s4047_s14 + $0x188] sm:$0xff]  ;;  %v385_v48 = vadd.f32 %v4169_v41, %v4166_v40  ;;  %v4190_v49 = vld [vmem:[%s4047_s14 + $0x190] sm:$0xff]  ;;  %v388_v51 = vadd.f32 %v4177_v44, %v4174_v43 }
  0x6a   : > { %v4193_v50 = vld [vmem:[%s4047_s14 + $0x198] sm:$0xff]  ;;  %v4198_v52 = vld [vmem:[%s4047_s14 + $0x80] sm:$0xff]  ;;  %v4201_v53 = vld [vmem:[%s4047_s14 + $0x88] sm:$0xff]  ;;  %v439_v54 = vadd.f32 %v4185_v47, %v4182_v46 }
  0x6b   : > { %425 = vadd.xlane.f32.xlu1 %v424_v19  ;;  %v4206_v55 = vld [vmem:[%s4047_s14 + $0x90] sm:$0xff]  ;;  %v4209_v56 = vld [vmem:[%s4047_s14 + $0x98] sm:$0xff]  ;;  %v442_v57 = vadd.f32 %v4193_v50, %v4190_v49  ;;  %v4214_v58 = vld [vmem:[%s4047_s14 + $0x1a0] sm:$0xff]  ;;  %v391_v60 = vadd.f32 %v4201_v53, %v4198_v52 }
  0x6c   : > { %v4217_v59 = vld [vmem:[%s4047_s14 + $0x1a8] sm:$0xff]  ;;  %v4222_v61 = vld [vmem:[%s4047_s14 + $0x1b0] sm:$0xff]  ;;  %v4225_v62 = vld [vmem:[%s4047_s14 + $0x1b8] sm:$0xff]  ;;  %v394_v63 = vadd.f32 %v4209_v56, %v4206_v55 }
  0x6d   : > { %374 = vadd.xlane.f32.xlu0 %v373_v22  ;;  %v4230_v3 = vld [vmem:[%s4047_s14 + $0xa0] sm:$0xff]  ;;  %v4233_v7 = vld [vmem:[%s4047_s14 + $0xa8] sm:$0xff]  ;;  %v445_v9 = vadd.f32 %v4217_v59, %v4214_v58  ;;  %v4238_v13 = vld [vmem:[%s4047_s14 + $0xb0] sm:$0xff]  ;;  %v448_v19 = vadd.f32 %v4225_v62, %v4222_v61 }
  0x6e   : > { %v4241_v16 = vld [vmem:[%s4047_s14 + $0xb8] sm:$0xff]  ;;  %v4246_v22 = vld [vmem:[%s4047_s14 + $0x1c0] sm:$0xff] }
  0x6f   : > { %377 = vadd.xlane.f32.xlu1 %v376_v25  ;;  %v4249_v25 = vld [vmem:[%s4047_s14 + $0x1c8] sm:$0xff] }
  0x70   : > { %5375 = vst [vmem:[#allocation15_spill] sm:$0xff] %v4249_v25 }
  0x71   : > { %428 = vadd.xlane.f32.xlu0 %v427_v28  ;;  %v397_v28 = vadd.f32 %v4233_v7, %v4230_v3 }
  0x73   : > { %431 = vadd.xlane.f32.xlu1 %v430_v31  ;;  %v4254_v31 = vld [vmem:[%s4047_s14 + $0x1d0] sm:$0xff] }
  0x74   : > { %5376 = vst [vmem:[#allocation16_spill] sm:$0xff] %v4254_v31 }
  0x75   : > { %380 = vadd.xlane.f32.xlu0 %v379_v34  ;;  %v4257_v34 = vld [vmem:[%s4047_s14 + $0x1d8] sm:$0xff] }
  0x76   : > { %5377 = vst [vmem:[#allocation17_spill] sm:$0xff] %v4257_v34 }
  0x77   : > { %383 = vadd.xlane.f32.xlu1 %v382_v37  ;;  %v400_v37 = vadd.f32 %v4241_v16, %v4238_v13 }
  0x79   : > { %434 = vadd.xlane.f32.xlu0 %v433_v42  ;;  %v4262_v42 = vld [vmem:[%s4047_s14 + $0xc0] sm:$0xff] }
  0x7b   : > { %437 = vadd.xlane.f32.xlu1 %v436_v45  ;;  %v4265_v45 = vld [vmem:[%s4047_s14 + $0xc8] sm:$0xff] }
  0x7c   : > { %5378 = vst [vmem:[#allocation18_spill] sm:$0xff] %v4265_v45 }
  0x7d   : > { %386 = vadd.xlane.f32.xlu0 %v385_v48  ;;  %v451_v48 = vadd.f32 %v4249_v25, %v4246_v22  ;;  %v4299_v25 = vld [vmem:[%s4047_s14 + $0xe8] sm:$0xff] }
  0x7e   : > { %5384 = vst [vmem:[#allocation24_spill] sm:$0xff] %v4299_v25 }
  0x7f   : > { %389 = vadd.xlane.f32.xlu1 %v388_v51  ;;  %v4270_v51 = vld [vmem:[%s4047_s14 + $0xd0] sm:$0xff] }
  0x81   : > { %440 = vadd.xlane.f32.xlu0 %v439_v54  ;;  %v4273_v54 = vld [vmem:[%s4047_s14 + $0xd8] sm:$0xff] }
  0x82   : > { %5379 = vst [vmem:[#allocation19_spill] sm:$0xff] %v4273_v54 }
  0x83   : > { %443 = vadd.xlane.f32.xlu1 %v442_v57  ;;  %v454_v57 = vadd.f32 %v4257_v34, %v4254_v31  ;;  %v4296_v31 = vld [vmem:[%s4047_s14 + $0xe0] sm:$0xff] }
  0x84   : > { %5383 = vst [vmem:[#allocation23_spill] sm:$0xff] %v4296_v31 }
  0x85   : > { %392 = vadd.xlane.f32.xlu0 %v391_v60  ;;  %v4278_v60 = vld [vmem:[%s4047_s14 + $0x1e0] sm:$0xff] }
  0x86   : > { %5380 = vst [vmem:[#allocation20_spill] sm:$0xff] %v4278_v60 }
  0x87   : > { %395 = vadd.xlane.f32.xlu1 %v394_v63  ;;  %v4281_v63 = vld [vmem:[%s4047_s14 + $0x1e8] sm:$0xff] }
  0x88   : > { %5381 = vst [vmem:[#allocation21_spill] sm:$0xff] %v4281_v63  ;;  %v457_v34 = vadd.f32 %v4281_v63, %v4278_v60  ;;  %v3440_v63 = vld [vmem:[#allocation5] ss:$24 sps:$4 sm:$0xff]   ;;  %v3441_v60 = vld [vmem:[#allocation5 + $0x34] ss:$24 sps:$4 sm:$0xff]  }
  0x89   : > { %446 = vadd.xlane.f32.xlu0 %v445_v9  ;;  %v403_v9 = vadd.f32 %v4265_v45, %v4262_v42  ;;  %v4307_v45 = vld [vmem:[%s4047_s14 + $0xf8] sm:$0xff] }
  0x8a   : > { %5386 = vst [vmem:[#allocation26_spill] sm:$0xff] %v4307_v45 }
  0x8b   : > { %449 = vadd.xlane.f32.xlu1 %v448_v19  ;;  %v406_v19 = vadd.f32 %v4273_v54, %v4270_v51  ;;  %v409_v54 = vadd.f32 %v4299_v25, %v4296_v31  ;;  %v3446_v25 = vld [vmem:[#allocation5 + $0x60] ss:$24 sps:$4 sm:$0xff]  }
  0x8d   : > { %398 = vadd.xlane.f32.xlu0 %v397_v28  ;;  %v4288_v28 = vld [vmem:[%s4047_s14 + $0x1f0] sm:$0xff] }
  0x8f   : > { %401 = vadd.xlane.f32.xlu1 %v400_v37  ;;  %v4291_v37 = vld [vmem:[%s4047_s14 + $0x1f8] sm:$0xff] }
  0x90   : > { %5382 = vst [vmem:[#allocation22_spill] sm:$0xff] %v4291_v37 }
  0x91   : > { %452 = vadd.xlane.f32.xlu0 %v451_v48  ;;  %v460_v48 = vadd.f32 %v4291_v37, %v4288_v28  ;;  %v3443_v37 = vld [vmem:[#allocation5 + $0x30] ss:$24 sps:$4 sm:$0xff]  }
  0x93   : > { %455 = vadd.xlane.f32.xlu1 %v454_v57  ;;  %v4304_v57 = vld [vmem:[%s4047_s14 + $0xf0] sm:$0xff]  ;;  %s3704_s14 = scalar_lea.vmem %s5004_s10, 4096 }
  0x94   : > { %5385 = vst [vmem:[#allocation25_spill] sm:$0xff] %v4304_v57  ;;  %p3705_p6 = scmp.ne.s32.totalorder %s5004_s10, %s3704_s14 }
  0x95   : > { %404 = vadd.xlane.f32.xlu0 %v403_v9  ;;  %v412_v9 = vadd.f32 %v4307_v45, %v4304_v57 }
  0x96   : > { %p3706_p8 = pnand %p3705_p6, %p3987_p10 }
  0x97   : > { %407 = vadd.xlane.f32.xlu1 %v406_v19  ;;  %v3438_v19 = vld [vmem:[#allocation5 + $0x4] ss:$24 sps:$4 sm:$0xff]  }
  0x98   : > { %3317 = vmatprep.subr.bf16.mxu1 %v3438_v19  ;;  %1520 = vmatprep.subr.bf16.mxu0 %v3438_v19  ;;  %v3452_v19 = vld [vmem:[#allocation5 + $0xc0] ss:$24 sps:$4 sm:$0xff]   ;;  %p3707_p12 = pneg %p3706_p8 }
  0x99   : > { %458 = vadd.xlane.f32.xlu0 %v457_v34  ;;  %3333 = vmatpush1.bf16.msra.mxu1 %v3440_v63  ;;  %v3444_v34 = vld [vmem:[#allocation5 + $0x64] ss:$24 sps:$4 sm:$0xff]  }
  0x9a   : > { %1521 = vmatpush1.bf16.msra.mxu0 %v3440_v63  ;;  %3318 = vmatprep.subr.bf16.mxu1 %v3441_v60  ;;  %v3453_v63 = vld [vmem:[#allocation5 + $0xf4] ss:$24 sps:$4 sm:$0xff]  }
  0x9b   : > { %461 = vadd.xlane.f32.xlu1 %v460_v48  ;;  %1522 = vmatprep.subr.bf16.mxu0 %v3441_v60  ;;  %v3447_v48 = vld [vmem:[#allocation5 + $0x94] ss:$24 sps:$4 sm:$0xff]   ;;  %v3455_v60 = vld [vmem:[#allocation5 + $0xf0] ss:$24 sps:$4 sm:$0xff]  }
  0x9d   : > { %410 = vadd.xlane.f32.xlu0 %v409_v54  ;;  %3334 = vmatpush1.bf16.msra.mxu1 %v3443_v37  ;;  %v3449_v54 = vld [vmem:[#allocation5 + $0x90] ss:$24 sps:$4 sm:$0xff]  }
  0x9e   : > { %1523 = vmatpush1.bf16.msra.mxu0 %v3443_v37  ;;  %3319 = vmatprep.subr.bf16.mxu1 %v3444_v34  ;;  %v3456_v37 = vld [vmem:[#allocation5 + $0x124] ss:$24 sps:$4 sm:$0xff]  }
  0x9f   : > { %413 = vadd.xlane.f32.xlu1 %v412_v9  ;;  %1524 = vmatprep.subr.bf16.mxu0 %v3444_v34  ;;  %v3450_v9 = vld [vmem:[#allocation5 + $0xc4] ss:$24 sps:$4 sm:$0xff]   ;;  %v3458_v34 = vld [vmem:[#allocation5 + $0x120] ss:$24 sps:$4 sm:$0xff]  }
  0xa1   : > { %3335 = vmatpush1.bf16.msra.mxu1 %v3446_v25 }
  0xa2   : > { %1525 = vmatpush1.bf16.msra.mxu0 %v3446_v25  ;;  %3320 = vmatprep.subr.bf16.mxu1 %v3447_v48  ;;  %v3459_v25 = vld [vmem:[#allocation5 + $0x154] ss:$24 sps:$4 sm:$0xff]  }
  0xa3   : > { %1526 = vmatprep.subr.bf16.mxu0 %v3447_v48  ;;  %v3461_v48 = vld [vmem:[#allocation5 + $0x150] ss:$24 sps:$4 sm:$0xff]  }
  0xa5   : > { %3336 = vmatpush1.bf16.msra.mxu1 %v3449_v54 }
  0xa6   : > { %1527 = vmatpush1.bf16.msra.mxu0 %v3449_v54  ;;  %3321 = vmatprep.subr.bf16.mxu1 %v3450_v9  ;;  %v3462_v54 = vld [vmem:[#allocation5 + $0x184] ss:$24 sps:$4 sm:$0xff]  }
  0xa7   : > { %1528 = vmatprep.subr.bf16.mxu0 %v3450_v9  ;;  %v3464_v9 = vld [vmem:[#allocation5 + $0x180] ss:$24 sps:$4 sm:$0xff]  }
  0xa9   : > { %3337 = vmatpush1.bf16.msra.mxu1 %v3452_v19 }
  0xaa   : > { %1529 = vmatpush1.bf16.msra.mxu0 %v3452_v19  ;;  %3322 = vmatprep.subr.bf16.mxu1 %v3453_v63  ;;  %v3465_v19 = vld [vmem:[#allocation5 + $0x1b4] ss:$24 sps:$4 sm:$0xff]  }
  0xab   : > { %1530 = vmatprep.subr.bf16.mxu0 %v3453_v63  ;;  %v3467_v63 = vld [vmem:[#allocation5 + $0x1b0] ss:$24 sps:$4 sm:$0xff]  }
  0xad   : > { %3338 = vmatpush1.bf16.msra.mxu1 %v3455_v60 }
  0xae   : > { %1531 = vmatpush1.bf16.msra.mxu0 %v3455_v60  ;;  %3323 = vmatprep.subr.bf16.mxu1 %v3456_v37 }
  0xaf   : > { %1532 = vmatprep.subr.bf16.mxu0 %v3456_v37 }
  0xb1   : > { %3339 = vmatpush1.bf16.msra.mxu1 %v3458_v34 }
  0xb2   : > { %1533 = vmatpush1.bf16.msra.mxu0 %v3458_v34  ;;  %3324 = vmatprep.subr.bf16.mxu1 %v3459_v25 }
  0xb3   : > { %1534 = vmatprep.subr.bf16.mxu0 %v3459_v25 }
  0xb5   : > { %3340 = vmatpush1.bf16.msra.mxu1 %v3461_v48 }
  0xb6   : > { %1535 = vmatpush1.bf16.msra.mxu0 %v3461_v48  ;;  %3325 = vmatprep.subr.bf16.mxu1 %v3462_v54 }
  0xb7   : > { %1536 = vmatprep.subr.bf16.mxu0 %v3462_v54 }
  0xb9   : > { %3341 = vmatpush1.bf16.msra.mxu1 %v3464_v9 }
  0xba   : > { %1537 = vmatpush1.bf16.msra.mxu0 %v3464_v9  ;;  %3326 = vmatprep.subr.bf16.mxu1 %v3465_v19 }
  0xbb   : > { %1538 = vmatprep.subr.bf16.mxu0 %v3465_v19 }
  0xbd   : > { %3342 = vmatpush1.bf16.msra.mxu1 %v3467_v63 }
  0xbe   : > { %1539 = vmatpush1.bf16.msra.mxu0 %v3467_v63 }
  0xee   : > { %v417_v60 = vpop.xlane.xlu0 %416 }
  0xef   : > { %v480_v37 = vmul.f32 0.00390625, %v417_v60 }
  0xf0   : > { %v369_v34 = vpop.xlane.xlu1 %368 }
  0xf1   : > { %v464_v45 = vmul.f32 0.00390625, %v369_v34  ;;  %v4314_v25 = vsub.f32 %v4058_v0, %v480_v37  ;;  %v4317_v48 = vsub.f32 %v4061_v1, %v480_v37 }
  0xf2   : > { %v420_v57 = vpop.xlane.xlu0 %419 }
  0xf3   : > { %5387 = vst [vmem:[#allocation27_spill] sm:$0xff] %v4314_v25  ;;  %5388 = vst [vmem:[#allocation28_spill] sm:$0xff] %v4317_v48  ;;  %v4320_v54 = vsub.f32 %v4072_v5, %v464_v45  ;;  %v4323_v9 = vsub.f32 %v4075_v6, %v464_v45  ;;  %v481_v19 = vmul.f32 0.00390625, %v420_v57  ;;  %v592_v63 = vmul.f32 %v4314_v25, %v4314_v25 }
  0xf4   : > { %v372_v31 = vpop.xlane.xlu1 %371  ;;  %v593_v60 = vmul.f32 %v4317_v48, %v4317_v48 }
  0xf5   : > { %5389 = vst [vmem:[#allocation29_spill] sm:$0xff] %v4320_v54  ;;  %5390 = vst [vmem:[#allocation30_spill] sm:$0xff] %v4323_v9  ;;  %v465_v0 = vmul.f32 0.00390625, %v372_v31  ;;  %v560_v1 = vmul.f32 %v4320_v54, %v4320_v54  ;;  %v561_v37 = vmul.f32 %v4323_v9, %v4323_v9  ;;  %v4334_v5 = vsub.f32 %v4064_v2, %v481_v19 }
  0xf6   : > { %v4337_v6 = vsub.f32 %v4069_v4, %v481_v19  ;;  %v672_v45 = vadd.f32 %v593_v60, %v592_v63  ;;  %v423_v57 = vpop.xlane.xlu0 %422 }
  0xf7   : > { %v4340_v34 = vsub.f32 %v4080_v8, %v465_v0  ;;  %v4343_v25 = vsub.f32 %v4085_v10, %v465_v0  ;;  %v482_v31 = vmul.f32 0.00390625, %v423_v57  ;;  %v594_v9 = vmul.f32 %v4334_v5, %v4334_v5 }
  0xf8   : > { %673 = vadd.xlane.f32.xlu0 %v672_v45  ;;  %v426_v54 = vpop.xlane.xlu1 %425  ;;  %v595_v2 = vmul.f32 %v4337_v6, %v4337_v6  ;;  %v624_v48 = vadd.f32 %v561_v37, %v560_v1 }
  0xf9   : > { %v483_v4 = vmul.f32 0.00390625, %v426_v54  ;;  %v562_v19 = vmul.f32 %v4340_v34, %v4340_v34  ;;  %v563_v8 = vmul.f32 %v4343_v25, %v4343_v25  ;;  %v4354_v10 = vsub.f32 %v4088_v11, %v482_v31 }
  0xfa   : > { %v4357_v63 = vsub.f32 %v4091_v12, %v482_v31  ;;  %v675_v60 = vadd.f32 %v595_v2, %v594_v9  ;;  %v375_v0 = vpop.xlane.xlu0 %374 }
  0xfb   : > { %v4360_v45 = vsub.f32 %v4096_v14, %v483_v4  ;;  %v4363_v1 = vsub.f32 %v4099_v15, %v483_v4  ;;  %v466_v54 = vmul.f32 0.00390625, %v375_v0  ;;  %v596_v57 = vmul.f32 %v4354_v10, %v4354_v10 }
  0xfc   : > { %676 = vadd.xlane.f32.xlu1 %v675_v60  ;;  %625 = vadd.xlane.f32.xlu0 %v624_v48  ;;  %v378_v37 = vpop.xlane.xlu1 %377  ;;  %v597_v11 = vmul.f32 %v4357_v63, %v4357_v63  ;;  %v627_v12 = vadd.f32 %v563_v8, %v562_v19 }
  0xfd   : > { %v467_v31 = vmul.f32 0.00390625, %v378_v37  ;;  %v598_v9 = vmul.f32 %v4360_v45, %v4360_v45  ;;  %v599_v14 = vmul.f32 %v4363_v1, %v4363_v1  ;;  %v4374_v15 = vsub.f32 %v4104_v17, %v466_v54 }
  0xfe   : > { %v4377_v48 = vsub.f32 %v4107_v18, %v466_v54  ;;  %v678_v2 = vadd.f32 %v597_v11, %v596_v57  ;;  %v429_v4 = vpop.xlane.xlu0 %428 }
  0xff   : > { %v4380_v60 = vsub.f32 %v4112_v20, %v467_v31  ;;  %v4383_v19 = vsub.f32 %v4115_v21, %v467_v31  ;;  %v484_v8 = vmul.f32 0.00390625, %v429_v4  ;;  %v564_v37 = vmul.f32 %v4374_v15, %v4374_v15 }
 0x100   : > { %679 = vadd.xlane.f32.xlu0 %v678_v2  ;;  %628 = vadd.xlane.f32.xlu1 %v627_v12  ;;  %v432_v0 = vpop.xlane.xlu1 %431  ;;  %v565_v17 = vmul.f32 %v4377_v48, %v4377_v48  ;;  %v681_v18 = vadd.f32 %v599_v14, %v598_v9 }
 0x101   : > { %v485_v54 = vmul.f32 0.00390625, %v432_v0  ;;  %v566_v57 = vmul.f32 %v4380_v60, %v4380_v60  ;;  %v567_v20 = vmul.f32 %v4383_v19, %v4383_v19  ;;  %v4394_v21 = vsub.f32 %v4120_v23, %v484_v8 }
 0x102   : > { %v4397_v11 = vsub.f32 %v4123_v24, %v484_v8  ;;  %v630_v12 = vadd.f32 %v565_v17, %v564_v37  ;;  %v381_v31 = vpop.xlane.xlu0 %380  ;;  %v3468_v8 = vld [vmem:[#allocation5 + $0x1e4] ss:$24 sps:$4 sm:$0xff]   ;;  %v3470_v17 = vld [vmem:[#allocation5 + $0x1e0] ss:$24 sps:$4 sm:$0xff]  }
 0x103   : > { %v4400_v2 = vsub.f32 %v4128_v26, %v485_v54  ;;  %v4403_v9 = vsub.f32 %v4131_v27, %v485_v54  ;;  %v468_v14 = vmul.f32 0.00390625, %v381_v31  ;;  %v600_v0 = vmul.f32 %v4394_v21, %v4394_v21  ;;  %3327 = vmatprep.subr.bf16.mxu1 %v3468_v8  ;;  %1540 = vmatprep.subr.bf16.mxu0 %v3468_v8  ;;  %v3471_v8 = vld [vmem:[#allocation5 + $0x214] ss:$24 sps:$4 sm:$0xff]  }
 0x104   : > { %631 = vadd.xlane.f32.xlu0 %v630_v12  ;;  %682 = vadd.xlane.f32.xlu1 %v681_v18  ;;  %v384_v4 = vpop.xlane.xlu1 %383  ;;  %v601_v23 = vmul.f32 %v4397_v11, %v4397_v11  ;;  %v633_v24 = vadd.f32 %v567_v20, %v566_v57 }
 0x105   : > { %v469_v37 = vmul.f32 0.00390625, %v384_v4  ;;  %v602_v26 = vmul.f32 %v4400_v2, %v4400_v2  ;;  %v603_v27 = vmul.f32 %v4403_v9, %v4403_v9  ;;  %v4414_v54 = vsub.f32 %v4136_v29, %v468_v14  ;;  %3343 = vmatpush1.bf16.msra.mxu1 %v3470_v17  ;;  %1541 = vmatpush1.bf16.msra.mxu0 %v3470_v17 }
 0x106   : > { %v4417_v18 = vsub.f32 %v4139_v30, %v468_v14  ;;  %v684_v12 = vadd.f32 %v601_v23, %v600_v0  ;;  %v435_v31 = vpop.xlane.xlu0 %434  ;;  %3328 = vmatprep.subr.bf16.mxu1 %v3471_v8  ;;  %1542 = vmatprep.subr.bf16.mxu0 %v3471_v8 }
 0x107   : > { %5391 = vst [vmem:[#allocation31_spill] sm:$0xff] %v4414_v54  ;;  %v4420_v57 = vsub.f32 %v4144_v32, %v469_v37  ;;  %v4423_v20 = vsub.f32 %v4147_v33, %v469_v37  ;;  %v486_v4 = vmul.f32 0.00390625, %v435_v31  ;;  %v568_v30 = vmul.f32 %v4414_v54, %v4414_v54 }
 0x108   : > { %685 = vadd.xlane.f32.xlu0 %v684_v12  ;;  %634 = vadd.xlane.f32.xlu1 %v633_v24  ;;  %v438_v29 = vpop.xlane.xlu1 %437  ;;  %v569_v14 = vmul.f32 %v4417_v18, %v4417_v18  ;;  %v687_v0 = vadd.f32 %v603_v27, %v602_v26  ;;  %v3473_v12 = vld [vmem:[#allocation5 + $0x210] ss:$24 sps:$4 sm:$0xff]  }
 0x109   : > { %v487_v23 = vmul.f32 0.00390625, %v438_v29  ;;  %v570_v32 = vmul.f32 %v4420_v57, %v4420_v57  ;;  %v571_v33 = vmul.f32 %v4423_v20, %v4423_v20  ;;  %v4434_v37 = vsub.f32 %v4152_v35, %v486_v4  ;;  %3344 = vmatpush1.bf16.msra.mxu1 %v3473_v12  ;;  %1543 = vmatpush1.bf16.msra.mxu0 %v3473_v12 }
 0x10a   : > { %v4437_v24 = vsub.f32 %v4155_v36, %v486_v4  ;;  %v636_v17 = vadd.f32 %v569_v14, %v568_v30  ;;  %v387_v31 = vpop.xlane.xlu0 %386  ;;  %v3474_v14 = vld [vmem:[#allocation5 + $0x244] ss:$24 sps:$4 sm:$0xff]  }
 0x10b   : > { %v4440_v54 = vsub.f32 %v4160_v38, %v487_v23  ;;  %v4443_v26 = vsub.f32 %v4163_v39, %v487_v23  ;;  %v470_v27 = vmul.f32 0.00390625, %v387_v31  ;;  %v604_v35 = vmul.f32 %v4434_v37, %v4434_v37  ;;  %3329 = vmatprep.subr.bf16.mxu1 %v3474_v14  ;;  %1544 = vmatprep.subr.bf16.mxu0 %v3474_v14 }
 0x10c   : > { %637 = vadd.xlane.f32.xlu0 %v636_v17  ;;  %688 = vadd.xlane.f32.xlu1 %v687_v0  ;;  %v390_v29 = vpop.xlane.xlu1 %389  ;;  %v605_v36 = vmul.f32 %v4437_v24, %v4437_v24  ;;  %v639_v4 = vadd.f32 %v571_v33, %v570_v32  ;;  %v3476_v17 = vld [vmem:[#allocation5 + $0x240] ss:$24 sps:$4 sm:$0xff]  }
 0x10d   : > { %v471_v30 = vmul.f32 0.00390625, %v390_v29  ;;  %v606_v38 = vmul.f32 %v4440_v54, %v4440_v54  ;;  %v607_v39 = vmul.f32 %v4443_v26, %v4443_v26  ;;  %v4454_v0 = vsub.f32 %v4166_v40, %v470_v27  ;;  %3345 = vmatpush1.bf16.msra.mxu1 %v3476_v17  ;;  %1545 = vmatpush1.bf16.msra.mxu0 %v3476_v17 }
 0x10e   : > { %v4457_v23 = vsub.f32 %v4169_v41, %v470_v27  ;;  %v690_v8 = vadd.f32 %v605_v36, %v604_v35  ;;  %v441_v31 = vpop.xlane.xlu0 %440  ;;  %v3477_v36 = vld [vmem:[#allocation5 + $0x274] ss:$24 sps:$4 sm:$0xff]  }
 0x10f   : > { %v4460_v32 = vsub.f32 %v4174_v43, %v471_v30  ;;  %v4463_v33 = vsub.f32 %v4177_v44, %v471_v30  ;;  %v488_v29 = vmul.f32 0.00390625, %v441_v31  ;;  %v572_v40 = vmul.f32 %v4454_v0, %v4454_v0  ;;  %3330 = vmatprep.subr.bf16.mxu1 %v3477_v36  ;;  %1546 = vmatprep.subr.bf16.mxu0 %v3477_v36 }
 0x110   : > { %691 = vadd.xlane.f32.xlu0 %v690_v8  ;;  %640 = vadd.xlane.f32.xlu1 %v639_v4  ;;  %v444_v12 = vpop.xlane.xlu1 %443  ;;  %v573_v41 = vmul.f32 %v4457_v23, %v4457_v23  ;;  %v693_v27 = vadd.f32 %v607_v39, %v606_v38  ;;  %v3479_v8 = vld [vmem:[#allocation5 + $0x270] ss:$24 sps:$4 sm:$0xff]  }
 0x111   : > { %v489_v35 = vmul.f32 0.00390625, %v444_v12  ;;  %v574_v43 = vmul.f32 %v4460_v32, %v4460_v32  ;;  %v575_v44 = vmul.f32 %v4463_v33, %v4463_v33  ;;  %v4474_v4 = vsub.f32 %v4182_v46, %v488_v29  ;;  %3346 = vmatpush1.bf16.msra.mxu1 %v3479_v8  ;;  %1547 = vmatpush1.bf16.msra.mxu0 %v3479_v8 }
 0x112   : > { %v4477_v30 = vsub.f32 %v4185_v47, %v488_v29  ;;  %v642_v14 = vadd.f32 %v573_v41, %v572_v40  ;;  %v393_v31 = vpop.xlane.xlu0 %392  ;;  %v3480_v41 = vld [vmem:[#allocation5 + $0x2a4] ss:$24 sps:$4 sm:$0xff]  }
 0x113   : > { %v4480_v38 = vsub.f32 %v4190_v49, %v489_v35  ;;  %v4483_v39 = vsub.f32 %v4193_v50, %v489_v35  ;;  %v472_v12 = vmul.f32 0.00390625, %v393_v31  ;;  %v608_v46 = vmul.f32 %v4474_v4, %v4474_v4  ;;  %3331 = vmatprep.subr.bf16.mxu1 %v3480_v41  ;;  %1548 = vmatprep.subr.bf16.mxu0 %v3480_v41 }
 0x114   : > { %643 = vadd.xlane.f32.xlu0 %v642_v14  ;;  %694 = vadd.xlane.f32.xlu1 %v693_v27  ;;  %v396_v17 = vpop.xlane.xlu1 %395  ;;  %v609_v47 = vmul.f32 %v4477_v30, %v4477_v30  ;;  %v645_v29 = vadd.f32 %v575_v44, %v574_v43  ;;  %v3482_v14 = vld [vmem:[#allocation5 + $0x2a0] ss:$24 sps:$4 sm:$0xff]  }
 0x115   : > { %v473_v40 = vmul.f32 0.00390625, %v396_v17  ;;  %v610_v49 = vmul.f32 %v4480_v38, %v4480_v38  ;;  %v611_v50 = vmul.f32 %v4483_v39, %v4483_v39  ;;  %v4494_v27 = vsub.f32 %v4198_v52, %v472_v12  ;;  %3347 = vmatpush1.bf16.msra.mxu1 %v3482_v14  ;;  %1549 = vmatpush1.bf16.msra.mxu0 %v3482_v14 }
 0x116   : > { %v4497_v35 = vsub.f32 %v4201_v53, %v472_v12  ;;  %v696_v36 = vadd.f32 %v609_v47, %v608_v46  ;;  %v447_v31 = vpop.xlane.xlu0 %446  ;;  %v3483_v47 = vld [vmem:[#allocation5 + $0x2d4] ss:$24 sps:$4 sm:$0xff]  }
 0x117   : > { %v4500_v43 = vsub.f32 %v4206_v55, %v473_v40  ;;  %v4503_v44 = vsub.f32 %v4209_v56, %v473_v40  ;;  %v490_v17 = vmul.f32 0.00390625, %v447_v31  ;;  %v576_v52 = vmul.f32 %v4494_v27, %v4494_v27  ;;  %3332 = vmatprep.subr.bf16.mxu1 %v3483_v47  ;;  %1550 = vmatprep.subr.bf16.mxu0 %v3483_v47  ;;  %v3488_v47 = vld [vmem:[#allocation5 + $0xc] ss:$24 sps:$4 sm:$0xff]  }
 0x118   : > { %697 = vadd.xlane.f32.xlu0 %v696_v36  ;;  %646 = vadd.xlane.f32.xlu1 %v645_v29  ;;  %v450_v8 = vpop.xlane.xlu1 %449  ;;  %v577_v53 = vmul.f32 %v4497_v35, %v4497_v35  ;;  %v699_v12 = vadd.f32 %v611_v50, %v610_v49  ;;  %v3485_v36 = vld [vmem:[#allocation5 + $0x2d0] ss:$24 sps:$4 sm:$0xff]  }
 0x119   : > { %v491_v46 = vmul.f32 0.00390625, %v450_v8  ;;  %v578_v55 = vmul.f32 %v4500_v43, %v4500_v43  ;;  %v579_v56 = vmul.f32 %v4503_v44, %v4503_v44  ;;  %v4514_v29 = vsub.f32 %v4214_v58, %v490_v17  ;;  %3348 = vmatpush1.bf16.msra.mxu1 %v3485_v36  ;;  %1551 = vmatpush1.bf16.msra.mxu0 %v3485_v36 }
 0x11a   : > { %v4517_v40 = vsub.f32 %v4217_v59, %v490_v17  ;;  %v648_v41 = vadd.f32 %v577_v53, %v576_v52  ;;  %v399_v31 = vpop.xlane.xlu0 %398  ;;  %1713 = vmatprep.subr.bf16.mxu1 %v3488_v47 }
 0x11b   : > { %v4520_v49 = vsub.f32 %v4222_v61, %v491_v46  ;;  %v4523_v50 = vsub.f32 %v4225_v62, %v491_v46  ;;  %v474_v8 = vmul.f32 0.00390625, %v399_v31  ;;  %v612_v58 = vmul.f32 %v4514_v29, %v4514_v29 }
 0x11c   : > { %649 = vadd.xlane.f32.xlu0 %v648_v41  ;;  %700 = vadd.xlane.f32.xlu1 %v699_v12  ;;  %v402_v14 = vpop.xlane.xlu1 %401  ;;  %v613_v59 = vmul.f32 %v4517_v40, %v4517_v40  ;;  %v651_v17 = vadd.f32 %v579_v56, %v578_v55 }
 0x11d   : > { %v475_v52 = vmul.f32 0.00390625, %v402_v14  ;;  %v614_v61 = vmul.f32 %v4520_v49, %v4520_v49  ;;  %v615_v62 = vmul.f32 %v4523_v50, %v4523_v50  ;;  %v4534_v53 = vsub.f32 %v4230_v3, %v474_v8 }
 0x11e   : > { %v4537_v12 = vsub.f32 %v4233_v7, %v474_v8  ;;  %v702_v46 = vadd.f32 %v613_v59, %v612_v58  ;;  %v453_v41 = vpop.xlane.xlu0 %452  ;;  %v5396_v59 = vld [vmem:[#allocation15_spill] sm:$0xff] }
 0x11f   : > { %5392 = vst [vmem:[#allocation32_spill] sm:$0xff] %v4534_v53  ;;  %v4540_v55 = vsub.f32 %v4238_v13, %v475_v52  ;;  %v4543_v56 = vsub.f32 %v4241_v16, %v475_v52  ;;  %v492_v31 = vmul.f32 0.00390625, %v453_v41  ;;  %v580_v3 = vmul.f32 %v4534_v53, %v4534_v53  ;;  %v5397_v53 = vld [vmem:[#allocation16_spill] sm:$0xff] }
 0x120   : > { %5393 = vst [vmem:[#allocation33_spill] sm:$0xff] %v4537_v12  ;;  %703 = vadd.xlane.f32.xlu0 %v702_v46  ;;  %652 = vadd.xlane.f32.xlu1 %v651_v17  ;;  %v456_v14 = vpop.xlane.xlu1 %455  ;;  %v581_v7 = vmul.f32 %v4537_v12, %v4537_v12  ;;  %v705_v36 = vadd.f32 %v615_v62, %v614_v61  ;;  %v3491_v46 = vld [vmem:[#allocation5 + $0x14] ss:$24 sps:$4 sm:$0xff]  }
 0x121   : > { %5394 = vst [vmem:[#allocation34_spill] sm:$0xff] %v4540_v55  ;;  %v493_v8 = vmul.f32 0.00390625, %v456_v14  ;;  %v582_v58 = vmul.f32 %v4540_v55, %v4540_v55  ;;  %v583_v13 = vmul.f32 %v4543_v56, %v4543_v56  ;;  %v4554_v16 = vsub.f32 %v4246_v22, %v492_v31  ;;  %v5399_v61 = vld [vmem:[#allocation17_spill] sm:$0xff]  ;;  %1906 = vmatprep.subr.bf16.mxu0 %v3491_v46 }
 0x122   : > { %v4557_v17 = vsub.f32 %v5396_v59, %v492_v31  ;;  %v654_v52 = vadd.f32 %v581_v7, %v580_v3  ;;  %v405_v41 = vpop.xlane.xlu0 %404 }
 0x123   : > { %5395 = vst [vmem:[#allocation35_spill] sm:$0xff] %v4554_v16  ;;  %v4560_v12 = vsub.f32 %v5397_v53, %v493_v8  ;;  %v4563_v62 = vsub.f32 %v5399_v61, %v493_v8  ;;  %v476_v14 = vmul.f32 0.00390625, %v405_v41  ;;  %v616_v22 = vmul.f32 %v4554_v16, %v4554_v16 }
 0x124   : > { %655 = vadd.xlane.f32.xlu0 %v654_v52  ;;  %706 = vadd.xlane.f32.xlu1 %v705_v36  ;;  %v408_v55 = vpop.xlane.xlu1 %407  ;;  %v617_v47 = vmul.f32 %v4557_v17, %v4557_v17  ;;  %v657_v31 = vadd.f32 %v583_v13, %v582_v58  ;;  %v5401_v36 = vld [vmem:[#allocation18_spill] sm:$0xff]  ;;  %v5404_v58 = vld [vmem:[#allocation19_spill] sm:$0xff] }
 0x125   : > { %5398 = vst [vmem:[#allocation15_spill] sm:$0xff] %v4560_v12  ;;  %v477_v3 = vmul.f32 0.00390625, %v408_v55  ;;  %v618_v7 = vmul.f32 %v4560_v12, %v4560_v12  ;;  %v619_v53 = vmul.f32 %v4563_v62, %v4563_v62  ;;  %v4574_v8 = vsub.f32 %v4262_v42, %v476_v14 }
 0x126   : > { %v4577_v59 = vsub.f32 %v5401_v36, %v476_v14  ;;  %v708_v52 = vadd.f32 %v617_v47, %v616_v22  ;;  %v459_v41 = vpop.xlane.xlu0 %458  ;;  %v5406_v47 = vld [vmem:[#allocation20_spill] sm:$0xff] }
 0x127   : > { %5400 = vst [vmem:[#allocation16_spill] sm:$0xff] %v4574_v8  ;;  %v4580_v61 = vsub.f32 %v4270_v51, %v477_v3  ;;  %v4583_v55 = vsub.f32 %v5404_v58, %v477_v3  ;;  %v494_v13 = vmul.f32 0.00390625, %v459_v41  ;;  %v584_v46 = vmul.f32 %v4574_v8, %v4574_v8 }
 0x128   : > { %5402 = vst [vmem:[#allocation17_spill] sm:$0xff] %v4577_v59  ;;  %709 = vadd.xlane.f32.xlu0 %v708_v52  ;;  %658 = vadd.xlane.f32.xlu1 %v657_v31  ;;  %v462_v12 = vpop.xlane.xlu1 %461  ;;  %v585_v42 = vmul.f32 %v4577_v59, %v4577_v59  ;;  %v711_v14 = vadd.f32 %v619_v53, %v618_v7  ;;  %v5408_v52 = vld [vmem:[#allocation21_spill] sm:$0xff]  ;;  %v5411_v59 = vld [vmem:[#allocation22_spill] sm:$0xff] }
 0x129   : > { %5403 = vst [vmem:[#allocation18_spill] sm:$0xff] %v4580_v61  ;;  %5405 = vst [vmem:[#allocation19_spill] sm:$0xff] %v4583_v55  ;;  %v495_v36 = vmul.f32 0.00390625, %v462_v12  ;;  %v586_v22 = vmul.f32 %v4580_v61, %v4580_v61  ;;  %v587_v51 = vmul.f32 %v4583_v55, %v4583_v55  ;;  %v4594_v3 = vsub.f32 %v5406_v47, %v494_v13  ;;  %v5419_v55 = vld [vmem:[#allocation26_spill] sm:$0xff] }
 0x12a   : > { %v4597_v31 = vsub.f32 %v5408_v52, %v494_v13  ;;  %v660_v41 = vadd.f32 %v585_v42, %v584_v46  ;;  %v411_v58 = vpop.xlane.xlu0 %410 }
 0x12b   : > { %5407 = vst [vmem:[#allocation20_spill] sm:$0xff] %v4594_v3  ;;  %v4600_v8 = vsub.f32 %v4288_v28, %v495_v36  ;;  %v4603_v7 = vsub.f32 %v5411_v59, %v495_v36  ;;  %v478_v12 = vmul.f32 0.00390625, %v411_v58  ;;  %v620_v61 = vmul.f32 %v4594_v3, %v4594_v3  ;;  %v5413_v59 = vld [vmem:[#allocation23_spill] sm:$0xff]  ;;  %v5415_v36 = vld [vmem:[#allocation24_spill] sm:$0xff]  ;;  %v5417_v58 = vld [vmem:[#allocation25_spill] sm:$0xff] }
 0x12c   : > { %5409 = vst [vmem:[#allocation21_spill] sm:$0xff] %v4597_v31  ;;  %661 = vadd.xlane.f32.xlu0 %v660_v41  ;;  %712 = vadd.xlane.f32.xlu1 %v711_v14  ;;  %v414_v53 = vpop.xlane.xlu1 %413  ;;  %v621_v47 = vmul.f32 %v4597_v31, %v4597_v31  ;;  %v663_v13 = vadd.f32 %v587_v51, %v586_v22 }
 0x12d   : > { %5410 = vst [vmem:[#allocation36_spill] sm:$0xff] %v4600_v8  ;;  %5412 = vst [vmem:[#allocation22_spill] sm:$0xff] %v4603_v7  ;;  %v479_v52 = vmul.f32 0.00390625, %v414_v53  ;;  %v622_v46 = vmul.f32 %v4600_v8, %v4600_v8  ;;  %v623_v28 = vmul.f32 %v4603_v7, %v4603_v7  ;;  %v4614_v42 = vsub.f32 %v5413_v59, %v478_v12 }
 0x12e   : > { %v4617_v14 = vsub.f32 %v5415_v36, %v478_v12  ;;  %v714_v41 = vadd.f32 %v621_v47, %v620_v61 }
 0x12f   : > { %5414 = vst [vmem:[#allocation23_spill] sm:$0xff] %v4614_v42  ;;  %v4620_v3 = vsub.f32 %v5417_v58, %v479_v52  ;;  %v4623_v31 = vsub.f32 %v5419_v55, %v479_v52  ;;  %v588_v22 = vmul.f32 %v4614_v42, %v4614_v42  ;;  %v717_v53 = vadd.f32 %v623_v28, %v622_v46 }
 0x130   : > { %5416 = vst [vmem:[#allocation24_spill] sm:$0xff] %v4617_v14  ;;  %715 = vadd.xlane.f32.xlu0 %v714_v41  ;;  %664 = vadd.xlane.f32.xlu1 %v663_v13  ;;  %v589_v51 = vmul.f32 %v4617_v14, %v4617_v14 }
 0x131   : > { %5418 = vst [vmem:[#allocation25_spill] sm:$0xff] %v4620_v3  ;;  %5420 = vst [vmem:[#allocation26_spill] sm:$0xff] %v4623_v31  ;;  %v590_v12 = vmul.f32 %v4620_v3, %v4620_v3  ;;  %v591_v61 = vmul.f32 %v4623_v31, %v4623_v31 }
 0x132   : > { %v666_v47 = vadd.f32 %v589_v51, %v588_v22 }
 0x133   : > { %v669_v55 = vadd.f32 %v591_v61, %v590_v12 }
 0x134   : > { %667 = vadd.xlane.f32.xlu0 %v666_v47  ;;  %718 = vadd.xlane.f32.xlu1 %v717_v53 }
 0x138   : > { %670 = vadd.xlane.f32.xlu1 %v669_v55 }
 0x185   : > { %v674_v52 = vpop.xlane.xlu0 %673 }
 0x186   : > { %v736_v13 = vmul.f32 0.00390625, %v674_v52 }
 0x188   : > { %v768_v59 = vadd.f32 1e-06, %v736_v13 }
 0x189   : > { %v626_v36 = vpop.xlane.xlu0 %625  ;;  %v677_v41 = vpop.xlane.xlu1 %676 }
 0x18a   : > { %v720_v58 = vmul.f32 0.00390625, %v626_v36  ;;  %v737_v42 = vmul.f32 0.00390625, %v677_v41  ;;  %3582 = vrsqrt.f32 %v768_v59 }
 0x18c   : > { %v769_v14 = vadd.f32 1e-06, %v737_v42  ;;  %v752_v46 = vadd.f32 1e-06, %v720_v58 }
 0x18d   : > { %v680_v28 = vpop.xlane.xlu0 %679  ;;  %v629_v3 = vpop.xlane.xlu1 %628 }
 0x18e   : > { %v738_v8 = vmul.f32 0.00390625, %v680_v28  ;;  %v721_v7 = vmul.f32 0.00390625, %v629_v3  ;;  %3584 = vrsqrt.f32 %v769_v14 }
 0x18f   : > { %3586 = vrsqrt.f32 %v752_v46 }
 0x190   : > { %v753_v22 = vadd.f32 1e-06, %v721_v7  ;;  %v770_v51 = vadd.f32 1e-06, %v738_v8 }
 0x191   : > { %v632_v53 = vpop.xlane.xlu0 %631  ;;  %v683_v12 = vpop.xlane.xlu1 %682 }
 0x192   : > { %v722_v61 = vmul.f32 0.00390625, %v632_v53  ;;  %v739_v47 = vmul.f32 0.00390625, %v683_v12  ;;  %3588 = vrsqrt.f32 %v753_v22  ;;  %v5421_v53 = vld [vmem:[#allocation28_spill] sm:$0xff] }
 0x193   : > { %3590 = vrsqrt.f32 %v770_v51 }
 0x194   : > { %v771_v55 = vadd.f32 1e-06, %v739_v47  ;;  %v754_v52 = vadd.f32 1e-06, %v722_v61  ;;  %v3583_v41 = vpop.eup %3582  ;;  %v5422_v61 = vld [vmem:[#allocation27_spill] sm:$0xff] }
 0x195   : > { %v686_v13 = vpop.xlane.xlu0 %685  ;;  %v635_v42 = vpop.xlane.xlu1 %634  ;;  %v849_v12 = vmul.f32 %v3583_v41, %v5421_v53  ;;  %v848_v47 = vmul.f32 %v3583_v41, %v5422_v61  ;;  %v3494_v53 = vld [vmem:[#allocation5 + $0x3c] ss:$24 sps:$4 sm:$0xff]  }
 0x196   : > { %v740_v59 = vmul.f32 0.00390625, %v686_v13  ;;  %v723_v36 = vmul.f32 0.00390625, %v635_v42  ;;  %3592 = vrsqrt.f32 %v771_v55 }
 0x197   : > { %3594 = vrsqrt.f32 %v754_v52 }
 0x198   : > { %v755_v58 = vadd.f32 1e-06, %v723_v36  ;;  %v3585_v3 = vpop.eup %3584  ;;  %v772_v7 = vadd.f32 1e-06, %v740_v59  ;;  %v3486_v36 = vld [vmem:[#allocation5 + $0x8] ss:$24 sps:$4 sm:$0xff]  }
 0x199   : > { %v638_v14 = vpop.xlane.xlu0 %637  ;;  %v689_v8 = vpop.xlane.xlu1 %688  ;;  %v851_v22 = vmul.f32 %v3585_v3, %v4337_v6  ;;  %v850_v13 = vmul.f32 %v3585_v3, %v4334_v5 }
 0x19a   : > { %v724_v46 = vmul.f32 0.00390625, %v638_v14  ;;  %v741_v28 = vmul.f32 0.00390625, %v689_v8  ;;  %v3587_v51 = vpop.eup %3586  ;;  %3596 = vrsqrt.f32 %v755_v58  ;;  %v5425_v58 = vld [vmem:[#allocation30_spill] sm:$0xff] }
 0x19b   : > { %v4637_v55 = vpack.c.bf16 %v851_v22, %v849_v12  ;;  %3598 = vrsqrt.f32 %v772_v7  ;;  %v4639_v8 = vpack.c.bf16 %v850_v13, %v848_v47  ;;  %v817_v41 = vmul.f32 %v3587_v51, %v5425_v58  ;;  %v3489_v22 = vld [vmem:[#allocation5 + $0x10] ss:$24 sps:$4 sm:$0xff]  }
 0x19c   : > { %v773_v42 = vadd.f32 1e-06, %v741_v28  ;;  %v3589_v52 = vpop.eup %3588  ;;  %v756_v59 = vadd.f32 1e-06, %v724_v46  ;;  %v5426_v28 = vld [vmem:[#allocation29_spill] sm:$0xff] }
 0x19d   : > { %5423 = vst [vmem:[#allocation28_spill] sm:$0xff] %v4637_v55  ;;  %v692_v31 = vpop.xlane.xlu0 %691  ;;  %v641_v14 = vpop.xlane.xlu1 %640  ;;  %5424 = vst [vmem:[#allocation27_spill] sm:$0xff] %v4639_v8  ;;  %1632 = vmatprep.mubr.bf16.mxu1 %v4637_v55  ;;  %v819_v5 = vmul.f32 %v3589_v52, %v4343_v25  ;;  %v816_v7 = vmul.f32 %v3587_v51, %v5426_v28  ;;  %v818_v46 = vmul.f32 %v3589_v52, %v4340_v34 }
 0x19e   : > { %v742_v16 = vmul.f32 0.00390625, %v692_v31  ;;  %v725_v6 = vmul.f32 0.00390625, %v641_v14  ;;  %v3591_v3 = vpop.eup %3590  ;;  %3600 = vrsqrt.f32 %v773_v42  ;;  %1633 = vmatmul.mubr.bf16.vlgmr.msra.gmra.mrb[0].mxu1 %v4639_v8  ;;  %v3492_v31 = vld [vmem:[#allocation5 + $0x38] ss:$24 sps:$4 sm:$0xff]   ;;  %v3497_v42 = vld [vmem:[#allocation5 + $0x44] ss:$24 sps:$4 sm:$0xff]  }
 0x19f   : > { %1714 = vmatpush1.bf16.msra.mxu1 %v3486_v36  ;;  %v4647_v61 = vpack.c.bf16 %v819_v5, %v817_v41  ;;  %3602 = vrsqrt.f32 %v756_v59  ;;  %v4649_v25 = vpack.c.bf16 %v818_v46, %v816_v7  ;;  %v3500_v8 = vld [vmem:[#allocation5 + $0x6c] ss:$24 sps:$4 sm:$0xff]   ;;  %v853_v51 = vmul.f32 %v3591_v3, %v4357_v63  ;;  %v3495_v41 = vld [vmem:[#allocation5 + $0x40] ss:$24 sps:$4 sm:$0xff]  }
 0x1a0   : > { %v757_v12 = vadd.f32 1e-06, %v725_v6  ;;  %v3593_v47 = vpop.eup %3592  ;;  %v774_v13 = vadd.f32 1e-06, %v742_v16  ;;  %1715 = vmatprep.subr.bf16.mxu1 %v3494_v53  ;;  %v852_v16 = vmul.f32 %v3591_v3, %v4354_v10  ;;  %v3498_v5 = vld [vmem:[#allocation5 + $0x68] ss:$24 sps:$4 sm:$0xff]  }
 0x1a1   : > { %v644_v14 = vpop.xlane.xlu0 %643  ;;  %v695_v58 = vpop.xlane.xlu1 %694  ;;  %1552 = vmatprep.mubr.bf16.mxu0 %v4647_v61  ;;  %v855_v36 = vmul.f32 %v3593_v47, %v4363_v1  ;;  %v854_v59 = vmul.f32 %v3593_v47, %v4360_v45  ;;  %v3506_v10 = vld [vmem:[#allocation5 + $0x9c] ss:$24 sps:$4 sm:$0xff]  }
 0x1a2   : > { %v726_v55 = vmul.f32 0.00390625, %v644_v14  ;;  %v743_v34 = vmul.f32 0.00390625, %v695_v58  ;;  %v3595_v52 = vpop.eup %3594  ;;  %3604 = vrsqrt.f32 %v757_v12  ;;  %1553 = vmatmul.mubr.bf16.vlgmr.msra.gmra.mrb[0].mxu0 %v4649_v25  ;;  %v3503_v12 = vld [vmem:[#allocation5 + $0x74] ss:$24 sps:$4 sm:$0xff]   ;;  %v3501_v58 = vld [vmem:[#allocation5 + $0x70] ss:$24 sps:$4 sm:$0xff]  }
 0x1a3   : > { %1907 = vmatpush1.bf16.msra.mxu0 %v3489_v22  ;;  %1716 = vmatpush1.bf16.msra.mxu1 %v3492_v31  ;;  %v4657_v53 = vpack.c.bf16 %v855_v36, %v853_v51  ;;  %3606 = vrsqrt.f32 %v774_v13  ;;  %v4659_v46 = vpack.c.bf16 %v854_v59, %v852_v16  ;;  %v821_v22 = vmul.f32 %v3595_v52, %v4377_v48  ;;  %v3509_v16 = vld [vmem:[#allocation5 + $0xa4] ss:$24 sps:$4 sm:$0xff]  }
 0x1a4   : > { %v775_v6 = vadd.f32 1e-06, %v743_v34  ;;  %v3597_v28 = vpop.eup %3596  ;;  %v758_v63 = vadd.f32 1e-06, %v726_v55  ;;  %1908 = vmatprep.subr.bf16.mxu0 %v3497_v42  ;;  %1717 = vmatprep.subr.bf16.mxu1 %v3500_v8  ;;  %v820_v55 = vmul.f32 %v3595_v52, %v4374_v15  ;;  %v3504_v42 = vld [vmem:[#allocation5 + $0x98] ss:$24 sps:$4 sm:$0xff]  }
 0x1a5   : > { %v698_v7 = vpop.xlane.xlu0 %697  ;;  %v647_v1 = vpop.xlane.xlu1 %646  ;;  %1642 = vmatprep.mubr.bf16.mxu1 %v4657_v53  ;;  %v823_v31 = vmul.f32 %v3597_v28, %v4383_v19  ;;  %v822_v13 = vmul.f32 %v3597_v28, %v4380_v60  ;;  %v3512_v15 = vld [vmem:[#allocation5 + $0xcc] ss:$24 sps:$4 sm:$0xff]  }
 0x1a6   : > { %v744_v3 = vmul.f32 0.00390625, %v698_v7  ;;  %v727_v45 = vmul.f32 0.00390625, %v647_v1  ;;  %v3599_v47 = vpop.eup %3598  ;;  %3608 = vrsqrt.f32 %v775_v6  ;;  %1643 = vmatmul.mubr.bf16.gmra.mrb[4].mxu1 %v4659_v46  ;;  %v3507_v1 = vld [vmem:[#allocation5 + $0xa0] ss:$24 sps:$4 sm:$0xff]  }
 0x1a7   : > { %1909 = vmatpush1.bf16.msra.mxu0 %v3495_v41  ;;  %1718 = vmatpush1.bf16.msra.mxu1 %v3498_v5  ;;  %v4667_v8 = vpack.c.bf16 %v823_v31, %v821_v22  ;;  %3610 = vrsqrt.f32 %v758_v63  ;;  %v4669_v36 = vpack.c.bf16 %v822_v13, %v820_v55  ;;  %v857_v59 = vmul.f32 %v3599_v47, %v4397_v11  ;;  %v3515_v22 = vld [vmem:[#allocation5 + $0xd4] ss:$24 sps:$4 sm:$0xff]  }
 0x1a8   : > { %v759_v14 = vadd.f32 1e-06, %v727_v45  ;;  %v3601_v34 = vpop.eup %3600  ;;  %v776_v48 = vadd.f32 1e-06, %v744_v3  ;;  %1910 = vmatprep.subr.bf16.mxu0 %v3503_v12  ;;  %1719 = vmatprep.subr.bf16.mxu1 %v3506_v10  ;;  %v856_v5 = vmul.f32 %v3599_v47, %v4394_v21  ;;  %v3510_v12 = vld [vmem:[#allocation5 + $0xc8] ss:$24 sps:$4 sm:$0xff]  }
 0x1a9   : > { %v650_v51 = vpop.xlane.xlu0 %649  ;;  %v701_v19 = vpop.xlane.xlu1 %700  ;;  %1562 = vmatprep.mubr.bf16.mxu0 %v4667_v8  ;;  %v859_v6 = vmul.f32 %v3601_v34, %v4403_v9  ;;  %v858_v28 = vmul.f32 %v3601_v34, %v4400_v2  ;;  %v3518_v21 = vld [vmem:[#allocation5 + $0xfc] ss:$24 sps:$4 sm:$0xff]  }
 0x1aa   : > { %v728_v52 = vmul.f32 0.00390625, %v650_v51  ;;  %v745_v60 = vmul.f32 0.00390625, %v701_v19  ;;  %v3603_v41 = vpop.eup %3602  ;;  %3612 = vrsqrt.f32 %v759_v14  ;;  %1563 = vmatmul.mubr.bf16.gmra.mrb[4].mxu0 %v4669_v36  ;;  %v5427_v14 = vld [vmem:[#allocation31_spill] sm:$0xff]  ;;  %v3513_v51 = vld [vmem:[#allocation5 + $0xd0] ss:$24 sps:$4 sm:$0xff]  }
 0x1ab   : > { %1911 = vmatpush1.bf16.msra.mxu0 %v3501_v58  ;;  %1720 = vmatpush1.bf16.msra.mxu1 %v3504_v42  ;;  %v4677_v7 = vpack.c.bf16 %v859_v6, %v857_v59  ;;  %3614 = vrsqrt.f32 %v776_v48  ;;  %v4679_v45 = vpack.c.bf16 %v858_v28, %v856_v5  ;;  %v825_v47 = vmul.f32 %v3603_v41, %v4417_v18  ;;  %v3516_v19 = vld [vmem:[#allocation5 + $0xf8] ss:$24 sps:$4 sm:$0xff]   ;;  %v3524_v59 = vld [vmem:[#allocation5 + $0x12c] ss:$24 sps:$4 sm:$0xff]  }
 0x1ac   : > { %v777_v63 = vadd.f32 1e-06, %v745_v60  ;;  %v3605_v10 = vpop.eup %3604  ;;  %v760_v11 = vadd.f32 1e-06, %v728_v52  ;;  %1912 = vmatprep.subr.bf16.mxu0 %v3509_v16  ;;  %1721 = vmatprep.subr.bf16.mxu1 %v3512_v15  ;;  %v824_v58 = vmul.f32 %v3603_v41, %v5427_v14  ;;  %v3521_v60 = vld [vmem:[#allocation5 + $0x104] ss:$24 sps:$4 sm:$0xff]  }
 0x1ad   : > { %v704_v3 = vpop.xlane.xlu0 %703  ;;  %v653_v9 = vpop.xlane.xlu1 %652  ;;  %1652 = vmatprep.mubr.bf16.mxu1 %v4677_v7  ;;  %v827_v55 = vmul.f32 %v3605_v10, %v4423_v20  ;;  %v826_v42 = vmul.f32 %v3605_v10, %v4420_v57  ;;  %v3525_v14 = vld [vmem:[#allocation5 + $0x130] ss:$24 sps:$4 sm:$0xff]  }
 0x1ae   : > { %v746_v31 = vmul.f32 0.00390625, %v704_v3  ;;  %v729_v2 = vmul.f32 0.00390625, %v653_v9  ;;  %v3607_v13 = vpop.eup %3606  ;;  %3616 = vrsqrt.f32 %v777_v63  ;;  %1653 = vmatmul.mubr.bf16.gmra.mrb[8].mxu1 %v4679_v45  ;;  %v3519_v63 = vld [vmem:[#allocation5 + $0x100] ss:$24 sps:$4 sm:$0xff]  }
 0x1af   : > { %1913 = vmatpush1.bf16.msra.mxu0 %v3507_v1  ;;  %1722 = vmatpush1.bf16.msra.mxu1 %v3510_v12  ;;  %v4687_v48 = vpack.c.bf16 %v827_v55, %v825_v47  ;;  %3618 = vrsqrt.f32 %v760_v11  ;;  %v4689_v52 = vpack.c.bf16 %v826_v42, %v824_v58  ;;  %v861_v41 = vmul.f32 %v3607_v13, %v4437_v24  ;;  %v3522_v9 = vld [vmem:[#allocation5 + $0x128] ss:$24 sps:$4 sm:$0xff]  }
 0x1b0   : > { %v761_v34 = vadd.f32 1e-06, %v729_v2  ;;  %v3609_v16 = vpop.eup %3608  ;;  %v778_v18 = vadd.f32 1e-06, %v746_v31  ;;  %1914 = vmatprep.subr.bf16.mxu0 %v3515_v22  ;;  %1723 = vmatprep.subr.bf16.mxu1 %v3518_v21  ;;  %v860_v1 = vmul.f32 %v3607_v13, %v4434_v37  ;;  %v3527_v31 = vld [vmem:[#allocation5 + $0x134] ss:$24 sps:$4 sm:$0xff]  }
 0x1b1   : > { %v656_v15 = vpop.xlane.xlu0 %655  ;;  %v707_v20 = vpop.xlane.xlu1 %706  ;;  %1572 = vmatprep.mubr.bf16.mxu0 %v4687_v48  ;;  %v863_v5 = vmul.f32 %v3609_v16, %v4443_v26  ;;  %v862_v12 = vmul.f32 %v3609_v16, %v4440_v54  ;;  %v3530_v2 = vld [vmem:[#allocation5 + $0x15c] ss:$24 sps:$4 sm:$0xff]   ;;  %v3528_v16 = vld [vmem:[#allocation5 + $0x158] ss:$24 sps:$4 sm:$0xff]  }
 0x1b2   : > { %v730_v6 = vmul.f32 0.00390625, %v656_v15  ;;  %v747_v57 = vmul.f32 0.00390625, %v707_v20  ;;  %v3611_v28 = vpop.eup %3610  ;;  %3620 = vrsqrt.f32 %v761_v34  ;;  %1573 = vmatmul.mubr.bf16.gmra.mrb[8].mxu0 %v4689_v52  ;;  %v3533_v20 = vld [vmem:[#allocation5 + $0x164] ss:$24 sps:$4 sm:$0xff]  }
 0x1b3   : > { %1915 = vmatpush1.bf16.msra.mxu0 %v3513_v51  ;;  %1724 = vmatpush1.bf16.msra.mxu1 %v3516_v19  ;;  %v4697_v3 = vpack.c.bf16 %v863_v5, %v861_v41  ;;  %3622 = vrsqrt.f32 %v778_v18  ;;  %v4699_v21 = vpack.c.bf16 %v862_v12, %v860_v1  ;;  %v829_v47 = vmul.f32 %v3611_v28, %v4457_v23  ;;  %v3531_v1 = vld [vmem:[#allocation5 + $0x160] ss:$24 sps:$4 sm:$0xff]  }
 0x1b4   : > { %v762_v10 = vadd.f32 1e-06, %v730_v6  ;;  %v779_v11 = vadd.f32 1e-06, %v747_v57  ;;  %v3613_v22 = vpop.eup %3612  ;;  %1916 = vmatprep.subr.bf16.mxu0 %v3521_v60  ;;  %1725 = vmatprep.subr.bf16.mxu1 %v3524_v59  ;;  %v828_v58 = vmul.f32 %v3611_v28, %v4454_v0  ;;  %v3536_v60 = vld [vmem:[#allocation5 + $0x18c] ss:$24 sps:$4 sm:$0xff]  }
 0x1b5   : > { %v710_v24 = vpop.xlane.xlu0 %709  ;;  %v659_v26 = vpop.xlane.xlu1 %658  ;;  %1662 = vmatprep.mubr.bf16.mxu1 %v4697_v3  ;;  %v831_v55 = vmul.f32 %v3613_v22, %v4463_v33  ;;  %v830_v42 = vmul.f32 %v3613_v22, %v4460_v32  ;;  %v3534_v12 = vld [vmem:[#allocation5 + $0x188] ss:$24 sps:$4 sm:$0xff]   ;;  %v3539_v22 = vld [vmem:[#allocation5 + $0x194] ss:$24 sps:$4 sm:$0xff]  }
 0x1b6   : > { %v748_v37 = vmul.f32 0.00390625, %v710_v24  ;;  %v731_v54 = vmul.f32 0.00390625, %v659_v26  ;;  %v3615_v13 = vpop.eup %3614  ;;  %3624 = vrsqrt.f32 %v779_v11  ;;  %1663 = vmatmul.mubr.bf16.gmra.mrb[12].mxu1 %v4699_v21 }
 0x1b7   : > { %3626 = vrsqrt.f32 %v762_v10  ;;  %1917 = vmatpush1.bf16.msra.mxu0 %v3519_v63  ;;  %1726 = vmatpush1.bf16.msra.mxu1 %v3522_v9  ;;  %v4707_v19 = vpack.c.bf16 %v831_v55, %v829_v47  ;;  %v4709_v15 = vpack.c.bf16 %v830_v42, %v828_v58  ;;  %v865_v59 = vmul.f32 %v3615_v13, %v4477_v30 }
 0x1b8   : > { %v780_v34 = vadd.f32 1e-06, %v748_v37  ;;  %v763_v51 = vadd.f32 1e-06, %v731_v54  ;;  %v3617_v23 = vpop.eup %3616  ;;  %1918 = vmatprep.subr.bf16.mxu0 %v3527_v31  ;;  %1727 = vmatprep.subr.bf16.mxu1 %v3530_v2  ;;  %v864_v41 = vmul.f32 %v3615_v13, %v4474_v4  ;;  %v3542_v4 = vld [vmem:[#allocation5 + $0x1bc] ss:$24 sps:$4 sm:$0xff]  }
 0x1b9   : > { %v662_v18 = vpop.xlane.xlu0 %661  ;;  %v713_v33 = vpop.xlane.xlu1 %712  ;;  %1582 = vmatprep.mubr.bf16.mxu0 %v4707_v19  ;;  %v867_v6 = vmul.f32 %v3617_v23, %v4483_v39  ;;  %v866_v5 = vmul.f32 %v3617_v23, %v4480_v38  ;;  %v3537_v13 = vld [vmem:[#allocation5 + $0x190] ss:$24 sps:$4 sm:$0xff]  }
 0x1ba   : > { %v732_v0 = vmul.f32 0.00390625, %v662_v18  ;;  %v749_v32 = vmul.f32 0.00390625, %v713_v33  ;;  %v3619_v57 = vpop.eup %3618  ;;  %3628 = vrsqrt.f32 %v763_v51  ;;  %1583 = vmatmul.mubr.bf16.gmra.mrb[12].mxu0 %v4709_v15  ;;  %v3545_v51 = vld [vmem:[#allocation5 + $0x1c4] ss:$24 sps:$4 sm:$0xff]  }
 0x1bb   : > { %3630 = vrsqrt.f32 %v780_v34  ;;  %1919 = vmatpush1.bf16.msra.mxu0 %v3525_v14  ;;  %1728 = vmatpush1.bf16.msra.mxu1 %v3528_v16  ;;  %v4717_v63 = vpack.c.bf16 %v867_v6, %v865_v59  ;;  %v4719_v9 = vpack.c.bf16 %v866_v5, %v864_v41  ;;  %v833_v26 = vmul.f32 %v3619_v57, %v4497_v35  ;;  %v3540_v14 = vld [vmem:[#allocation5 + $0x1b8] ss:$24 sps:$4 sm:$0xff]  }
 0x1bc   : > { %v781_v28 = vadd.f32 1e-06, %v749_v32  ;;  %v3621_v10 = vpop.eup %3620  ;;  %v764_v30 = vadd.f32 1e-06, %v732_v0  ;;  %1920 = vmatprep.subr.bf16.mxu0 %v3533_v20  ;;  %1729 = vmatprep.subr.bf16.mxu1 %v3536_v60  ;;  %v832_v37 = vmul.f32 %v3619_v57, %v4494_v27  ;;  %v3548_v27 = vld [vmem:[#allocation5 + $0x1ec] ss:$24 sps:$4 sm:$0xff]  }
 0x1bd   : > { %v716_v11 = vpop.xlane.xlu0 %715  ;;  %v665_v39 = vpop.xlane.xlu1 %664  ;;  %1672 = vmatprep.mubr.bf16.mxu1 %v4717_v63  ;;  %v835_v31 = vmul.f32 %v3621_v10, %v4503_v44  ;;  %v834_v54 = vmul.f32 %v3621_v10, %v4500_v43  ;;  %v3543_v20 = vld [vmem:[#allocation5 + $0x1c0] ss:$24 sps:$4 sm:$0xff]   ;;  %v5428_v5 = vld [vmem:[#allocation33_spill] sm:$0xff] }
 0x1be   : > { %v750_v24 = vmul.f32 0.00390625, %v716_v11  ;;  %v733_v38 = vmul.f32 0.00390625, %v665_v39  ;;  %v3623_v2 = vpop.eup %3622  ;;  %3632 = vrsqrt.f32 %v781_v28  ;;  %1673 = vmatmul.mubr.bf16.gmra.mrb[16].mxu1 %v4719_v9  ;;  %v3546_v57 = vld [vmem:[#allocation5 + $0x1e8] ss:$24 sps:$4 sm:$0xff]   ;;  %v5430_v39 = vld [vmem:[#allocation34_spill] sm:$0xff] }
 0x1bf   : > { %1921 = vmatpush1.bf16.msra.mxu0 %v3531_v1  ;;  %1730 = vmatpush1.bf16.msra.mxu1 %v3534_v12  ;;  %v4727_v55 = vpack.c.bf16 %v835_v31, %v833_v26  ;;  %3634 = vrsqrt.f32 %v764_v30  ;;  %v4729_v34 = vpack.c.bf16 %v834_v54, %v832_v37  ;;  %v869_v18 = vmul.f32 %v3623_v2, %v4517_v40  ;;  %v3551_v1 = vld [vmem:[#allocation5 + $0x1f4] ss:$24 sps:$4 sm:$0xff]   ;;  %v3552_v31 = vld [vmem:[#allocation5 + $0x218] ss:$24 sps:$4 sm:$0xff]  }
 0x1c0   : > { %v765_v47 = vadd.f32 1e-06, %v733_v38  ;;  %v3625_v58 = vpop.eup %3624  ;;  %v782_v35 = vadd.f32 1e-06, %v750_v24  ;;  %1922 = vmatprep.subr.bf16.mxu0 %v3539_v22  ;;  %1731 = vmatprep.subr.bf16.mxu1 %v3542_v4  ;;  %v868_v60 = vmul.f32 %v3623_v2, %v4514_v29  ;;  %v5429_v29 = vld [vmem:[#allocation32_spill] sm:$0xff] }
 0x1c1   : > { %v668_v42 = vpop.xlane.xlu0 %667  ;;  %v719_v44 = vpop.xlane.xlu1 %718  ;;  %1592 = vmatprep.mubr.bf16.mxu0 %v4727_v55  ;;  %v871_v33 = vmul.f32 %v3625_v58, %v4523_v50  ;;  %v870_v0 = vmul.f32 %v3625_v58, %v4520_v49  ;;  %v3554_v49 = vld [vmem:[#allocation5 + $0x21c] ss:$24 sps:$4 sm:$0xff]   ;;  %v3549_v38 = vld [vmem:[#allocation5 + $0x1f0] ss:$24 sps:$4 sm:$0xff]   ;;  %v3560_v54 = vld [vmem:[#allocation5 + $0x24c] ss:$24 sps:$4 sm:$0xff]  }
 0x1c2   : > { %v3627_v16 = vpop.eup %3626  ;;  %v734_v43 = vmul.f32 0.00390625, %v668_v42  ;;  %v751_v23 = vmul.f32 0.00390625, %v719_v44  ;;  %3636 = vrsqrt.f32 %v765_v47  ;;  %1593 = vmatmul.mubr.bf16.gmra.mrb[16].mxu0 %v4729_v34  ;;  %v5432_v58 = vld [vmem:[#allocation15_spill] sm:$0xff] }
 0x1c3   : > { %1923 = vmatpush1.bf16.msra.mxu0 %v3537_v13  ;;  %1732 = vmatpush1.bf16.msra.mxu1 %v3540_v14  ;;  %v4737_v6 = vpack.c.bf16 %v871_v33, %v869_v18  ;;  %3638 = vrsqrt.f32 %v782_v35  ;;  %v4739_v50 = vpack.c.bf16 %v870_v0, %v868_v60  ;;  %v837_v28 = vmul.f32 %v3627_v16, %v5428_v5  ;;  %v5431_v13 = vld [vmem:[#allocation35_spill] sm:$0xff]  ;;  %v5435_v60 = vld [vmem:[#allocation16_spill] sm:$0xff] }
 0x1c4   : > { %v766_v32 = vadd.f32 1e-06, %v734_v43  ;;  %v783_v59 = vadd.f32 1e-06, %v751_v23  ;;  %v3629_v41 = vpop.eup %3628  ;;  %1924 = vmatprep.subr.bf16.mxu0 %v3545_v51  ;;  %1733 = vmatprep.subr.bf16.mxu1 %v3548_v27  ;;  %v836_v12 = vmul.f32 %v3627_v16, %v5429_v29  ;;  %v3555_v51 = vld [vmem:[#allocation5 + $0x220] ss:$24 sps:$4 sm:$0xff]  }
 0x1c5   : > { %v671_v40 = vpop.xlane.xlu1 %670  ;;  %v3631_v10 = vpop.eup %3630  ;;  %1682 = vmatprep.mubr.bf16.mxu1 %v4737_v6  ;;  %v839_v11 = vmul.f32 %v3629_v41, %v4543_v56  ;;  %v838_v22 = vmul.f32 %v3629_v41, %v5430_v39  ;;  %v3557_v56 = vld [vmem:[#allocation5 + $0x224] ss:$24 sps:$4 sm:$0xff]   ;;  %v3558_v27 = vld [vmem:[#allocation5 + $0x248] ss:$24 sps:$4 sm:$0xff]   ;;  %v3563_v43 = vld [vmem:[#allocation5 + $0x254] ss:$24 sps:$4 sm:$0xff]  }
 0x1c6   : > { %3640 = vrsqrt.f32 %v766_v32  ;;  %v735_v30 = vmul.f32 0.00390625, %v671_v40  ;;  %1683 = vmatmul.mubr.bf16.gmra.mrb[20].mxu1 %v4739_v50  ;;  %v873_v37 = vmul.f32 %v3631_v10, %v4557_v17  ;;  %v872_v14 = vmul.f32 %v3631_v10, %v5431_v13  ;;  %v5433_v23 = vld [vmem:[#allocation17_spill] sm:$0xff]  ;;  %v5434_v33 = vld [vmem:[#allocation19_spill] sm:$0xff]  ;;  %v5436_v32 = vld [vmem:[#allocation18_spill] sm:$0xff] }
 0x1c7   : > { %3642 = vrsqrt.f32 %v783_v59  ;;  %1925 = vmatpush1.bf16.msra.mxu0 %v3543_v20  ;;  %1734 = vmatpush1.bf16.msra.mxu1 %v3546_v57  ;;  %v4747_v24 = vpack.c.bf16 %v839_v11, %v837_v28  ;;  %v4749_v26 = vpack.c.bf16 %v838_v22, %v836_v12  ;;  %v3561_v5 = vld [vmem:[#allocation5 + $0x250] ss:$24 sps:$4 sm:$0xff]   ;;  %v3569_v12 = vld [vmem:[#allocation5 + $0x284] ss:$24 sps:$4 sm:$0xff]  }
 0x1c8   : > { %v767_v4 = vadd.f32 1e-06, %v735_v30  ;;  %v3633_v2 = vpop.eup %3632  ;;  %1926 = vmatprep.subr.bf16.mxu0 %v3551_v1  ;;  %1735 = vmatprep.subr.bf16.mxu1 %v3554_v49  ;;  %v3564_v1 = vld [vmem:[#allocation5 + $0x278] ss:$24 sps:$4 sm:$0xff]   ;;  %v3572_v49 = vld [vmem:[#allocation5 + $0x2ac] ss:$24 sps:$4 sm:$0xff]  }
 0x1c9   : > { %1602 = vmatprep.mubr.bf16.mxu0 %v4747_v24  ;;  %v875_v47 = vmul.f32 %v3633_v2, %v4563_v62  ;;  %v874_v35 = vmul.f32 %v3633_v2, %v5432_v58  ;;  %v3635_v42 = vpop.eup %3634  ;;  %v3566_v62 = vld [vmem:[#allocation5 + $0x27c] ss:$24 sps:$4 sm:$0xff]   ;;  %v5439_v22 = vld [vmem:[#allocation20_spill] sm:$0xff] }
 0x1ca   : > { %3644 = vrsqrt.f32 %v767_v4  ;;  %1603 = vmatmul.mubr.bf16.gmra.mrb[20].mxu0 %v4749_v26  ;;  %v841_v18 = vmul.f32 %v3635_v42, %v5433_v23  ;;  %v840_v0 = vmul.f32 %v3635_v42, %v5435_v60  ;;  %v5437_v10 = vld [vmem:[#allocation21_spill] sm:$0xff]  ;;  %v5438_v11 = vld [vmem:[#allocation22_spill] sm:$0xff]  ;;  %v5441_v13 = vld [vmem:[#allocation24_spill] sm:$0xff] }
 0x1cb   : > { %1927 = vmatpush1.bf16.msra.mxu0 %v3549_v38  ;;  %1736 = vmatpush1.bf16.msra.mxu1 %v3552_v31  ;;  %v4757_v44 = vpack.c.bf16 %v875_v47, %v873_v37  ;;  %v4759_v17 = vpack.c.bf16 %v874_v35, %v872_v14  ;;  %v5440_v38 = vld [vmem:[#allocation36_spill] sm:$0xff]  ;;  %v5442_v58 = vld [vmem:[#allocation26_spill] sm:$0xff]  ;;  %v5443_v42 = vld [vmem:[#allocation23_spill] sm:$0xff] }
 0x1cc   : > { %v3637_v16 = vpop.eup %3636  ;;  %1928 = vmatprep.subr.bf16.mxu0 %v3557_v56  ;;  %1737 = vmatprep.subr.bf16.mxu1 %v3560_v54  ;;  %v3567_v56 = vld [vmem:[#allocation5 + $0x280] ss:$24 sps:$4 sm:$0xff]   ;;  %v3581_v60 = vld [vmem:[#allocation5 + $0x2e4] ss:$24 sps:$4 sm:$0xff]  }
 0x1cd   : > { %1692 = vmatprep.mubr.bf16.mxu1 %v4757_v44  ;;  %v843_v20 = vmul.f32 %v3637_v16, %v5434_v33  ;;  %v842_v59 = vmul.f32 %v3637_v16, %v5436_v32  ;;  %v3639_v57 = vpop.eup %3638  ;;  %v3570_v47 = vld [vmem:[#allocation5 + $0x2a8] ss:$24 sps:$4 sm:$0xff]  }
 0x1ce   : > { %1693 = vmatmul.mubr.bf16.gmra.mrb[24].mxu1 %v4759_v17  ;;  %v877_v30 = vmul.f32 %v3639_v57, %v5437_v10  ;;  %v876_v4 = vmul.f32 %v3639_v57, %v5439_v22  ;;  %v3573_v33 = vld [vmem:[#allocation5 + $0x2b0] ss:$24 sps:$4 sm:$0xff]  }
 0x1cf   : > { %1929 = vmatpush1.bf16.msra.mxu0 %v3555_v51  ;;  %1738 = vmatpush1.bf16.msra.mxu1 %v3558_v27  ;;  %v4767_v40 = vpack.c.bf16 %v843_v20, %v841_v18  ;;  %v4769_v28 = vpack.c.bf16 %v842_v59, %v840_v0  ;;  %v5444_v27 = vld [vmem:[#allocation25_spill] sm:$0xff]  ;;  %v3579_v0 = vld [vmem:[#allocation5 + $0x2e0] ss:$24 sps:$4 sm:$0xff]  }
 0x1d0   : > { %v3641_v41 = vpop.eup %3640  ;;  %1930 = vmatprep.subr.bf16.mxu0 %v3563_v43  ;;  %1739 = vmatprep.subr.bf16.mxu1 %v3566_v62  ;;  %v3575_v43 = vld [vmem:[#allocation5 + $0x2b4] ss:$24 sps:$4 sm:$0xff]   ;;  %v3576_v20 = vld [vmem:[#allocation5 + $0x2d8] ss:$24 sps:$4 sm:$0xff]  }
 0x1d1   : > { %v3643_v29 = vpop.eup %3642  ;;  %1612 = vmatprep.mubr.bf16.mxu0 %v4767_v40  ;;  %v845_v14 = vmul.f32 %v3641_v41, %v5441_v13  ;;  %v844_v51 = vmul.f32 %v3641_v41, %v5443_v42  ;;  %v3578_v62 = vld [vmem:[#allocation5 + $0x2dc] ss:$24 sps:$4 sm:$0xff]  }
 0x1d2   : > { %v879_v39 = vmul.f32 %v3643_v29, %v5438_v11  ;;  %v878_v31 = vmul.f32 %v3643_v29, %v5440_v38  ;;  %1613 = vmatmul.mubr.bf16.gmra.mrb[24].mxu0 %v4769_v28 }
 0x1d3   : > { %1931 = vmatpush1.bf16.msra.mxu0 %v3561_v5  ;;  %1740 = vmatpush1.bf16.msra.mxu1 %v3564_v1 }
 0x1d4   : > { %v3645_v2 = vpop.eup %3644  ;;  %v4777_v37 = vpack.c.bf16 %v879_v39, %v877_v30  ;;  %v4779_v54 = vpack.c.bf16 %v878_v31, %v876_v4  ;;  %1932 = vmatprep.subr.bf16.mxu0 %v3569_v12  ;;  %1741 = vmatprep.subr.bf16.mxu1 %v3572_v49 }
 0x1d5   : > { %v847_v35 = vmul.f32 %v3645_v2, %v5442_v58  ;;  %v846_v16 = vmul.f32 %v3645_v2, %v5444_v27 }
 0x1d6   : > { %1702 = vmatprep.mubr.bf16.mxu1 %v4777_v37 }
 0x1d7   : > { %1703 = vmatmul.mubr.bf16.gmra.mrb[28].mxu1 %v4779_v54  ;;  %v895_v23 = vpack.c.bf16 %v847_v35, %v845_v14  ;;  %v894_v18 = vpack.c.bf16 %v846_v16, %v844_v51  ;;  %1933 = vmatpush1.bf16.msra.mxu0 %v3567_v56 }
 0x1d8   : > { %1742 = vmatpush1.bf16.msra.mxu1 %v3570_v47  ;;  %1745 = vmatprep.mubr.bf16.mxu1 %v4647_v61 }
 0x1d9   : > { %1622 = vmatprep.mubr.bf16.mxu0 %v895_v23  ;;  %1934 = vmatprep.subr.bf16.mxu0 %v3575_v43 }
 0x1da   : > { %1743 = vmatprep.subr.bf16.mxu1 %v3578_v62  ;;  %1623 = vmatmul.mubr.bf16.gmra.mrb[28].mxu0 %v894_v18 }
 0x1db   : > { %1935 = vmatpush1.bf16.msra.mxu0 %v3573_v33  ;;  %1938 = vmatprep.mubr.bf16.mxu0 %v4647_v61  ;;  %v5445_v61 = vld [vmem:[#allocation28_spill] sm:$0xff] }
 0x1dc   : > { %1744 = vmatpush1.bf16.msra.mxu1 %v3576_v20  ;;  %1936 = vmatprep.subr.bf16.mxu0 %v3581_v60 }
 0x1df   : > { %1746 = vmatmul.mubr.bf16.vlgmr.msra.gmra.mrb[32].mxu1 %v4649_v25  ;;  %1937 = vmatpush1.bf16.msra.mxu0 %v3579_v0 }
 0x1e0   : > { %1755 = vmatprep.mubr.bf16.mxu1 %v4667_v8 }
 0x1e2   : > { %1939 = vmatmul.mubr.bf16.vlgmr.msra.gmra.mrb[32].mxu0 %v4649_v25  ;;  %v5446_v25 = vld [vmem:[#allocation27_spill] sm:$0xff] }
 0x1e3   : > { %1948 = vmatprep.mubr.bf16.mxu0 %v4667_v8 }
 0x1e7   : > { %1756 = vmatmul.mubr.bf16.gmra.mrb[36].mxu1 %v4669_v36 }
 0x1e8   : > { %1765 = vmatprep.mubr.bf16.mxu1 %v4687_v48 }
 0x1ea   : > { %1949 = vmatmul.mubr.bf16.gmra.mrb[36].mxu0 %v4669_v36  ;;  %v4853_v36 = vld [vmem:[%s5317_s2] sm:$0x3f] }
 0x1eb   : > { %1958 = vmatprep.mubr.bf16.mxu0 %v4687_v48 }
 0x1ef   : > { %1766 = vmatmul.mubr.bf16.gmra.mrb[40].mxu1 %v4689_v52 }
 0x1f0   : > { %1775 = vmatprep.mubr.bf16.mxu1 %v4707_v19 }
 0x1f2   : > { %1959 = vmatmul.mubr.bf16.gmra.mrb[40].mxu0 %v4689_v52 }
 0x1f3   : > { %1968 = vmatprep.mubr.bf16.mxu0 %v4707_v19 }
 0x1f7   : > { %1776 = vmatmul.mubr.bf16.gmra.mrb[44].mxu1 %v4709_v15 }
 0x1f8   : > { %1785 = vmatprep.mubr.bf16.mxu1 %v4727_v55 }
 0x1fa   : > { %1969 = vmatmul.mubr.bf16.gmra.mrb[44].mxu0 %v4709_v15 }
 0x1fb   : > { %1978 = vmatprep.mubr.bf16.mxu0 %v4727_v55 }
 0x1ff   : > { %1786 = vmatmul.mubr.bf16.gmra.mrb[48].mxu1 %v4729_v34 }
 0x200   : > { %1795 = vmatprep.mubr.bf16.mxu1 %v4747_v24 }
 0x202   : > { %1979 = vmatmul.mubr.bf16.gmra.mrb[48].mxu0 %v4729_v34 }
 0x203   : > { %1988 = vmatprep.mubr.bf16.mxu0 %v4747_v24 }
 0x207   : > { %1796 = vmatmul.mubr.bf16.gmra.mrb[52].mxu1 %v4749_v26 }
 0x208   : > { %1805 = vmatprep.mubr.bf16.mxu1 %v4767_v40 }
 0x20a   : > { %1989 = vmatmul.mubr.bf16.gmra.mrb[52].mxu0 %v4749_v26 }
 0x20b   : > { %1998 = vmatprep.mubr.bf16.mxu0 %v4767_v40 }
 0x20f   : > { %1806 = vmatmul.mubr.bf16.gmra.mrb[56].mxu1 %v4769_v28 }
 0x210   : > { %1815 = vmatprep.mubr.bf16.mxu1 %v895_v23 }
 0x212   : > { %1999 = vmatmul.mubr.bf16.gmra.mrb[56].mxu0 %v4769_v28 }
 0x213   : > { %2008 = vmatprep.mubr.bf16.mxu0 %v895_v23 }
 0x217   : > { %1816 = vmatmul.mubr.bf16.gmra.mrb[60].mxu1 %v894_v18 }
 0x218   : > { %1825 = vmatprep.mubr.bf16.mxu1 %v5445_v61 }
 0x21a   : > { %2009 = vmatmul.mubr.bf16.gmra.mrb[60].mxu0 %v894_v18 }
 0x21b   : > { %2018 = vmatprep.mubr.bf16.mxu0 %v5445_v61 }
 0x21f   : > { %1826 = vmatmul.mubr.bf16.gmra.mrb[64].mxu1 %v5446_v25 }
 0x220   : > { %1835 = vmatprep.mubr.bf16.mxu1 %v4657_v53 }
 0x222   : > { %2019 = vmatmul.mubr.bf16.gmra.mrb[64].mxu0 %v5446_v25 }
 0x223   : > { %2028 = vmatprep.mubr.bf16.mxu0 %v4657_v53  ;;  %v1010_v53 = vlaneseq }
 0x227   : > { %1836 = vmatmul.mubr.bf16.gmra.mrb[68].mxu1 %v4659_v46 }
 0x228   : > { %1845 = vmatprep.mubr.bf16.mxu1 %v4677_v7 }
 0x22a   : > { %2029 = vmatmul.mubr.bf16.gmra.mrb[68].mxu0 %v4659_v46  ;;  %v4847_v46 = vshrl.u32 %v1010_v53, 7 }
 0x22b   : > { %2038 = vmatprep.mubr.bf16.mxu0 %v4677_v7 }
 0x22c   : > { %v1012_v8 = vsub.s32 0, %v4847_v46  ;;  %v1016_v7 = vsub.s32 1, %v4847_v46 }
 0x22e   : > { %v4860_v48 = vrot.slane %v4853_v36, %v1016_v7 }
 0x22f   : > { %1846 = vmatmul.mubr.bf16.gmra.mrb[72].mxu1 %v4679_v45 }
 0x230   : > { %1855 = vmatprep.mubr.bf16.mxu1 %v4697_v3 }
 0x232   : > { %2039 = vmatmul.mubr.bf16.gmra.mrb[72].mxu0 %v4679_v45  ;;  %v4857_v45 = vrot.slane %v4853_v36, %v1012_v8 }
 0x233   : > { %2048 = vmatprep.mubr.bf16.mxu0 %v4697_v3 }
 0x237   : > { %1856 = vmatmul.mubr.bf16.gmra.mrb[76].mxu1 %v4699_v21 }
 0x238   : > { %1865 = vmatprep.mubr.bf16.mxu1 %v4717_v63 }
 0x23a   : > { %2049 = vmatmul.mubr.bf16.gmra.mrb[76].mxu0 %v4699_v21 }
 0x23b   : > { %2058 = vmatprep.mubr.bf16.mxu0 %v4717_v63 }
 0x23f   : > { %1866 = vmatmul.mubr.bf16.gmra.mrb[80].mxu1 %v4719_v9 }
 0x240   : > { %1875 = vmatprep.mubr.bf16.mxu1 %v4737_v6 }
 0x242   : > { %2059 = vmatmul.mubr.bf16.gmra.mrb[80].mxu0 %v4719_v9 }
 0x243   : > { %2068 = vmatprep.mubr.bf16.mxu0 %v4737_v6 }
 0x247   : > { %1876 = vmatmul.mubr.bf16.gmra.mrb[84].mxu1 %v4739_v50 }
 0x248   : > { %1885 = vmatprep.mubr.bf16.mxu1 %v4757_v44 }
 0x24a   : > { %2069 = vmatmul.mubr.bf16.gmra.mrb[84].mxu0 %v4739_v50 }
 0x24b   : > { %2078 = vmatprep.mubr.bf16.mxu0 %v4757_v44 }
 0x24f   : > { %1886 = vmatmul.mubr.bf16.gmra.mrb[88].mxu1 %v4759_v17 }
 0x250   : > { %1895 = vmatprep.mubr.bf16.mxu1 %v4777_v37 }
 0x252   : > { %2079 = vmatmul.mubr.bf16.gmra.mrb[88].mxu0 %v4759_v17 }
 0x253   : > { %2088 = vmatprep.mubr.bf16.mxu0 %v4777_v37 }
 0x257   : > { %1896 = vmatmul.mubr.bf16.gmra.mrb[92].mxu1 %v4779_v54 }
 0x25a   : > { %2089 = vmatmul.mubr.bf16.gmra.mrb[92].mxu0 %v4779_v54 }
 0x271   : > { %v1634_v52 = vpop.f32.mrb[0].mxu1 }
 0x272   : > { %v1635_v3 = vadd.f32 %v1634_v52, %v4857_v45  ;;  %v1636_v21 = vpop.f32.mrb[1].mxu1 }
 0x273   : > { %v1637_v19 = vadd.f32 %v1636_v21, %v4860_v48  ;;  %v1638_v15 = vpop.f32.mrb[2].mxu1 }
 0x274   : > { %v1639_v63 = vadd.f32 %v1638_v15, %v4857_v45  ;;  %v1640_v9 = vpop.f32.mrb[3].mxu1 }
 0x275   : > { %v3234_v55 = vpack.c.bf16 %v1637_v19, %v1635_v3  ;;  %v1641_v34 = vadd.f32 %v1640_v9, %v4860_v48  ;;  %v1554_v6 = vpop.f32.mrb[0].mxu0 }
 0x276   : > { %v1555_v50 = vadd.f32 %v1554_v6, %v4857_v45  ;;  %v1556_v24 = vpop.f32.mrb[1].mxu0 }
 0x277   : > { %2307 = vst [vmem:[%s4871_s8 + $0x80] sm:$0xff] %v3234_v55  ;;  %v3235_v26 = vpack.c.bf16 %v1641_v34, %v1639_v63  ;;  %v1557_v44 = vadd.f32 %v1556_v24, %v4860_v48  ;;  %v1558_v17 = vpop.f32.mrb[2].mxu0 }
 0x278   : > { %v1559_v32 = vadd.f32 %v1558_v17, %v4857_v45  ;;  %v1560_v59 = vpop.f32.mrb[3].mxu0 }
 0x279   : > { %2308 = vst [vmem:[%s4871_s8 + $0x88] sm:$0xff] %v3235_v26  ;;  %v3218_v57 = vpack.c.bf16 %v1557_v44, %v1555_v50  ;;  %v1561_v41 = vadd.f32 %v1560_v59, %v4860_v48  ;;  %v1644_v40 = vpop.f32.mrb[4].mxu1 }
 0x27a   : > { %v1645_v5 = vadd.f32 %v1644_v40, %v4857_v45  ;;  %v1646_v28 = vpop.f32.mrb[5].mxu1 }
 0x27b   : > { %2291 = vst [vmem:[%s4871_s8] sm:$0xff] %v3218_v57  ;;  %v3219_v1 = vpack.c.bf16 %v1561_v41, %v1559_v32  ;;  %v1647_v29 = vadd.f32 %v1646_v28, %v4860_v48  ;;  %v1648_v12 = vpop.f32.mrb[6].mxu1 }
 0x27c   : > { %v1649_v49 = vadd.f32 %v1648_v12, %v4857_v45  ;;  %v1650_v10 = vpop.f32.mrb[7].mxu1 }
 0x27d   : > { %2292 = vst [vmem:[%s4871_s8 + $0x8] sm:$0xff] %v3219_v1  ;;  %v3236_v30 = vpack.c.bf16 %v1647_v29, %v1645_v5  ;;  %v1651_v11 = vadd.f32 %v1650_v10, %v4860_v48  ;;  %v1564_v39 = vpop.f32.mrb[4].mxu0 }
 0x27e   : > { %v1565_v22 = vadd.f32 %v1564_v39, %v4857_v45  ;;  %v1566_v4 = vpop.f32.mrb[5].mxu0 }
 0x27f   : > { %2309 = vst [vmem:[%s4871_s8 + $0x90] sm:$0xff] %v3236_v30  ;;  %v3237_v38 = vpack.c.bf16 %v1651_v11, %v1649_v49  ;;  %v1567_v31 = vadd.f32 %v1566_v4, %v4860_v48  ;;  %v1568_v2 = vpop.f32.mrb[6].mxu0 }
 0x280   : > { %v1569_v37 = vadd.f32 %v1568_v2, %v4857_v45  ;;  %v1570_v56 = vpop.f32.mrb[7].mxu0 }
 0x281   : > { %2310 = vst [vmem:[%s4871_s8 + $0x98] sm:$0xff] %v3237_v38  ;;  %v3220_v54 = vpack.c.bf16 %v1567_v31, %v1565_v22  ;;  %v1571_v47 = vadd.f32 %v1570_v56, %v4860_v48  ;;  %v1654_v13 = vpop.f32.mrb[8].mxu1 }
 0x282   : > { %v1655_v14 = vadd.f32 %v1654_v13, %v4857_v45  ;;  %v1656_v58 = vpop.f32.mrb[9].mxu1 }
 0x283   : > { %2293 = vst [vmem:[%s4871_s8 + $0x10] sm:$0xff] %v3220_v54  ;;  %v3221_v35 = vpack.c.bf16 %v1571_v47, %v1569_v37  ;;  %v1657_v42 = vadd.f32 %v1656_v58, %v4860_v48  ;;  %v1658_v51 = vpop.f32.mrb[10].mxu1 }
 0x284   : > { %v1659_v27 = vadd.f32 %v1658_v51, %v4857_v45  ;;  %v1660_v16 = vpop.f32.mrb[11].mxu1 }
 0x285   : > { %2294 = vst [vmem:[%s4871_s8 + $0x18] sm:$0xff] %v3221_v35  ;;  %v3238_v43 = vpack.c.bf16 %v1657_v42, %v1655_v14  ;;  %v1661_v62 = vadd.f32 %v1660_v16, %v4860_v48  ;;  %v1574_v23 = vpop.f32.mrb[8].mxu0 }
 0x286   : > { %v1575_v18 = vadd.f32 %v1574_v23, %v4857_v45  ;;  %v1576_v33 = vpop.f32.mrb[9].mxu0 }
 0x287   : > { %2311 = vst [vmem:[%s4871_s8 + $0xa0] sm:$0xff] %v3238_v43  ;;  %v3239_v20 = vpack.c.bf16 %v1661_v62, %v1659_v27  ;;  %v1577_v60 = vadd.f32 %v1576_v33, %v4860_v48  ;;  %v1578_v0 = vpop.f32.mrb[10].mxu0 }
 0x288   : > { %v1579_v61 = vadd.f32 %v1578_v0, %v4857_v45  ;;  %v1580_v25 = vpop.f32.mrb[11].mxu0 }
 0x289   : > { %2312 = vst [vmem:[%s4871_s8 + $0xa8] sm:$0xff] %v3239_v20  ;;  %v3222_v53 = vpack.c.bf16 %v1577_v60, %v1575_v18  ;;  %v1581_v8 = vadd.f32 %v1580_v25, %v4860_v48  ;;  %v1664_v7 = vpop.f32.mrb[12].mxu1 }
 0x28a   : > { %v1665_v52 = vadd.f32 %v1664_v7, %v4857_v45  ;;  %v1666_v3 = vpop.f32.mrb[13].mxu1 }
 0x28b   : > { %2295 = vst [vmem:[%s4871_s8 + $0x20] sm:$0xff] %v3222_v53  ;;  %v3223_v21 = vpack.c.bf16 %v1581_v8, %v1579_v61  ;;  %v1667_v19 = vadd.f32 %v1666_v3, %v4860_v48  ;;  %v1668_v15 = vpop.f32.mrb[14].mxu1 }
 0x28c   : > { %v1669_v63 = vadd.f32 %v1668_v15, %v4857_v45  ;;  %v1670_v9 = vpop.f32.mrb[15].mxu1 }
 0x28d   : > { %2296 = vst [vmem:[%s4871_s8 + $0x28] sm:$0xff] %v3223_v21  ;;  %v3240_v55 = vpack.c.bf16 %v1667_v19, %v1665_v52  ;;  %v1671_v34 = vadd.f32 %v1670_v9, %v4860_v48  ;;  %v1584_v6 = vpop.f32.mrb[12].mxu0 }
 0x28e   : > { %v1585_v50 = vadd.f32 %v1584_v6, %v4857_v45  ;;  %v1586_v24 = vpop.f32.mrb[13].mxu0 }
 0x28f   : > { %2313 = vst [vmem:[%s4871_s8 + $0xb0] sm:$0xff] %v3240_v55  ;;  %v3241_v26 = vpack.c.bf16 %v1671_v34, %v1669_v63  ;;  %v1587_v44 = vadd.f32 %v1586_v24, %v4860_v48  ;;  %v1588_v17 = vpop.f32.mrb[14].mxu0 }
 0x290   : > { %v1589_v32 = vadd.f32 %v1588_v17, %v4857_v45  ;;  %v1590_v59 = vpop.f32.mrb[15].mxu0 }
 0x291   : > { %2314 = vst [vmem:[%s4871_s8 + $0xb8] sm:$0xff] %v3241_v26  ;;  %v3224_v57 = vpack.c.bf16 %v1587_v44, %v1585_v50  ;;  %v1591_v41 = vadd.f32 %v1590_v59, %v4860_v48  ;;  %v1674_v40 = vpop.f32.mrb[16].mxu1 }
 0x292   : > { %v1675_v5 = vadd.f32 %v1674_v40, %v4857_v45  ;;  %v1676_v28 = vpop.f32.mrb[17].mxu1 }
 0x293   : > { %2297 = vst [vmem:[%s4871_s8 + $0x30] sm:$0xff] %v3224_v57  ;;  %v3225_v1 = vpack.c.bf16 %v1591_v41, %v1589_v32  ;;  %v1677_v29 = vadd.f32 %v1676_v28, %v4860_v48  ;;  %v1678_v12 = vpop.f32.mrb[18].mxu1 }
 0x294   : > { %v1679_v49 = vadd.f32 %v1678_v12, %v4857_v45  ;;  %v1680_v10 = vpop.f32.mrb[19].mxu1 }
 0x295   : > { %2298 = vst [vmem:[%s4871_s8 + $0x38] sm:$0xff] %v3225_v1  ;;  %v3242_v30 = vpack.c.bf16 %v1677_v29, %v1675_v5  ;;  %v1681_v11 = vadd.f32 %v1680_v10, %v4860_v48  ;;  %v1594_v39 = vpop.f32.mrb[16].mxu0  ;;  %v1020_v1 = vsub.s32 2, %v4847_v46  ;;  %v1024_v10 = vsub.s32 3, %v4847_v46 }
 0x296   : > { %v1595_v22 = vadd.f32 %v1594_v39, %v4857_v45  ;;  %v1596_v4 = vpop.f32.mrb[17].mxu0 }
 0x297   : > { %2315 = vst [vmem:[%s4871_s8 + $0xc0] sm:$0xff] %v3242_v30  ;;  %v3243_v38 = vpack.c.bf16 %v1681_v11, %v1679_v49  ;;  %v1597_v31 = vadd.f32 %v1596_v4, %v4860_v48  ;;  %v1598_v2 = vpop.f32.mrb[18].mxu0 }
 0x298   : > { %v1599_v37 = vadd.f32 %v1598_v2, %v4857_v45  ;;  %v1600_v56 = vpop.f32.mrb[19].mxu0  ;;  %v4960_v2 = vrot.slane %v4853_v36, %v1020_v1 }
 0x299   : > { %2316 = vst [vmem:[%s4871_s8 + $0xc8] sm:$0xff] %v3243_v38  ;;  %v3226_v54 = vpack.c.bf16 %v1597_v31, %v1595_v22  ;;  %v1601_v47 = vadd.f32 %v1600_v56, %v4860_v48  ;;  %v1684_v13 = vpop.f32.mrb[20].mxu1 }
 0x29a   : > { %v1685_v14 = vadd.f32 %v1684_v13, %v4857_v45  ;;  %v1686_v58 = vpop.f32.mrb[21].mxu1  ;;  %v4966_v13 = vrot.slane %v4853_v36, %v1024_v10 }
 0x29b   : > { %2299 = vst [vmem:[%s4871_s8 + $0x40] sm:$0xff] %v3226_v54  ;;  %v3227_v35 = vpack.c.bf16 %v1601_v47, %v1599_v37  ;;  %v1687_v42 = vadd.f32 %v1686_v58, %v4860_v48  ;;  %v1688_v51 = vpop.f32.mrb[22].mxu1  ;;  %v1028_v37 = vsub.s32 4, %v4847_v46 }
 0x29c   : > { %v1689_v27 = vadd.f32 %v1688_v51, %v4857_v45  ;;  %v1690_v16 = vpop.f32.mrb[23].mxu1 }
 0x29d   : > { %2300 = vst [vmem:[%s4871_s8 + $0x48] sm:$0xff] %v3227_v35  ;;  %v3244_v43 = vpack.c.bf16 %v1687_v42, %v1685_v14  ;;  %v1691_v62 = vadd.f32 %v1690_v16, %v4860_v48  ;;  %v1604_v23 = vpop.f32.mrb[20].mxu0  ;;  %v1032_v14 = vsub.s32 5, %v4847_v46 }
 0x29e   : > { %v1605_v18 = vadd.f32 %v1604_v23, %v4857_v45  ;;  %v1606_v33 = vpop.f32.mrb[21].mxu0 }
 0x29f   : > { %2317 = vst [vmem:[%s4871_s8 + $0xd0] sm:$0xff] %v3244_v43  ;;  %v3245_v20 = vpack.c.bf16 %v1691_v62, %v1689_v27  ;;  %v1607_v60 = vadd.f32 %v1606_v33, %v4860_v48  ;;  %v1608_v0 = vpop.f32.mrb[22].mxu0  ;;  %v4974_v62 = vrot.slane %v4853_v36, %v1028_v37 }
 0x2a0   : > { %v1609_v61 = vadd.f32 %v1608_v0, %v4857_v45  ;;  %v1610_v25 = vpop.f32.mrb[23].mxu0 }
 0x2a1   : > { %2318 = vst [vmem:[%s4871_s8 + $0xd8] sm:$0xff] %v3245_v20  ;;  %v3228_v53 = vpack.c.bf16 %v1607_v60, %v1605_v18  ;;  %v1611_v8 = vadd.f32 %v1610_v25, %v4860_v48  ;;  %v1694_v7 = vpop.f32.mrb[24].mxu1  ;;  %v4979_v18 = vrot.slane %v4853_v36, %v1032_v14 }
 0x2a2   : > { %v1695_v52 = vadd.f32 %v1694_v7, %v4857_v45  ;;  %v1696_v3 = vpop.f32.mrb[25].mxu1 }
 0x2a3   : > { %2301 = vst [vmem:[%s4871_s8 + $0x50] sm:$0xff] %v3228_v53  ;;  %v3229_v21 = vpack.c.bf16 %v1611_v8, %v1609_v61  ;;  %v1697_v19 = vadd.f32 %v1696_v3, %v4860_v48  ;;  %v1698_v15 = vpop.f32.mrb[26].mxu1 }
 0x2a4   : > { %v1699_v63 = vadd.f32 %v1698_v15, %v4857_v45  ;;  %v1700_v9 = vpop.f32.mrb[27].mxu1 }
 0x2a5   : > { %2302 = vst [vmem:[%s4871_s8 + $0x58] sm:$0xff] %v3229_v21  ;;  %v3246_v55 = vpack.c.bf16 %v1697_v19, %v1695_v52  ;;  %v1701_v34 = vadd.f32 %v1700_v9, %v4860_v48  ;;  %v1614_v6 = vpop.f32.mrb[24].mxu0 }
 0x2a6   : > { %v1615_v50 = vadd.f32 %v1614_v6, %v4857_v45  ;;  %v1616_v24 = vpop.f32.mrb[25].mxu0 }
 0x2a7   : > { %2319 = vst [vmem:[%s4871_s8 + $0xe0] sm:$0xff] %v3246_v55  ;;  %v3247_v26 = vpack.c.bf16 %v1701_v34, %v1699_v63  ;;  %v1617_v44 = vadd.f32 %v1616_v24, %v4860_v48  ;;  %v1618_v17 = vpop.f32.mrb[26].mxu0 }
 0x2a8   : > { %v1619_v32 = vadd.f32 %v1618_v17, %v4857_v45  ;;  %v1620_v59 = vpop.f32.mrb[27].mxu0 }
 0x2a9   : > { %2320 = vst [vmem:[%s4871_s8 + $0xe8] sm:$0xff] %v3247_v26  ;;  %v3230_v57 = vpack.c.bf16 %v1617_v44, %v1615_v50  ;;  %v1621_v41 = vadd.f32 %v1620_v59, %v4860_v48 }
 0x2aa   : > { %v1704_v40 = vpop.f32.mrb[28].mxu1 }
 0x2ab   : > { %v1705_v5 = vadd.f32 %v1704_v40, %v4857_v45  ;;  %v1706_v28 = vpop.f32.mrb[29].mxu1  ;;  %2303 = vst [vmem:[%s4871_s8 + $0x60] sm:$0xff] %v3230_v57  ;;  %v3231_v29 = vpack.c.bf16 %v1621_v41, %v1619_v32 }
 0x2ac   : > { %v1707_v12 = vadd.f32 %v1706_v28, %v4860_v48  ;;  %v1708_v49 = vpop.f32.mrb[30].mxu1 }
 0x2ad   : > { %v1709_v30 = vadd.f32 %v1708_v49, %v4857_v45  ;;  %v1710_v11 = vpop.f32.mrb[31].mxu1  ;;  %2304 = vst [vmem:[%s4871_s8 + $0x68] sm:$0xff] %v3231_v29  ;;  %v1624_v4 = vpop.f32.mrb[28].mxu0 }
 0x2ae   : > { %v3248_v39 = vpack.c.bf16 %v1707_v12, %v1705_v5  ;;  %v1711_v22 = vadd.f32 %v1710_v11, %v4860_v48  ;;  %v1625_v38 = vadd.f32 %v1624_v4, %v4857_v45  ;;  %v1626_v31 = vpop.f32.mrb[29].mxu0 }
 0x2af   : > { %v1627_v54 = vadd.f32 %v1626_v31, %v4860_v48  ;;  %v1628_v47 = vpop.f32.mrb[30].mxu0 }
 0x2b0   : > { %2321 = vst [vmem:[%s4871_s8 + $0xf0] sm:$0xff] %v3248_v39  ;;  %v3249_v56 = vpack.c.bf16 %v1711_v22, %v1709_v30  ;;  %v1629_v58 = vadd.f32 %v1628_v47, %v4857_v45  ;;  %v1630_v35 = vpop.f32.mrb[31].mxu0 }
 0x2b1   : > { %v3232_v42 = vpack.c.bf16 %v1627_v54, %v1625_v38  ;;  %v1631_v51 = vadd.f32 %v1630_v35, %v4860_v48 }
 0x2b2   : > { %2322 = vst [vmem:[%s4871_s8 + $0xf8] sm:$0xff] %v3249_v56  ;;  %v1747_v27 = vpop.f32.mrb[32].mxu1 }
 0x2b3   : > { %v1748_v16 = vadd.f32 %v1747_v27, %v4960_v2  ;;  %v1749_v43 = vpop.f32.mrb[33].mxu1  ;;  %2305 = vst [vmem:[%s4871_s8 + $0x70] sm:$0xff] %v3232_v42  ;;  %v3233_v23 = vpack.c.bf16 %v1631_v51, %v1629_v58 }
 0x2b4   : > { %v1750_v46 = vadd.f32 %v1749_v43, %v4966_v13  ;;  %v1751_v45 = vpop.f32.mrb[34].mxu1 }
 0x2b5   : > { %v1752_v33 = vadd.f32 %v1751_v45, %v4960_v2  ;;  %v1753_v48 = vpop.f32.mrb[35].mxu1  ;;  %2306 = vst [vmem:[%s4871_s8 + $0x78] sm:$0xff] %v3233_v23  ;;  %v1940_v0 = vpop.f32.mrb[32].mxu0  ;;  %s3710_s8 = scalar_lea.vmem %s3709_s28, 8192 }
 0x2b6   : > { %v3250_v20 = vpack.c.bf16 %v1750_v46, %v1748_v16  ;;  %v1754_v60 = vadd.f32 %v1753_v48, %v4966_v13  ;;  %v1941_v61 = vadd.f32 %v1940_v0, %v4974_v62  ;;  %v1942_v25 = vpop.f32.mrb[33].mxu0  ;;  %p3712_p0 = scmp.lt.s32.totalorder %s3710_s8, %s3704_s14 }
 0x2b7   : > { %v1943_v53 = vadd.f32 %v1942_v25, %v4979_v18  ;;  %v1944_v8 = vpop.f32.mrb[34].mxu0 }
 0x2b8   : > { %2515 = vst [vmem:[%s4989_s9] sm:$0xff] %v3250_v20  ;;  %v3251_v36 = vpack.c.bf16 %v1754_v60, %v1752_v33  ;;  %v1945_v7 = vadd.f32 %v1944_v8, %v4974_v62  ;;  %v1946_v52 = vpop.f32.mrb[35].mxu0  ;;  %p3713_p5 = por %p3712_p0, %p3711_p11 }
 0x2b9   : > { %v3282_v3 = vpack.c.bf16 %v1943_v53, %v1941_v61  ;;  %v1947_v21 = vadd.f32 %v1946_v52, %v4979_v18 }
 0x2ba   : > { %2516 = vst [vmem:[%s4989_s9 + $0x8] sm:$0xff] %v3251_v36  ;;  %v1757_v19 = vpop.f32.mrb[36].mxu1  ;;  %p3714_p9 = pnand %p3713_p5, %p3707_p12 }
 0x2bb   : > { %v1758_v15 = vadd.f32 %v1757_v19, %v4960_v2  ;;  %v1759_v63 = vpop.f32.mrb[37].mxu1  ;;  %2739 = vst [vmem:[%s5007_s30] sm:$0xff] %v3282_v3  ;;  %v3283_v9 = vpack.c.bf16 %v1947_v21, %v1945_v7 }
 0x2bc   : > { %v1760_v55 = vadd.f32 %v1759_v63, %v4966_v13  ;;  %v1761_v34 = vpop.f32.mrb[38].mxu1 }
 0x2bd   : > { %3717 = shalt.err (!%p3714_p9)
}
 0x2be   : > { %s3718_s17 = scalar_lea.hbm %s5000_s15, 4096  ;;  %s3722_s26 = scalar_lea.hbm %s5318_s3, 8192 }
 0x2bf   : > { %p3719_p1 = scmp.ne.s32.totalorder %s5000_s15, %s3718_s17  ;;  %p3723_p7 = scmp.lt.u32.totalorder %s5000_s15, %s5318_s3 }
 0x2c0   : > { %p3724_p13 = scmp.lt.u32.totalorder %s3722_s26, %s3718_s17  ;;  %p3726_p6 = scmp.lt.u32.totalorder %s3718_s17, %s5000_s15 }
 0x2c1   : > { %p3720_p2 = pnand %p3719_p1, %p3987_p10 }
 0x2c2   : > { %p3725_p4 = por %p3724_p13, %p3723_p7 }
 0x2c3   : > { %p3721_p3 = pneg %p3720_p2 }
 0x2c4   : > { %p3727_p8 = por %p3726_p6, %p3725_p4 }
 0x2c6   : > { %p3728_p12 = pnand %p3727_p8, %p3721_p3 }
 0x2c8   : > { %3731 = shalt.err (!%p3728_p12)
}
 0x2c9   : > { %s3859_s14 = smov 128   ;;  %s3860_s8 = smov 8   ;;  %v1762_v6 = vadd.f32 %v1761_v34, %v4960_v2  ;;  %v1763_v50 = vpop.f32.mrb[39].mxu1  ;;  %2740 = vst [vmem:[%s5007_s30 + $0x8] sm:$0xff] %v3283_v9  ;;  %v3252_v24 = vpack.c.bf16 %v1760_v55, %v1758_v15  ;;  %v1950_v44 = vpop.f32.mrb[36].mxu0 }
 0x2ca   : > { %3355 = dma.vmem_to_hbm [thread:$0]  (%p3987_p10), %s5004_s10, 4096, %s5000_s15, %s2772_s12, %s3859_s14, %s3859_s14, %s3860_s8   ;;  %v1764_v26 = vadd.f32 %v1763_v50, %v4966_v13  ;;  %v1951_v17 = vadd.f32 %v1950_v44, %v4974_v62  ;;  %v1952_v32 = vpop.f32.mrb[37].mxu0  ;;  %v1767_v29 = vpop.f32.mrb[40].mxu1 }
 0x2cb   : > { %2517 = vst [vmem:[%s4989_s9 + $0x10] sm:$0xff] %v3252_v24  ;;  %v1953_v57 = vadd.f32 %v1952_v32, %v4979_v18  ;;  %v1954_v41 = vpop.f32.mrb[38].mxu0  ;;  %v1768_v12 = vadd.f32 %v1767_v29, %v4960_v2  ;;  %v1769_v49 = vpop.f32.mrb[41].mxu1  ;;  %s2776_s25 = sand.u32 1, %s3924_s24   ;;  %s2817_s29 = sshll.u32 %s4989_s9, 4  ;;  %s5220_s29 = int_to_ptr.vmem [resolvable:$true] %s2817_s29 }
 0x2cc   : > { %v3253_v59 = vpack.c.bf16 %v1764_v26, %v1762_v6  ;;  %v1955_v40 = vadd.f32 %v1954_v41, %v4974_v62  ;;  %v1956_v5 = vpop.f32.mrb[39].mxu0  ;;  %v1770_v30 = vadd.f32 %v1769_v49, %v4966_v13  ;;  %v1771_v11 = vpop.f32.mrb[42].mxu1  ;;  %s5218_s10 = scalar_lea.hbm %s5319_s4, %s4986_s6  ;;  %s2836_s12 = sshll.u32 %s5007_s30, 4  ;;  %s5262_s12 = int_to_ptr.vmem [resolvable:$true] %s2836_s12 }
 0x2cd   : > { %v3284_v28 = vpack.c.bf16 %v1953_v57, %v1951_v17  ;;  %v1957_v1 = vadd.f32 %v1956_v5, %v4979_v18  ;;  %v1772_v39 = vadd.f32 %v1771_v11, %v4960_v2  ;;  %v1773_v22 = vpop.f32.mrb[43].mxu1  ;;  %v1960_v31 = vpop.f32.mrb[40].mxu0  ;;  %s5226_s17 = scalar_lea.sflag [#allocation9], %s2776_s25  ;;  %s3732_s21 = scalar_lea.vmem %s5220_s29, 4096 }
 0x2ce   : > { %2518 = vst [vmem:[%s4989_s9 + $0x18] sm:$0xff] %v3253_v59  ;;  %v3254_v4 = vpack.c.bf16 %v1770_v30, %v1768_v12  ;;  %v1774_v38 = vadd.f32 %v1773_v22, %v4966_v13  ;;  %v1961_v37 = vadd.f32 %v1960_v31, %v4974_v62  ;;  %v1962_v56 = vpop.f32.mrb[41].mxu0  ;;  %v1777_v27 = vpop.f32.mrb[44].mxu1  ;;  %p3733_p11 = scmp.ne.s32.totalorder %s5220_s29, %s3732_s21  ;;  %s3861_s16 = smov [#allocation8]  }
 0x2cf   : > { %2741 = vst [vmem:[%s5007_s30 + $0x10] sm:$0xff] %v3284_v28  ;;  %v3285_v10 = vpack.c.bf16 %v1957_v1, %v1955_v40  ;;  %v1963_v47 = vadd.f32 %v1962_v56, %v4979_v18  ;;  %v1964_v14 = vpop.f32.mrb[42].mxu0  ;;  %v1778_v16 = vadd.f32 %v1777_v27, %v4960_v2  ;;  %v1779_v43 = vpop.f32.mrb[45].mxu1  ;;  %s3736_s26 = sshll.u32 %s3861_s16, 4  ;;  %s3737_s26 = int_to_ptr.vmem [resolvable:$false] %s3736_s26 }
 0x2d0   : > { %2519 = vst [vmem:[%s4989_s9 + $0x20] sm:$0xff] %v3254_v4  ;;  %v3255_v54 = vpack.c.bf16 %v1774_v38, %v1772_v39  ;;  %v1965_v58 = vadd.f32 %v1964_v14, %v4974_v62  ;;  %v1966_v35 = vpop.f32.mrb[43].mxu0  ;;  %v1780_v46 = vadd.f32 %v1779_v43, %v4966_v13  ;;  %v1781_v45 = vpop.f32.mrb[46].mxu1  ;;  %p3734_p0 = pnand %p3733_p11, %p3987_p10  ;;  %s3738_s28 = scalar_lea.vmem %s3737_s26, 8192 }
 0x2d1   : > { %2742 = vst [vmem:[%s5007_s30 + $0x18] sm:$0xff] %v3285_v10  ;;  %v3286_v42 = vpack.c.bf16 %v1963_v47, %v1961_v37  ;;  %v1967_v51 = vadd.f32 %v1966_v35, %v4979_v18  ;;  %v1782_v33 = vadd.f32 %v1781_v45, %v4960_v2  ;;  %v1783_v48 = vpop.f32.mrb[47].mxu1  ;;  %v1970_v0 = vpop.f32.mrb[44].mxu0  ;;  %p3739_p9 = scmp.lt.s32.totalorder %s5220_s29, %s3737_s26  ;;  %p3740_p1 = scmp.lt.s32.totalorder %s3738_s28, %s3732_s21 }
 0x2d2   : > { %2520 = vst [vmem:[%s4989_s9 + $0x28] sm:$0xff] %v3255_v54  ;;  %v3256_v20 = vpack.c.bf16 %v1780_v46, %v1778_v16  ;;  %v1784_v60 = vadd.f32 %v1783_v48, %v4966_v13  ;;  %v1971_v61 = vadd.f32 %v1970_v0, %v4974_v62  ;;  %v1972_v25 = vpop.f32.mrb[45].mxu0  ;;  %v1787_v19 = vpop.f32.mrb[48].mxu1  ;;  %p3735_p5 = pneg %p3734_p0 }
 0x2d3   : > { %2743 = vst [vmem:[%s5007_s30 + $0x20] sm:$0xff] %v3286_v42  ;;  %v3287_v23 = vpack.c.bf16 %v1967_v51, %v1965_v58  ;;  %v1973_v53 = vadd.f32 %v1972_v25, %v4979_v18  ;;  %v1974_v8 = vpop.f32.mrb[46].mxu0  ;;  %v1788_v15 = vadd.f32 %v1787_v19, %v4960_v2  ;;  %v1789_v63 = vpop.f32.mrb[49].mxu1  ;;  %p3741_p2 = por %p3740_p1, %p3739_p9 }
 0x2d4   : > { %2521 = vst [vmem:[%s4989_s9 + $0x30] sm:$0xff] %v3256_v20  ;;  %v3257_v36 = vpack.c.bf16 %v1784_v60, %v1782_v33  ;;  %v1975_v7 = vadd.f32 %v1974_v8, %v4974_v62  ;;  %v1976_v52 = vpop.f32.mrb[47].mxu0  ;;  %v1790_v55 = vadd.f32 %v1789_v63, %v4966_v13  ;;  %v1791_v34 = vpop.f32.mrb[50].mxu1 }
 0x2d5   : > { %2744 = vst [vmem:[%s5007_s30 + $0x28] sm:$0xff] %v3287_v23  ;;  %v3288_v3 = vpack.c.bf16 %v1973_v53, %v1971_v61  ;;  %v1977_v21 = vadd.f32 %v1976_v52, %v4979_v18  ;;  %v1792_v6 = vadd.f32 %v1791_v34, %v4960_v2  ;;  %v1793_v50 = vpop.f32.mrb[51].mxu1  ;;  %v1980_v44 = vpop.f32.mrb[48].mxu0  ;;  %p3742_p3 = pnand %p3741_p2, %p3735_p5 }
 0x2d6   : > { %2522 = vst [vmem:[%s4989_s9 + $0x38] sm:$0xff] %v3257_v36  ;;  %v3258_v24 = vpack.c.bf16 %v1790_v55, %v1788_v15  ;;  %v1794_v26 = vadd.f32 %v1793_v50, %v4966_v13  ;;  %v1981_v17 = vadd.f32 %v1980_v44, %v4974_v62  ;;  %v1982_v32 = vpop.f32.mrb[49].mxu0 }
 0x2d7   : > { %2745 = vst [vmem:[%s5007_s30 + $0x30] sm:$0xff] %v3288_v3  ;;  %v3289_v9 = vpack.c.bf16 %v1977_v21, %v1975_v7  ;;  %v1983_v57 = vadd.f32 %v1982_v32, %v4979_v18  ;;  %v1984_v41 = vpop.f32.mrb[50].mxu0 }
 0x2d8   : > { %2523 = vst [vmem:[%s4989_s9 + $0x40] sm:$0xff] %v3258_v24  ;;  %v3259_v59 = vpack.c.bf16 %v1794_v26, %v1792_v6  ;;  %v1985_v40 = vadd.f32 %v1984_v41, %v4974_v62  ;;  %v1986_v5 = vpop.f32.mrb[51].mxu0 }
 0x2d9   : > { %2746 = vst [vmem:[%s5007_s30 + $0x38] sm:$0xff] %v3289_v9  ;;  %v3290_v28 = vpack.c.bf16 %v1983_v57, %v1981_v17  ;;  %v1987_v1 = vadd.f32 %v1986_v5, %v4979_v18 }
 0x2da   : > { %2524 = vst [vmem:[%s4989_s9 + $0x48] sm:$0xff] %v3259_v59  ;;  %v1797_v29 = vpop.f32.mrb[52].mxu1 }
 0x2db   : > { %v1798_v12 = vadd.f32 %v1797_v29, %v4960_v2  ;;  %v1799_v49 = vpop.f32.mrb[53].mxu1  ;;  %2747 = vst [vmem:[%s5007_s30 + $0x40] sm:$0xff] %v3290_v28  ;;  %v3291_v10 = vpack.c.bf16 %v1987_v1, %v1985_v40 }
 0x2dc   : > { %v1800_v30 = vadd.f32 %v1799_v49, %v4966_v13  ;;  %v1801_v11 = vpop.f32.mrb[54].mxu1 }
 0x2dd   : > { %v1802_v39 = vadd.f32 %v1801_v11, %v4960_v2  ;;  %v1803_v22 = vpop.f32.mrb[55].mxu1  ;;  %2748 = vst [vmem:[%s5007_s30 + $0x48] sm:$0xff] %v3291_v10  ;;  %v1990_v31 = vpop.f32.mrb[52].mxu0 }
 0x2de   : > { %v3260_v4 = vpack.c.bf16 %v1800_v30, %v1798_v12  ;;  %v1804_v38 = vadd.f32 %v1803_v22, %v4966_v13  ;;  %v1991_v37 = vadd.f32 %v1990_v31, %v4974_v62  ;;  %v1992_v56 = vpop.f32.mrb[53].mxu0 }
 0x2df   : > { %v1993_v47 = vadd.f32 %v1992_v56, %v4979_v18  ;;  %v1994_v14 = vpop.f32.mrb[54].mxu0 }
 0x2e0   : > { %2525 = vst [vmem:[%s4989_s9 + $0x50] sm:$0xff] %v3260_v4  ;;  %v3261_v54 = vpack.c.bf16 %v1804_v38, %v1802_v39  ;;  %v1995_v58 = vadd.f32 %v1994_v14, %v4974_v62  ;;  %v1996_v35 = vpop.f32.mrb[55].mxu0 }
 0x2e1   : > { %v3292_v42 = vpack.c.bf16 %v1993_v47, %v1991_v37  ;;  %v1997_v51 = vadd.f32 %v1996_v35, %v4979_v18 }
 0x2e2   : > { %2526 = vst [vmem:[%s4989_s9 + $0x58] sm:$0xff] %v3261_v54  ;;  %v1807_v27 = vpop.f32.mrb[56].mxu1 }
 0x2e3   : > { %v1808_v16 = vadd.f32 %v1807_v27, %v4960_v2  ;;  %v1809_v43 = vpop.f32.mrb[57].mxu1  ;;  %2749 = vst [vmem:[%s5007_s30 + $0x50] sm:$0xff] %v3292_v42  ;;  %v3293_v23 = vpack.c.bf16 %v1997_v51, %v1995_v58 }
 0x2e4   : > { %v1810_v46 = vadd.f32 %v1809_v43, %v4966_v13  ;;  %v1811_v45 = vpop.f32.mrb[58].mxu1 }
 0x2e5   : > { %v1812_v33 = vadd.f32 %v1811_v45, %v4960_v2  ;;  %v1813_v48 = vpop.f32.mrb[59].mxu1  ;;  %2750 = vst [vmem:[%s5007_s30 + $0x58] sm:$0xff] %v3293_v23  ;;  %v2000_v0 = vpop.f32.mrb[56].mxu0 }
 0x2e6   : > { %v3262_v20 = vpack.c.bf16 %v1810_v46, %v1808_v16  ;;  %v1814_v60 = vadd.f32 %v1813_v48, %v4966_v13  ;;  %v2001_v61 = vadd.f32 %v2000_v0, %v4974_v62  ;;  %v2002_v25 = vpop.f32.mrb[57].mxu0 }
 0x2e7   : > { %v2003_v53 = vadd.f32 %v2002_v25, %v4979_v18  ;;  %v2004_v8 = vpop.f32.mrb[58].mxu0 }
 0x2e8   : > { %2527 = vst [vmem:[%s4989_s9 + $0x60] sm:$0xff] %v3262_v20  ;;  %v3263_v36 = vpack.c.bf16 %v1814_v60, %v1812_v33  ;;  %v2005_v7 = vadd.f32 %v2004_v8, %v4974_v62  ;;  %v2006_v52 = vpop.f32.mrb[59].mxu0 }
 0x2e9   : > { %v3294_v3 = vpack.c.bf16 %v2003_v53, %v2001_v61  ;;  %v2007_v21 = vadd.f32 %v2006_v52, %v4979_v18 }
 0x2ea   : > { %2528 = vst [vmem:[%s4989_s9 + $0x68] sm:$0xff] %v3263_v36  ;;  %v1817_v19 = vpop.f32.mrb[60].mxu1 }
 0x2eb   : > { %v1818_v15 = vadd.f32 %v1817_v19, %v4960_v2  ;;  %v1819_v63 = vpop.f32.mrb[61].mxu1  ;;  %2751 = vst [vmem:[%s5007_s30 + $0x60] sm:$0xff] %v3294_v3  ;;  %v3295_v9 = vpack.c.bf16 %v2007_v21, %v2005_v7 }
 0x2ec   : > { %v1820_v55 = vadd.f32 %v1819_v63, %v4966_v13  ;;  %v1821_v34 = vpop.f32.mrb[62].mxu1 }
 0x2ed   : > { %v1822_v6 = vadd.f32 %v1821_v34, %v4960_v2  ;;  %v1823_v50 = vpop.f32.mrb[63].mxu1  ;;  %2752 = vst [vmem:[%s5007_s30 + $0x68] sm:$0xff] %v3295_v9  ;;  %v2010_v44 = vpop.f32.mrb[60].mxu0 }
 0x2ee   : > { %v3264_v24 = vpack.c.bf16 %v1820_v55, %v1818_v15  ;;  %v1824_v26 = vadd.f32 %v1823_v50, %v4966_v13  ;;  %v2011_v17 = vadd.f32 %v2010_v44, %v4974_v62  ;;  %v2012_v32 = vpop.f32.mrb[61].mxu0 }
 0x2ef   : > { %v2013_v57 = vadd.f32 %v2012_v32, %v4979_v18  ;;  %v2014_v41 = vpop.f32.mrb[62].mxu0 }
 0x2f0   : > { %2529 = vst [vmem:[%s4989_s9 + $0x70] sm:$0xff] %v3264_v24  ;;  %v3265_v59 = vpack.c.bf16 %v1824_v26, %v1822_v6  ;;  %v2015_v40 = vadd.f32 %v2014_v41, %v4974_v62  ;;  %v2016_v5 = vpop.f32.mrb[63].mxu0 }
 0x2f1   : > { %v3296_v28 = vpack.c.bf16 %v2013_v57, %v2011_v17  ;;  %v2017_v1 = vadd.f32 %v2016_v5, %v4979_v18 }
 0x2f2   : > { %2530 = vst [vmem:[%s4989_s9 + $0x78] sm:$0xff] %v3265_v59  ;;  %v1827_v29 = vpop.f32.mrb[64].mxu1 }
 0x2f3   : > { %v1828_v12 = vadd.f32 %v1827_v29, %v4960_v2  ;;  %v1829_v49 = vpop.f32.mrb[65].mxu1  ;;  %2753 = vst [vmem:[%s5007_s30 + $0x70] sm:$0xff] %v3296_v28  ;;  %v3297_v10 = vpack.c.bf16 %v2017_v1, %v2015_v40 }
 0x2f4   : > { %v1830_v30 = vadd.f32 %v1829_v49, %v4966_v13  ;;  %v1831_v11 = vpop.f32.mrb[66].mxu1 }
 0x2f5   : > { %v1832_v39 = vadd.f32 %v1831_v11, %v4960_v2  ;;  %v1833_v22 = vpop.f32.mrb[67].mxu1  ;;  %2754 = vst [vmem:[%s5007_s30 + $0x78] sm:$0xff] %v3297_v10  ;;  %v2020_v31 = vpop.f32.mrb[64].mxu0 }
 0x2f6   : > { %v3266_v4 = vpack.c.bf16 %v1830_v30, %v1828_v12  ;;  %v1834_v38 = vadd.f32 %v1833_v22, %v4966_v13  ;;  %v2021_v37 = vadd.f32 %v2020_v31, %v4974_v62  ;;  %v2022_v56 = vpop.f32.mrb[65].mxu0 }
 0x2f7   : > { %v2023_v47 = vadd.f32 %v2022_v56, %v4979_v18  ;;  %v2024_v14 = vpop.f32.mrb[66].mxu0 }
 0x2f8   : > { %2531 = vst [vmem:[%s4989_s9 + $0x80] sm:$0xff] %v3266_v4  ;;  %v3267_v54 = vpack.c.bf16 %v1834_v38, %v1832_v39  ;;  %v2025_v58 = vadd.f32 %v2024_v14, %v4974_v62  ;;  %v2026_v35 = vpop.f32.mrb[67].mxu0 }
 0x2f9   : > { %v3298_v42 = vpack.c.bf16 %v2023_v47, %v2021_v37  ;;  %v2027_v51 = vadd.f32 %v2026_v35, %v4979_v18 }
 0x2fa   : > { %2532 = vst [vmem:[%s4989_s9 + $0x88] sm:$0xff] %v3267_v54  ;;  %v1837_v27 = vpop.f32.mrb[68].mxu1 }
 0x2fb   : > { %v1838_v16 = vadd.f32 %v1837_v27, %v4960_v2  ;;  %v1839_v43 = vpop.f32.mrb[69].mxu1  ;;  %2755 = vst [vmem:[%s5007_s30 + $0x80] sm:$0xff] %v3298_v42  ;;  %v3299_v23 = vpack.c.bf16 %v2027_v51, %v2025_v58 }
 0x2fc   : > { %v1840_v46 = vadd.f32 %v1839_v43, %v4966_v13  ;;  %v1841_v45 = vpop.f32.mrb[70].mxu1 }
 0x2fd   : > { %v1842_v33 = vadd.f32 %v1841_v45, %v4960_v2  ;;  %v1843_v48 = vpop.f32.mrb[71].mxu1  ;;  %2756 = vst [vmem:[%s5007_s30 + $0x88] sm:$0xff] %v3299_v23  ;;  %v2030_v0 = vpop.f32.mrb[68].mxu0 }
 0x2fe   : > { %v3268_v20 = vpack.c.bf16 %v1840_v46, %v1838_v16  ;;  %v1844_v60 = vadd.f32 %v1843_v48, %v4966_v13  ;;  %v2031_v61 = vadd.f32 %v2030_v0, %v4974_v62  ;;  %v2032_v25 = vpop.f32.mrb[69].mxu0 }
 0x2ff   : > { %v2033_v53 = vadd.f32 %v2032_v25, %v4979_v18  ;;  %v2034_v8 = vpop.f32.mrb[70].mxu0 }
 0x300   : > { %2533 = vst [vmem:[%s4989_s9 + $0x90] sm:$0xff] %v3268_v20  ;;  %v3269_v36 = vpack.c.bf16 %v1844_v60, %v1842_v33  ;;  %v2035_v7 = vadd.f32 %v2034_v8, %v4974_v62  ;;  %v2036_v52 = vpop.f32.mrb[71].mxu0 }
 0x301   : > { %v3300_v3 = vpack.c.bf16 %v2033_v53, %v2031_v61  ;;  %v2037_v21 = vadd.f32 %v2036_v52, %v4979_v18 }
 0x302   : > { %2534 = vst [vmem:[%s4989_s9 + $0x98] sm:$0xff] %v3269_v36  ;;  %v1847_v19 = vpop.f32.mrb[72].mxu1 }
 0x303   : > { %v1848_v15 = vadd.f32 %v1847_v19, %v4960_v2  ;;  %v1849_v63 = vpop.f32.mrb[73].mxu1  ;;  %2757 = vst [vmem:[%s5007_s30 + $0x90] sm:$0xff] %v3300_v3  ;;  %v3301_v9 = vpack.c.bf16 %v2037_v21, %v2035_v7 }
 0x304   : > { %v1850_v55 = vadd.f32 %v1849_v63, %v4966_v13  ;;  %v1851_v34 = vpop.f32.mrb[74].mxu1 }
 0x305   : > { %v1852_v6 = vadd.f32 %v1851_v34, %v4960_v2  ;;  %v1853_v50 = vpop.f32.mrb[75].mxu1  ;;  %2758 = vst [vmem:[%s5007_s30 + $0x98] sm:$0xff] %v3301_v9  ;;  %v2040_v44 = vpop.f32.mrb[72].mxu0 }
 0x306   : > { %v3270_v24 = vpack.c.bf16 %v1850_v55, %v1848_v15  ;;  %v1854_v26 = vadd.f32 %v1853_v50, %v4966_v13  ;;  %v2041_v17 = vadd.f32 %v2040_v44, %v4974_v62  ;;  %v2042_v32 = vpop.f32.mrb[73].mxu0 }
 0x307   : > { %v2043_v57 = vadd.f32 %v2042_v32, %v4979_v18  ;;  %v2044_v41 = vpop.f32.mrb[74].mxu0 }
 0x308   : > { %2535 = vst [vmem:[%s4989_s9 + $0xa0] sm:$0xff] %v3270_v24  ;;  %v3271_v59 = vpack.c.bf16 %v1854_v26, %v1852_v6  ;;  %v2045_v40 = vadd.f32 %v2044_v41, %v4974_v62  ;;  %v2046_v5 = vpop.f32.mrb[75].mxu0 }
 0x309   : > { %v3302_v28 = vpack.c.bf16 %v2043_v57, %v2041_v17  ;;  %v2047_v1 = vadd.f32 %v2046_v5, %v4979_v18 }
 0x30a   : > { %2536 = vst [vmem:[%s4989_s9 + $0xa8] sm:$0xff] %v3271_v59  ;;  %v1857_v29 = vpop.f32.mrb[76].mxu1 }
 0x30b   : > { %v1858_v12 = vadd.f32 %v1857_v29, %v4960_v2  ;;  %v1859_v49 = vpop.f32.mrb[77].mxu1  ;;  %2759 = vst [vmem:[%s5007_s30 + $0xa0] sm:$0xff] %v3302_v28  ;;  %v3303_v10 = vpack.c.bf16 %v2047_v1, %v2045_v40 }
 0x30c   : > { %v1860_v30 = vadd.f32 %v1859_v49, %v4966_v13  ;;  %v1861_v11 = vpop.f32.mrb[78].mxu1 }
 0x30d   : > { %v1862_v39 = vadd.f32 %v1861_v11, %v4960_v2  ;;  %v1863_v22 = vpop.f32.mrb[79].mxu1  ;;  %2760 = vst [vmem:[%s5007_s30 + $0xa8] sm:$0xff] %v3303_v10  ;;  %v2050_v31 = vpop.f32.mrb[76].mxu0 }
 0x30e   : > { %v3272_v4 = vpack.c.bf16 %v1860_v30, %v1858_v12  ;;  %v1864_v38 = vadd.f32 %v1863_v22, %v4966_v13  ;;  %v2051_v37 = vadd.f32 %v2050_v31, %v4974_v62  ;;  %v2052_v56 = vpop.f32.mrb[77].mxu0 }
 0x30f   : > { %v2053_v47 = vadd.f32 %v2052_v56, %v4979_v18  ;;  %v2054_v14 = vpop.f32.mrb[78].mxu0 }
 0x310   : > { %2537 = vst [vmem:[%s4989_s9 + $0xb0] sm:$0xff] %v3272_v4  ;;  %v3273_v54 = vpack.c.bf16 %v1864_v38, %v1862_v39  ;;  %v2055_v58 = vadd.f32 %v2054_v14, %v4974_v62  ;;  %v2056_v35 = vpop.f32.mrb[79].mxu0 }
 0x311   : > { %v3304_v42 = vpack.c.bf16 %v2053_v47, %v2051_v37  ;;  %v2057_v51 = vadd.f32 %v2056_v35, %v4979_v18 }
 0x312   : > { %2538 = vst [vmem:[%s4989_s9 + $0xb8] sm:$0xff] %v3273_v54  ;;  %v1867_v27 = vpop.f32.mrb[80].mxu1 }
 0x313   : > { %v1868_v16 = vadd.f32 %v1867_v27, %v4960_v2  ;;  %v1869_v43 = vpop.f32.mrb[81].mxu1  ;;  %2761 = vst [vmem:[%s5007_s30 + $0xb0] sm:$0xff] %v3304_v42  ;;  %v3305_v23 = vpack.c.bf16 %v2057_v51, %v2055_v58 }
 0x314   : > { %v1870_v46 = vadd.f32 %v1869_v43, %v4966_v13  ;;  %v1871_v45 = vpop.f32.mrb[82].mxu1 }
 0x315   : > { %v1872_v33 = vadd.f32 %v1871_v45, %v4960_v2  ;;  %v1873_v48 = vpop.f32.mrb[83].mxu1  ;;  %2762 = vst [vmem:[%s5007_s30 + $0xb8] sm:$0xff] %v3305_v23  ;;  %v2060_v0 = vpop.f32.mrb[80].mxu0 }
 0x316   : > { %v3274_v20 = vpack.c.bf16 %v1870_v46, %v1868_v16  ;;  %v1874_v60 = vadd.f32 %v1873_v48, %v4966_v13  ;;  %v2061_v61 = vadd.f32 %v2060_v0, %v4974_v62  ;;  %v2062_v25 = vpop.f32.mrb[81].mxu0 }
 0x317   : > { %v2063_v53 = vadd.f32 %v2062_v25, %v4979_v18  ;;  %v2064_v8 = vpop.f32.mrb[82].mxu0 }
 0x318   : > { %2539 = vst [vmem:[%s4989_s9 + $0xc0] sm:$0xff] %v3274_v20  ;;  %v3275_v36 = vpack.c.bf16 %v1874_v60, %v1872_v33  ;;  %v2065_v7 = vadd.f32 %v2064_v8, %v4974_v62  ;;  %v2066_v52 = vpop.f32.mrb[83].mxu0 }
 0x319   : > { %v3306_v3 = vpack.c.bf16 %v2063_v53, %v2061_v61  ;;  %v2067_v21 = vadd.f32 %v2066_v52, %v4979_v18 }
 0x31a   : > { %2540 = vst [vmem:[%s4989_s9 + $0xc8] sm:$0xff] %v3275_v36  ;;  %v1877_v19 = vpop.f32.mrb[84].mxu1 }
 0x31b   : > { %v1878_v15 = vadd.f32 %v1877_v19, %v4960_v2  ;;  %v1879_v63 = vpop.f32.mrb[85].mxu1  ;;  %2763 = vst [vmem:[%s5007_s30 + $0xc0] sm:$0xff] %v3306_v3  ;;  %v3307_v9 = vpack.c.bf16 %v2067_v21, %v2065_v7 }
 0x31c   : > { %v1880_v55 = vadd.f32 %v1879_v63, %v4966_v13  ;;  %v1881_v34 = vpop.f32.mrb[86].mxu1 }
 0x31d   : > { %v1882_v6 = vadd.f32 %v1881_v34, %v4960_v2  ;;  %v1883_v50 = vpop.f32.mrb[87].mxu1  ;;  %2764 = vst [vmem:[%s5007_s30 + $0xc8] sm:$0xff] %v3307_v9  ;;  %v2070_v44 = vpop.f32.mrb[84].mxu0 }
 0x31e   : > { %v3276_v24 = vpack.c.bf16 %v1880_v55, %v1878_v15  ;;  %v1884_v26 = vadd.f32 %v1883_v50, %v4966_v13  ;;  %v2071_v17 = vadd.f32 %v2070_v44, %v4974_v62  ;;  %v2072_v32 = vpop.f32.mrb[85].mxu0 }
 0x31f   : > { %v2073_v57 = vadd.f32 %v2072_v32, %v4979_v18  ;;  %v2074_v41 = vpop.f32.mrb[86].mxu0 }
 0x320   : > { %2541 = vst [vmem:[%s4989_s9 + $0xd0] sm:$0xff] %v3276_v24  ;;  %v3277_v59 = vpack.c.bf16 %v1884_v26, %v1882_v6  ;;  %v2075_v40 = vadd.f32 %v2074_v41, %v4974_v62  ;;  %v2076_v5 = vpop.f32.mrb[87].mxu0 }
 0x321   : > { %v3308_v28 = vpack.c.bf16 %v2073_v57, %v2071_v17  ;;  %v2077_v1 = vadd.f32 %v2076_v5, %v4979_v18 }
 0x322   : > { %2542 = vst [vmem:[%s4989_s9 + $0xd8] sm:$0xff] %v3277_v59  ;;  %v1887_v29 = vpop.f32.mrb[88].mxu1 }
 0x323   : > { %v1888_v12 = vadd.f32 %v1887_v29, %v4960_v2  ;;  %v1889_v49 = vpop.f32.mrb[89].mxu1  ;;  %2765 = vst [vmem:[%s5007_s30 + $0xd0] sm:$0xff] %v3308_v28  ;;  %v3309_v10 = vpack.c.bf16 %v2077_v1, %v2075_v40 }
 0x324   : > { %v1890_v30 = vadd.f32 %v1889_v49, %v4966_v13  ;;  %v1891_v11 = vpop.f32.mrb[90].mxu1 }
 0x325   : > { %v1892_v39 = vadd.f32 %v1891_v11, %v4960_v2  ;;  %v1893_v22 = vpop.f32.mrb[91].mxu1  ;;  %2766 = vst [vmem:[%s5007_s30 + $0xd8] sm:$0xff] %v3309_v10  ;;  %v2080_v31 = vpop.f32.mrb[88].mxu0 }
 0x326   : > { %v3278_v4 = vpack.c.bf16 %v1890_v30, %v1888_v12  ;;  %v1894_v38 = vadd.f32 %v1893_v22, %v4966_v13  ;;  %v2081_v37 = vadd.f32 %v2080_v31, %v4974_v62  ;;  %v2082_v56 = vpop.f32.mrb[89].mxu0 }
 0x327   : > { %v2083_v47 = vadd.f32 %v2082_v56, %v4979_v18  ;;  %v2084_v14 = vpop.f32.mrb[90].mxu0 }
 0x328   : > { %2543 = vst [vmem:[%s4989_s9 + $0xe0] sm:$0xff] %v3278_v4  ;;  %v3279_v54 = vpack.c.bf16 %v1894_v38, %v1892_v39  ;;  %v2085_v58 = vadd.f32 %v2084_v14, %v4974_v62  ;;  %v2086_v35 = vpop.f32.mrb[91].mxu0 }
 0x329   : > { %v3310_v42 = vpack.c.bf16 %v2083_v47, %v2081_v37  ;;  %v2087_v51 = vadd.f32 %v2086_v35, %v4979_v18 }
 0x32a   : > { %2544 = vst [vmem:[%s4989_s9 + $0xe8] sm:$0xff] %v3279_v54  ;;  %v1897_v27 = vpop.f32.mrb[92].mxu1 }
 0x32b   : > { %v1898_v16 = vadd.f32 %v1897_v27, %v4960_v2  ;;  %v1899_v43 = vpop.f32.mrb[93].mxu1  ;;  %2767 = vst [vmem:[%s5007_s30 + $0xe0] sm:$0xff] %v3310_v42  ;;  %v3311_v23 = vpack.c.bf16 %v2087_v51, %v2085_v58 }
 0x32c   : > { %v1900_v46 = vadd.f32 %v1899_v43, %v4966_v13  ;;  %v1901_v45 = vpop.f32.mrb[94].mxu1 }
 0x32d   : > { %v1902_v33 = vadd.f32 %v1901_v45, %v4960_v2  ;;  %v1903_v48 = vpop.f32.mrb[95].mxu1  ;;  %2768 = vst [vmem:[%s5007_s30 + $0xe8] sm:$0xff] %v3311_v23  ;;  %v2090_v0 = vpop.f32.mrb[92].mxu0 }
 0x32e   : > { %v3280_v20 = vpack.c.bf16 %v1900_v46, %v1898_v16  ;;  %v1904_v60 = vadd.f32 %v1903_v48, %v4966_v13  ;;  %v2091_v61 = vadd.f32 %v2090_v0, %v4974_v62  ;;  %v2092_v25 = vpop.f32.mrb[93].mxu0 }
 0x32f   : > { %v2093_v53 = vadd.f32 %v2092_v25, %v4979_v18  ;;  %v2094_v8 = vpop.f32.mrb[94].mxu0 }
 0x330   : > { %2545 = vst [vmem:[%s4989_s9 + $0xf0] sm:$0xff] %v3280_v20  ;;  %v3281_v36 = vpack.c.bf16 %v1904_v60, %v1902_v33  ;;  %v2095_v2 = vadd.f32 %v2094_v8, %v4974_v62  ;;  %v2096_v13 = vpop.f32.mrb[95].mxu0 }
 0x331   : > { %v3312_v7 = vpack.c.bf16 %v2093_v53, %v2091_v61  ;;  %v2097_v52 = vadd.f32 %v2096_v13, %v4979_v18 }
 0x332   : > { %2546 = vst [vmem:[%s4989_s9 + $0xf8] sm:$0xff] %v3281_v36 }
 0x333   : > { %3745 = shalt.err (!%p3742_p3)
}
 0x334   : > { %s3746_s9 = scalar_lea.hbm %s5218_s10, 4096  ;;  %s3750_s15 = scalar_lea.hbm %s5319_s4, 8192 }
 0x335   : > { %p3747_p7 = scmp.ne.s32.totalorder %s5218_s10, %s3746_s9  ;;  %p3751_p6 = scmp.lt.u32.totalorder %s5218_s10, %s5319_s4 }
 0x336   : > { %p3752_p8 = scmp.lt.u32.totalorder %s3750_s15, %s3746_s9  ;;  %p3754_p11 = scmp.lt.u32.totalorder %s3746_s9, %s5218_s10 }
 0x337   : > { %p3748_p13 = pnand %p3747_p7, %p3987_p10 }
 0x338   : > { %p3753_p12 = por %p3752_p8, %p3751_p6 }
 0x339   : > { %p3749_p4 = pneg %p3748_p13 }
 0x33a   : > { %p3755_p0 = por %p3754_p11, %p3753_p12 }
 0x33c   : > { %p3756_p5 = pnand %p3755_p0, %p3749_p4 }
 0x33e   : > { %3759 = shalt.err (!%p3756_p5)
}
 0x33f   : > { %3356 = dma.vmem_to_hbm [thread:$0]  (%p3987_p10), %s5220_s29, 4096, %s5218_s10, %s5226_s17, %s3859_s14, %s3859_s14, %s3860_s8   ;;  %v3313_v62 = vpack.c.bf16 %v2097_v52, %v2095_v2 }
 0x340   : > { %2769 = vst [vmem:[%s5007_s30 + $0xf0] sm:$0xff] %v3312_v7  ;;  %s5258_s9 = scalar_lea.hbm %s5320_s5, %s4986_s6  ;;  %s3760_s25 = scalar_lea.vmem %s5262_s12, 4096 }
 0x341   : > { %2770 = vst [vmem:[%s5007_s30 + $0xf8] sm:$0xff] %v3313_v62  ;;  %p3761_p9 = scmp.ne.s32.totalorder %s5262_s12, %s3760_s25  ;;  %s3862_s29 = smov [#allocation10]  }
 0x342   : > { %s3764_s10 = sshll.u32 %s3862_s29, 4  ;;  %s3765_s10 = int_to_ptr.vmem [resolvable:$false] %s3764_s10 }
 0x343   : > { %p3762_p1 = pnand %p3761_p9, %p3987_p10  ;;  %s3766_s24 = scalar_lea.vmem %s3765_s10, 8192 }
 0x344   : > { %p3767_p3 = scmp.lt.s32.totalorder %s5262_s12, %s3765_s10  ;;  %p3768_p7 = scmp.lt.s32.totalorder %s3766_s24, %s3760_s25 }
 0x345   : > { %p3763_p2 = pneg %p3762_p1 }
 0x346   : > { %p3769_p13 = por %p3768_p7, %p3767_p3 }
 0x348   : > { %p3770_p4 = pnand %p3769_p13, %p3763_p2 }
 0x34a   : > { %3773 = shalt.err (!%p3770_p4)
}
 0x34b   : > { %s3774_s6 = scalar_lea.hbm %s5258_s9, 4096  ;;  %s3778_s16 = scalar_lea.hbm %s5320_s5, 8192 }
 0x34c   : > { %p3775_p6 = scmp.ne.s32.totalorder %s5258_s9, %s3774_s6  ;;  %p3779_p11 = scmp.lt.u32.totalorder %s5258_s9, %s5320_s5 }
 0x34d   : > { %p3780_p0 = scmp.lt.u32.totalorder %s3778_s16, %s3774_s6  ;;  %p3782_p9 = scmp.lt.u32.totalorder %s3774_s6, %s5258_s9 }
 0x34e   : > { %p3776_p8 = pnand %p3775_p6, %p3987_p10 }
 0x34f   : > { %p3781_p5 = por %p3780_p0, %p3779_p11 }
 0x350   : > { %p3777_p12 = pneg %p3776_p8 }
 0x351   : > { %p3783_p1 = por %p3782_p9, %p3781_p5 }
 0x353   : > { %p3784_p2 = pnand %p3783_p1, %p3777_p12 }
 0x355   : > { %3787 = shalt.err (!%p3784_p2)
}
 0x356   : > { %3357 = dma.vmem_to_hbm [thread:$0]  (%p3987_p10), %s5262_s12, 4096, %s5258_s9, %s5226_s17, %s3859_s14, %s3859_s14, %s3860_s8  }
 0x357 PF: > { %s2851_s28 = sand.u32 1, %s3830_s18   ;;  %p5447_p3 = scmp.ne.s32.totalorder %s5364_s27, 0 }
 0x358   : > { %p5448_p7 = scmp.ge.s32.totalorder %s3850_s23, 2  ;;  %s2852_s25 = scalar_lea.sflag [#allocation4], %s2851_s28 }
 0x35a   : > { %p3370_p13 = pnand %p5448_p7, %p5447_p3 }
 0x35c   : > { %3821 = dma.done.wait (!%p3370_p13), %s2852_s25, 4096  }
 0x35d   : > { %3823 = vsyncadd (!%p3370_p13), %s2852_s25, 4294963200  ;;  %s5449_s11 = sadd.s32 4294967294, %s3850_s23  }
 0x35e   : > { %s2860_s29 = sand.u32 1, %s5449_s11  }
 0x35f   : > { %s2861_s10 = scalar_lea.sflag [#allocation9], %s2860_s29 }
 0x360   : > { %3825 = dma.done.wait (!%p3370_p13), %s2861_s10, 8192  }
 0x361   : > { %3827 = vsyncadd (!%p3370_p13), %s2861_s10, 4294959104  ;;  %s26_s23 = sadd.s32 1, %s3850_s23   ;;  %s5450_s18 = smov %s3834_s19 }
 0x362   : > { %p23_p10 = scmp.ge.s32.totalorder %s26_s23, 4   ;;  %s5451_s19 = smov %s3838_s20 }
 0x363   : > { %s5452_s20 = smov %s3996_s13  ;;  %s5453_s21 = smov %s3846_s22 }
 0x364   : > { %s5454_s22 = smov %s5456_s7  ;;  %25 = sbr.rel (!%p23_p10) target bundleno = 9 (0x9), region = 113 }
 0x36b   :  { %2875 = vsyncpa [#allocation3], 1 }
 0x36c   :  { %2877 = vsyncpa [#allocation3 + $0x1], 1 }
 0x36d   :  { %2878 = vsyncpa [#allocation6], 1 }
 0x36e   :  { %2879 = vsyncpa [#allocation4], 1 }
 0x36f   :  { %2881 = vsyncpa [#allocation4 + $0x1], 1 }
 0x370   :  { %2882 = vsyncpa [#allocation9], 1 }
 0x371   :  { %2884 = vsyncpa [#allocation9 + $0x1], 1 }

</bundles_post_ra>
